<compile_context>
chip_gen: v6e
topology: v6e:2x2x1
jax: 0.10.0
libtpu: 0.0.40
codegen_flags: <defaults>
</compile_context>

<pallas_src>
import functools

import jax
import jax.numpy as jnp
from jax.experimental import pallas as pl
from jax.experimental.pallas import tpu as pltpu


# --------------------------------------------------------------------------- conv + stats kernel
def _conv3x3_stats_kernel(x_ref, w_ref, scale_ref, bias_ref,
                          y_ref, sum_ref, sumsq_ref,
                          xpad_ref, acc_ref, *, apply_prenorm):
    """One 3x3 'same' conv stage on a (1, H, W, Cin) batch tile.

    x_ref     : (1, H, W, Cin)      bf16 input tile (pre-BN conv output of the previous
                                    stage when apply_prenorm=True)
    w_ref     : (9, Cin, Cout)      bf16 conv taps, tap index = ky*3 + kx
    scale_ref : (1, Cin)  f32       previous-stage BN scale = gamma * rsqrt(var + eps)
    bias_ref  : (1, Cin)  f32       previous-stage BN bias  = beta - mean * scale
    y_ref     : (1, H, W, Cout)     pre-BN conv output tile
    sum_ref   : (1, 1, Cout) f32    per-tile partial  sum(y)   over (H, W)
    sumsq_ref : (1, 1, Cout) f32    per-tile partial  sum(y^2) over (H, W)
    xpad_ref  : (1, H+2, W+2, Cin)  f32 VMEM scratch (zero 1-pixel halo)
    acc_ref   : (1, H, W, Cout)     f32 VMEM accumulator scratch
    """
    H, W = y_ref.shape[1], y_ref.shape[2]
    Cin = x_ref.shape[-1]

    x = x_ref[...].astype(jnp.float32)
    if apply_prenorm:
        # Previous stage's BatchNorm + ReLU folded into this stage's read (two-pass BN).
        scale = scale_ref[...].reshape(1, 1, 1, Cin)
        bias = bias_ref[...].reshape(1, 1, 1, Cin)
        x = jnp.maximum(x * scale + bias, 0.0)

    # Zero-filled 1-pixel halo built in VMEM (padding=1).  No wrapper-side jnp.pad, so the
    # input is never re-read / re-written through HBM just to pad it.  The scratch is
    # re-zeroed every step: with "parallel" grid semantics each core owns its own scratch
    # and is not guaranteed to execute step 0.
    xpad_ref[...] = jnp.zeros(xpad_ref.shape, xpad_ref.dtype)
    xpad_ref[:, 1:H + 1, 1:W + 1, :] = x

    # 3x3 'same' conv as 9 shifted (Cin -> Cout) MXU matmuls, bf16 in / f32 accumulation.
    # The kx (sublane-axis) shift is hoisted: only 3 W-slices (2 of them misaligned) are
    # materialized; the ky slices run along H (neither sublane nor lane) and are nearly free.
    for kx in range(3):
        xk = xpad_ref[:, :, kx:kx + W, :].astype(jnp.bfloat16)      # (1, H+2, W, Cin)
        part = None
        for ky in range(3):
            patch = xk[:, ky:ky + H, :, :]                          # (1, H, W, Cin)
            tap = w_ref[ky * 3 + kx]                                # (Cin, Cout) bf16
            d = jax.lax.dot_general(
                patch, tap,
                dimension_numbers=(((3,), (0,)), ((), ())),
                preferred_element_type=jnp.float32)                 # (1, H, W, Cout) f32
            part = d if part is None else part + d
        # Accumulate into a VMEM scratch (bounds vreg live-range / spill risk at real tiles).
        if kx == 0:
            acc_ref[...] = part
        else:
            acc_ref[...] = acc_ref[...] + part

    acc = acc_ref[...]
    y_ref[...] = acc.astype(y_ref.dtype)

    # Per-tile partial BatchNorm statistics (two-pass BN): reduced across tiles outside the
    # kernel, so the grid stays freely tileable / megacore-parallel without a cross-tile
    # in-kernel reduction.
    sum_ref[...] = jnp.sum(acc, axis=(1, 2))[:, None, :]
    sumsq_ref[...] = jnp.sum(acc * acc, axis=(1, 2))[:, None, :]


def _conv3x3_stats(x_nhwc, w9, prev_scale, prev_bias, *, apply_prenorm, out_dtype):
    """pallas_call wrapper: returns (pre-BN conv output, partial sum, partial sumsq)."""
    N, H, W, Cin = x_nhwc.shape
    Cout = w9.shape[-1]
    kernel = functools.partial(_conv3x3_stats_kernel, apply_prenorm=apply_prenorm)
    return pl.pallas_call(
        kernel,
        out_shape=(
            jax.ShapeDtypeStruct((N, H, W, Cout), out_dtype),
            jax.ShapeDtypeStruct((N, 1, Cout), jnp.float32),
            jax.ShapeDtypeStruct((N, 1, Cout), jnp.float32),
        ),
        grid=(N,),
        in_specs=[
            pl.BlockSpec((1, H, W, Cin), lambda n: (n, 0, 0, 0)),
            pl.BlockSpec((9, Cin, Cout), lambda n: (0, 0, 0)),
            pl.BlockSpec((1, Cin), lambda n: (0, 0)),
            pl.BlockSpec((1, Cin), lambda n: (0, 0)),
        ],
        out_specs=(
            pl.BlockSpec((1, H, W, Cout), lambda n: (n, 0, 0, 0)),
            pl.BlockSpec((1, 1, Cout), lambda n: (n, 0, 0)),
            pl.BlockSpec((1, 1, Cout), lambda n: (n, 0, 0)),
        ),
        scratch_shapes=[
            pltpu.VMEM((1, H + 2, W + 2, Cin), jnp.float32),   # zero-halo input scratch
            pltpu.VMEM((1, H, W, Cout), jnp.float32),          # f32 accumulator
        ],
        compiler_params=pltpu.CompilerParams(
            dimension_semantics=("parallel",),                 # batch tiles independent (v7x 2 TCs)
            vmem_limit_bytes=32 * 1024 * 1024,                 # safe on v5e/v6e/v7x; re-derive per gen
        ),
    )(x_nhwc, w9, prev_scale, prev_bias)


# ------------------------------------------------------------------------- final BN + ReLU kernel
def _bn_relu_kernel(y_ref, scale_ref, bias_ref, o_ref):
    C = y_ref.shape[-1]
    y = y_ref[...].astype(jnp.float32)
    scale = scale_ref[...].reshape(1, 1, 1, C)
    bias = bias_ref[...].reshape(1, 1, 1, C)
    o_ref[...] = jnp.maximum(y * scale + bias, 0.0).astype(o_ref.dtype)


def _bn_relu(y_nhwc, scale, bias):
    N, H, W, C = y_nhwc.shape
    return pl.pallas_call(
        _bn_relu_kernel,
        out_shape=jax.ShapeDtypeStruct((N, H, W, C), jnp.float32),
        grid=(N,),
        in_specs=[
            pl.BlockSpec((1, H, W, C), lambda n: (n, 0, 0, 0)),
            pl.BlockSpec((1, C), lambda n: (0, 0)),
            pl.BlockSpec((1, C), lambda n: (0, 0)),
        ],
        out_specs=pl.BlockSpec((1, H, W, C), lambda n: (n, 0, 0, 0)),
        compiler_params=pltpu.CompilerParams(
            dimension_semantics=("parallel",),
            vmem_limit_bytes=32 * 1024 * 1024,
        ),
    )(y_nhwc, scale, bias)


# -------------------------------------------------------------------------------- BN finalization
def _bn_scale_bias(part_sum, part_sumsq, count, gamma, beta, eps=1e-5):
    """Reduce per-tile partial stats -> per-channel affine (scale, bias) of train-mode BN."""
    s = jnp.sum(part_sum, axis=(0, 1))         # (C,)
    ss = jnp.sum(part_sumsq, axis=(0, 1))      # (C,)
    mean = s / count
    var = ss / count - mean * mean             # biased batch variance (PyTorch train-mode norm)
    inv = jax.lax.rsqrt(var + eps)
    scale = gamma * inv
    bias = beta - mean * scale
    return (scale.reshape(1, -1).astype(jnp.float32),
            bias.reshape(1, -1).astype(jnp.float32))


# ------------------------------------------------------------------------------------- DoubleConv
def _double_conv_nhwc(x_nhwc, params, eps=1e-5):
    N, H, W, Cin = x_nhwc.shape
    count = float(N * H * W)

    # bf16 MXU feed: inputs + taps in bf16 (halves HBM/VMEM traffic), f32 accumulation.
    x_bf16 = x_nhwc.astype(jnp.bfloat16)
    w1 = params["w1"].astype(jnp.bfloat16)
    w2 = params["w2"].astype(jnp.bfloat16)
    dummy_scale = jnp.ones((1, Cin), jnp.float32)
    dummy_bias = jnp.zeros((1, Cin), jnp.float32)

    # Stage 1: conv1 + per-tile BN1 partial stats (pre-BN intermediate kept in bf16).
    y1, s1, ss1 = _conv3x3_stats(x_bf16, w1, dummy_scale, dummy_bias,
                                 apply_prenorm=False, out_dtype=jnp.bfloat16)
    scale1, bias1 = _bn_scale_bias(s1, ss1, count, params["gamma1"], params["beta1"], eps)

    # Stage 2: BN1 + ReLU folded into conv2's read; conv2 + per-tile BN2 partial stats.
    y2, s2, ss2 = _conv3x3_stats(y1, w2, scale1, bias1,
                                 apply_prenorm=True, out_dtype=jnp.float32)
    scale2, bias2 = _bn_scale_bias(s2, ss2, count, params["gamma2"], params["beta2"], eps)

    # Final BN2 + ReLU (nothing downstream to fold it into).
    return _bn_relu(y2, scale2, bias2)


# ----------------------------------------------------------------------------- Up wrapper (NCHW)
def _bilinear_up2_nchw(x):
    """nn.Upsample(scale_factor=2, mode='bilinear', align_corners=True) on NCHW (XLA glue)."""
    N, C, H, W = x.shape
    Ho, Wo = 2 * H, 2 * W

    def grid1d(n_in, n_out):
        src = jnp.arange(n_out, dtype=jnp.float32) * (n_in - 1) / max(n_out - 1, 1)
        i0 = jnp.clip(jnp.floor(src).astype(jnp.int32), 0, max(n_in - 2, 0))
        frac = src - i0.astype(jnp.float32)
        i1 = jnp.minimum(i0 + 1, n_in - 1)
        return i0, i1, frac

    y0, y1, fy = grid1d(H, Ho)
    x0, x1, fx = grid1d(W, Wo)
    rows = (x[:, :, y0, :] * (1.0 - fy)[None, None, :, None]
            + x[:, :, y1, :] * fy[None, None, :, None])                    # (N, C, Ho, W)
    return rows[:, :, :, x0] * (1.0 - fx) + rows[:, :, :, x1] * fx         # (N, C, Ho, Wo)


@jax.jit
def up_forward(x1_nchw, x2_nchw, params):
    """Up.forward(x1, x2) with bilinear=True.  PyTorch-style NCHW in / NCHW out."""
    x1 = _bilinear_up2_nchw(x1_nchw)
    dy = x2_nchw.shape[2] - x1.shape[2]
    dx = x2_nchw.shape[3] - x1.shape[3]
    x1 = jnp.pad(x1, ((0, 0), (0, 0),
                      (dy // 2, dy - dy // 2),
                      (dx // 2, dx - dx // 2)))                            # F.pad
    x = jnp.concatenate([x2_nchw, x1], axis=1)                             # torch.cat(dim=1)
    x_nhwc = jnp.transpose(x, (0, 2, 3, 1))                                # NCHW -> NHWC
    y = _double_conv_nhwc(x_nhwc, params)
    return jnp.transpose(y, (0, 3, 1, 2))                                  # NHWC -> NCHW


# -------------------------------------------------------------------------------- params / ref
def init_up_params(key, in_channels, out_channels):
    """Up(in_channels, out_channels, bilinear=True): DoubleConv(in, out, mid=in // 2)."""
    mid_channels = in_channels // 2
    k1, k2, k3, k4, k5, k6 = jax.random.split(key, 6)

    def to_taps(w_oihw):  # torch Conv2d weight (Cout, Cin, 3, 3) -> (9, Cin, Cout), tap = ky*3+kx
        cout, cin = w_oihw.shape[0], w_oihw.shape[1]
        return jnp.transpose(w_oihw, (2, 3, 1, 0)).reshape(9, cin, cout)

    w1 = jax.random.normal(k1, (mid_channels, in_channels, 3, 3), jnp.float32) * 0.1
    w2 = jax.random.normal(k2, (out_channels, mid_channels, 3, 3), jnp.float32) * 0.1
    return dict(
        w1=to_taps(w1),
        gamma1=1.0 + 0.2 * jax.random.normal(k3, (mid_channels,), jnp.float32),
        beta1=0.1 * jax.random.normal(k4, (mid_channels,), jnp.float32),
        w2=to_taps(w2),
        gamma2=1.0 + 0.2 * jax.random.normal(k5, (out_channels,), jnp.float32),
        beta2=0.1 * jax.random.normal(k6, (out_channels,), jnp.float32),
    )


def _reference_up(x1_nchw, x2_nchw, params, *, bf16_conv_inputs):
    """Pure-JAX reference for Up.forward (conv_general_dilated + train-mode BN + ReLU)."""
    def conv(x_nhwc, w9):
        cin, cout = w9.shape[1], w9.shape[2]
        w = w9.reshape(3, 3, cin, cout)                                    # HWIO
        if bf16_conv_inputs:   # mirror the intentional bf16 MXU feed
            x_nhwc = x_nhwc.astype(jnp.bfloat16).astype(jnp.float32)
            w = w.astype(jnp.bfloat16).astype(jnp.float32)
        return jax.lax.conv_general_dilated(
            x_nhwc, w, window_strides=(1, 1), padding="SAME",
            dimension_numbers=("NHWC", "HWIO", "NHWC"))

    def bn_relu(y, gamma, beta):
        mean = jnp.mean(y, axis=(0, 1, 2), keepdims=True)
        var = jnp.mean((y - mean) ** 2, axis=(0, 1, 2), keepdims=True)
        y = (y - mean) * jax.lax.rsqrt(var + 1e-5) * gamma.reshape(1, 1, 1, -1) \
            + beta.reshape(1, 1, 1, -1)
        return jnp.maximum(y, 0.0)

    x1 = _bilinear_up2_nchw(x1_nchw)
    dy = x2_nchw.shape[2] - x1.shape[2]
    dx = x2_nchw.shape[3] - x1.shape[3]
    x1 = jnp.pad(x1, ((0, 0), (0, 0), (dy // 2, dy - dy // 2), (dx // 2, dx - dx // 2)))
    x = jnp.transpose(jnp.concatenate([x2_nchw, x1], axis=1), (0, 2, 3, 1))
    h = bn_relu(conv(x, params["w1"]), params["gamma1"], params["beta1"])
    y = bn_relu(conv(h, params["w2"]), params["gamma2"], params["beta2"])
    return jnp.transpose(y, (0, 3, 1, 2))


# ------------------------------------------------------------------------------------------ main
if __name__ == "__main__":
    key = jax.random.PRNGKey(0)
    k_x1, k_x2, k_p = jax.random.split(key, 3)

    # Up(in_channels=8, out_channels=8, bilinear=True):
    #   x1: (N, 4, 8, 8) low-res feature map, x2: (N, 4, 16, 16) skip connection.
    N, H, W = 2, 16, 16
    c_x1, c_x2 = 4, 4
    in_channels = c_x1 + c_x2          # channels after upsample + concat
    out_channels = 8

    x1 = jax.random.normal(k_x1, (N, c_x1, H // 2, W // 2), jnp.float32)
    x2 = jax.random.normal(k_x2, (N, c_x2, H, W), jnp.float32)
    params = init_up_params(k_p, in_channels, out_channels)

    out = jax.block_until_ready(up_forward(x1, x2, params))
    assert out.shape == (N, out_channels, H, W), out.shape

    # Tight check vs a reference that also rounds conv operands to bf16 (matching the
    # intentional bf16 MXU feed), plus a looser sanity check vs the pure-f32 reference.
    ref_bf16 = _reference_up(x1, x2, params, bf16_conv_inputs=True)
    ref_f32 = _reference_up(x1, x2, params, bf16_conv_inputs=False)
    assert jnp.allclose(out, ref_bf16, atol=3e-2, rtol=3e-2), \
        float(jnp.max(jnp.abs(out - ref_bf16)))
    assert jnp.allclose(out, ref_f32, atol=1e-1, rtol=1e-1), \
        float(jnp.max(jnp.abs(out - ref_f32)))

    print("KERNEL_OK")
</pallas_src>

<mosaic_0001>
module attributes {stable_mosaic.version = 11 : i64} {
  func.func @_conv3x3_stats_kernel(%arg0: i32, %arg1: memref<1x16x16x8xbf16, #tpu.memory_space<vmem>>, %arg2: memref<9x8x4xbf16, #tpu.memory_space<vmem>>, %arg3: memref<1x8xf32, #tpu.memory_space<vmem>>, %arg4: memref<1x8xf32, #tpu.memory_space<vmem>>, %arg5: memref<1x16x16x4xbf16, #tpu.memory_space<vmem>>, %arg6: memref<1x1x4xf32, #tpu.memory_space<vmem>>, %arg7: memref<1x1x4xf32, #tpu.memory_space<vmem>>, %arg8: memref<1x18x18x8xf32, #tpu.memory_space<vmem>>, %arg9: memref<1x16x16x4xf32, #tpu.memory_space<vmem>>) attributes {dimension_semantics = [#tpu.dimension_semantics<parallel>], iteration_bounds = array<i64: 2>, scalar_prefetch = 0 : i64, scratch_operands = 2 : i64, tpu.core_type = #tpu.core_type<tc>, window_params = [{transform_indices = @transform_0, window_bounds = array<i64: 1, 16, 16, 8>}, {pipeline_mode = #tpu.pipeline_mode<synchronous>, transform_indices = @transform_1, window_bounds = array<i64: 9, 8, 4>}, {pipeline_mode = #tpu.pipeline_mode<synchronous>, transform_indices = @transform_2, window_bounds = array<i64: 1, 8>}, {pipeline_mode = #tpu.pipeline_mode<synchronous>, transform_indices = @transform_3, window_bounds = array<i64: 1, 8>}, {transform_indices = @transform_4, window_bounds = array<i64: 1, 16, 16, 4>}, {transform_indices = @transform_5, window_bounds = array<i64: 1, 1, 4>}, {transform_indices = @transform_6, window_bounds = array<i64: 1, 1, 4>}]} {
    %c0 = arith.constant 0 : index
    %c0_0 = arith.constant 0 : index
    %c0_1 = arith.constant 0 : index
    %c0_2 = arith.constant 0 : index
    %0 = vector.load %arg1[%c0, %c0_0, %c0_1, %c0_2] : memref<1x16x16x8xbf16, #tpu.memory_space<vmem>>, vector<1x16x16x8xbf16>
    %1 = arith.extf %0 : vector<1x16x16x8xbf16> to vector<1x16x16x8xf32>
    %cst = arith.constant 0.000000e+00 : f32
    %2 = vector.broadcast %cst : f32 to vector<1x18x18x8xf32>
    %c0_3 = arith.constant 0 : index
    %c0_4 = arith.constant 0 : index
    %c0_5 = arith.constant 0 : index
    %c0_6 = arith.constant 0 : index
    %3 = vector.load %arg8[%c0_3, %c0_4, %c0_5, %c0_6] : memref<1x18x18x8xf32, #tpu.memory_space<vmem>>, vector<1x18x18x8xf32>
    tpu.vector_store %arg8[%c0_3, %c0_4, %c0_5, %c0_6], %2 {strides = array<i32>} : memref<1x18x18x8xf32, #tpu.memory_space<vmem>>, vector<1x18x18x8xf32>,
    %c0_7 = arith.constant 0 : index
    %c1 = arith.constant 1 : index
    %c1_8 = arith.constant 1 : index
    %c0_9 = arith.constant 0 : index
    %4 = vector.load %arg8[%c0_7, %c1, %c1_8, %c0_9] : memref<1x18x18x8xf32, #tpu.memory_space<vmem>>, vector<1x16x16x8xf32>
    tpu.vector_store %arg8[%c0_7, %c1, %c1_8, %c0_9], %1 {strides = array<i32>} : memref<1x18x18x8xf32, #tpu.memory_space<vmem>>, vector<1x16x16x8xf32>,
    %c0_10 = arith.constant 0 : index
    %c0_11 = arith.constant 0 : index
    %c0_12 = arith.constant 0 : index
    %c0_13 = arith.constant 0 : index
    %5 = vector.load %arg8[%c0_10, %c0_11, %c0_12, %c0_13] : memref<1x18x18x8xf32, #tpu.memory_space<vmem>>, vector<1x18x16x8xf32>
    %6 = arith.truncf %5 : vector<1x18x16x8xf32> to vector<1x18x16x8xbf16>
    %7 = vector.extract_strided_slice %6 {offsets = [0, 0, 0, 0], sizes = [1, 16, 16, 8], strides = [1, 1, 1, 1]} : vector<1x18x16x8xbf16> to vector<1x16x16x8xbf16>
    %c0_14 = arith.constant 0 : index
    %c0_15 = arith.constant 0 : index
    %c0_16 = arith.constant 0 : index
    %8 = vector.load %arg2[%c0_14, %c0_15, %c0_16] : memref<9x8x4xbf16, #tpu.memory_space<vmem>>, vector<1x8x4xbf16>
    %9 = vector.shape_cast %8 : vector<1x8x4xbf16> to vector<8x4xbf16>
    %cst_17 = arith.constant dense<0.000000e+00> : vector<1x16x16x4xf32>
    %10 = tpu.matmul %7, %9, %cst_17 {dimension_numbers = #tpu.dot_dimension_numbers<[3], [0], [0, 1, 2], [1], [0, 0, 0, 1, 0, 2, 1, 1], [], []>} : vector<1x16x16x8xbf16>, vector<8x4xbf16>, vector<1x16x16x4xf32> -> vector<1x16x16x4xf32>
    %11 = vector.extract_strided_slice %6 {offsets = [0, 1, 0, 0], sizes = [1, 16, 16, 8], strides = [1, 1, 1, 1]} : vector<1x18x16x8xbf16> to vector<1x16x16x8xbf16>
    %c3 = arith.constant 3 : index
    %c0_18 = arith.constant 0 : index
    %c0_19 = arith.constant 0 : index
    %12 = vector.load %arg2[%c3, %c0_18, %c0_19] : memref<9x8x4xbf16, #tpu.memory_space<vmem>>, vector<1x8x4xbf16>
    %13 = vector.shape_cast %12 : vector<1x8x4xbf16> to vector<8x4xbf16>
    %cst_20 = arith.constant dense<0.000000e+00> : vector<1x16x16x4xf32>
    %14 = tpu.matmul %11, %13, %cst_20 {dimension_numbers = #tpu.dot_dimension_numbers<[3], [0], [0, 1, 2], [1], [0, 0, 0, 1, 0, 2, 1, 1], [], []>} : vector<1x16x16x8xbf16>, vector<8x4xbf16>, vector<1x16x16x4xf32> -> vector<1x16x16x4xf32>
    %15 = arith.addf %10, %14 : vector<1x16x16x4xf32>
    %16 = vector.extract_strided_slice %6 {offsets = [0, 2, 0, 0], sizes = [1, 16, 16, 8], strides = [1, 1, 1, 1]} : vector<1x18x16x8xbf16> to vector<1x16x16x8xbf16>
    %c6 = arith.constant 6 : index
    %c0_21 = arith.constant 0 : index
    %c0_22 = arith.constant 0 : index
    %17 = vector.load %arg2[%c6, %c0_21, %c0_22] : memref<9x8x4xbf16, #tpu.memory_space<vmem>>, vector<1x8x4xbf16>
    %18 = vector.shape_cast %17 : vector<1x8x4xbf16> to vector<8x4xbf16>
    %cst_23 = arith.constant dense<0.000000e+00> : vector<1x16x16x4xf32>
    %19 = tpu.matmul %16, %18, %cst_23 {dimension_numbers = #tpu.dot_dimension_numbers<[3], [0], [0, 1, 2], [1], [0, 0, 0, 1, 0, 2, 1, 1], [], []>} : vector<1x16x16x8xbf16>, vector<8x4xbf16>, vector<1x16x16x4xf32> -> vector<1x16x16x4xf32>
    %20 = arith.addf %15, %19 : vector<1x16x16x4xf32>
    %c0_24 = arith.constant 0 : index
    %c0_25 = arith.constant 0 : index
    %c0_26 = arith.constant 0 : index
    %c0_27 = arith.constant 0 : index
    %21 = vector.load %arg9[%c0_24, %c0_25, %c0_26, %c0_27] : memref<1x16x16x4xf32, #tpu.memory_space<vmem>>, vector<1x16x16x4xf32>
    tpu.vector_store %arg9[%c0_24, %c0_25, %c0_26, %c0_27], %20 {strides = array<i32>} : memref<1x16x16x4xf32, #tpu.memory_space<vmem>>, vector<1x16x16x4xf32>,
    %c0_28 = arith.constant 0 : index
    %c0_29 = arith.constant 0 : index
    %c1_30 = arith.constant 1 : index
    %c0_31 = arith.constant 0 : index
    %22 = vector.load %arg8[%c0_28, %c0_29, %c1_30, %c0_31] : memref<1x18x18x8xf32, #tpu.memory_space<vmem>>, vector<1x18x16x8xf32>
    %23 = arith.truncf %22 : vector<1x18x16x8xf32> to vector<1x18x16x8xbf16>
    %24 = vector.extract_strided_slice %23 {offsets = [0, 0, 0, 0], sizes = [1, 16, 16, 8], strides = [1, 1, 1, 1]} : vector<1x18x16x8xbf16> to vector<1x16x16x8xbf16>
    %c1_32 = arith.constant 1 : index
    %c0_33 = arith.constant 0 : index
    %c0_34 = arith.constant 0 : index
    %25 = vector.load %arg2[%c1_32, %c0_33, %c0_34] : memref<9x8x4xbf16, #tpu.memory_space<vmem>>, vector<1x8x4xbf16>
    %26 = vector.shape_cast %25 : vector<1x8x4xbf16> to vector<8x4xbf16>
    %cst_35 = arith.constant dense<0.000000e+00> : vector<1x16x16x4xf32>
    %27 = tpu.matmul %24, %26, %cst_35 {dimension_numbers = #tpu.dot_dimension_numbers<[3], [0], [0, 1, 2], [1], [0, 0, 0, 1, 0, 2, 1, 1], [], []>} : vector<1x16x16x8xbf16>, vector<8x4xbf16>, vector<1x16x16x4xf32> -> vector<1x16x16x4xf32>
    %28 = vector.extract_strided_slice %23 {offsets = [0, 1, 0, 0], sizes = [1, 16, 16, 8], strides = [1, 1, 1, 1]} : vector<1x18x16x8xbf16> to vector<1x16x16x8xbf16>
    %c4 = arith.constant 4 : index
    %c0_36 = arith.constant 0 : index
    %c0_37 = arith.constant 0 : index
    %29 = vector.load %arg2[%c4, %c0_36, %c0_37] : memref<9x8x4xbf16, #tpu.memory_space<vmem>>, vector<1x8x4xbf16>
    %30 = vector.shape_cast %29 : vector<1x8x4xbf16> to vector<8x4xbf16>
    %cst_38 = arith.constant dense<0.000000e+00> : vector<1x16x16x4xf32>
    %31 = tpu.matmul %28, %30, %cst_38 {dimension_numbers = #tpu.dot_dimension_numbers<[3], [0], [0, 1, 2], [1], [0, 0, 0, 1, 0, 2, 1, 1], [], []>} : vector<1x16x16x8xbf16>, vector<8x4xbf16>, vector<1x16x16x4xf32> -> vector<1x16x16x4xf32>
    %32 = arith.addf %27, %31 : vector<1x16x16x4xf32>
    %33 = vector.extract_strided_slice %23 {offsets = [0, 2, 0, 0], sizes = [1, 16, 16, 8], strides = [1, 1, 1, 1]} : vector<1x18x16x8xbf16> to vector<1x16x16x8xbf16>
    %c7 = arith.constant 7 : index
    %c0_39 = arith.constant 0 : index
    %c0_40 = arith.constant 0 : index
    %34 = vector.load %arg2[%c7, %c0_39, %c0_40] : memref<9x8x4xbf16, #tpu.memory_space<vmem>>, vector<1x8x4xbf16>
    %35 = vector.shape_cast %34 : vector<1x8x4xbf16> to vector<8x4xbf16>
    %cst_41 = arith.constant dense<0.000000e+00> : vector<1x16x16x4xf32>
    %36 = tpu.matmul %33, %35, %cst_41 {dimension_numbers = #tpu.dot_dimension_numbers<[3], [0], [0, 1, 2], [1], [0, 0, 0, 1, 0, 2, 1, 1], [], []>} : vector<1x16x16x8xbf16>, vector<8x4xbf16>, vector<1x16x16x4xf32> -> vector<1x16x16x4xf32>
    %37 = arith.addf %32, %36 : vector<1x16x16x4xf32>
    %c0_42 = arith.constant 0 : index
    %c0_43 = arith.constant 0 : index
    %c0_44 = arith.constant 0 : index
    %c0_45 = arith.constant 0 : index
    %38 = vector.load %arg9[%c0_42, %c0_43, %c0_44, %c0_45] : memref<1x16x16x4xf32, #tpu.memory_space<vmem>>, vector<1x16x16x4xf32>
    %39 = arith.addf %38, %37 : vector<1x16x16x4xf32>
    %c0_46 = arith.constant 0 : index
    %c0_47 = arith.constant 0 : index
    %c0_48 = arith.constant 0 : index
    %c0_49 = arith.constant 0 : index
    %40 = vector.load %arg9[%c0_46, %c0_47, %c0_48, %c0_49] : memref<1x16x16x4xf32, #tpu.memory_space<vmem>>, vector<1x16x16x4xf32>
    tpu.vector_store %arg9[%c0_46, %c0_47, %c0_48, %c0_49], %39 {strides = array<i32>} : memref<1x16x16x4xf32, #tpu.memory_space<vmem>>, vector<1x16x16x4xf32>,
    %c0_50 = arith.constant 0 : index
    %c0_51 = arith.constant 0 : index
    %c2 = arith.constant 2 : index
    %c0_52 = arith.constant 0 : index
    %41 = vector.load %arg8[%c0_50, %c0_51, %c2, %c0_52] : memref<1x18x18x8xf32, #tpu.memory_space<vmem>>, vector<1x18x16x8xf32>
    %42 = arith.truncf %41 : vector<1x18x16x8xf32> to vector<1x18x16x8xbf16>
    %43 = vector.extract_strided_slice %42 {offsets = [0, 0, 0, 0], sizes = [1, 16, 16, 8], strides = [1, 1, 1, 1]} : vector<1x18x16x8xbf16> to vector<1x16x16x8xbf16>
    %c2_53 = arith.constant 2 : index
    %c0_54 = arith.constant 0 : index
    %c0_55 = arith.constant 0 : index
    %44 = vector.load %arg2[%c2_53, %c0_54, %c0_55] : memref<9x8x4xbf16, #tpu.memory_space<vmem>>, vector<1x8x4xbf16>
    %45 = vector.shape_cast %44 : vector<1x8x4xbf16> to vector<8x4xbf16>
    %cst_56 = arith.constant dense<0.000000e+00> : vector<1x16x16x4xf32>
    %46 = tpu.matmul %43, %45, %cst_56 {dimension_numbers = #tpu.dot_dimension_numbers<[3], [0], [0, 1, 2], [1], [0, 0, 0, 1, 0, 2, 1, 1], [], []>} : vector<1x16x16x8xbf16>, vector<8x4xbf16>, vector<1x16x16x4xf32> -> vector<1x16x16x4xf32>
    %47 = vector.extract_strided_slice %42 {offsets = [0, 1, 0, 0], sizes = [1, 16, 16, 8], strides = [1, 1, 1, 1]} : vector<1x18x16x8xbf16> to vector<1x16x16x8xbf16>
    %c5 = arith.constant 5 : index
    %c0_57 = arith.constant 0 : index
    %c0_58 = arith.constant 0 : index
    %48 = vector.load %arg2[%c5, %c0_57, %c0_58] : memref<9x8x4xbf16, #tpu.memory_space<vmem>>, vector<1x8x4xbf16>
    %49 = vector.shape_cast %48 : vector<1x8x4xbf16> to vector<8x4xbf16>
    %cst_59 = arith.constant dense<0.000000e+00> : vector<1x16x16x4xf32>
    %50 = tpu.matmul %47, %49, %cst_59 {dimension_numbers = #tpu.dot_dimension_numbers<[3], [0], [0, 1, 2], [1], [0, 0, 0, 1, 0, 2, 1, 1], [], []>} : vector<1x16x16x8xbf16>, vector<8x4xbf16>, vector<1x16x16x4xf32> -> vector<1x16x16x4xf32>
    %51 = arith.addf %46, %50 : vector<1x16x16x4xf32>
    %52 = vector.extract_strided_slice %42 {offsets = [0, 2, 0, 0], sizes = [1, 16, 16, 8], strides = [1, 1, 1, 1]} : vector<1x18x16x8xbf16> to vector<1x16x16x8xbf16>
    %c8 = arith.constant 8 : index
    %c0_60 = arith.constant 0 : index
    %c0_61 = arith.constant 0 : index
    %53 = vector.load %arg2[%c8, %c0_60, %c0_61] : memref<9x8x4xbf16, #tpu.memory_space<vmem>>, vector<1x8x4xbf16>
    %54 = vector.shape_cast %53 : vector<1x8x4xbf16> to vector<8x4xbf16>
    %cst_62 = arith.constant dense<0.000000e+00> : vector<1x16x16x4xf32>
    %55 = tpu.matmul %52, %54, %cst_62 {dimension_numbers = #tpu.dot_dimension_numbers<[3], [0], [0, 1, 2], [1], [0, 0, 0, 1, 0, 2, 1, 1], [], []>} : vector<1x16x16x8xbf16>, vector<8x4xbf16>, vector<1x16x16x4xf32> -> vector<1x16x16x4xf32>
    %56 = arith.addf %51, %55 : vector<1x16x16x4xf32>
    %c0_63 = arith.constant 0 : index
    %c0_64 = arith.constant 0 : index
    %c0_65 = arith.constant 0 : index
    %c0_66 = arith.constant 0 : index
    %57 = vector.load %arg9[%c0_63, %c0_64, %c0_65, %c0_66] : memref<1x16x16x4xf32, #tpu.memory_space<vmem>>, vector<1x16x16x4xf32>
    %58 = arith.addf %57, %56 : vector<1x16x16x4xf32>
    %c0_67 = arith.constant 0 : index
    %c0_68 = arith.constant 0 : index
    %c0_69 = arith.constant 0 : index
    %c0_70 = arith.constant 0 : index
    %59 = vector.load %arg9[%c0_67, %c0_68, %c0_69, %c0_70] : memref<1x16x16x4xf32, #tpu.memory_space<vmem>>, vector<1x16x16x4xf32>
    tpu.vector_store %arg9[%c0_67, %c0_68, %c0_69, %c0_70], %58 {strides = array<i32>} : memref<1x16x16x4xf32, #tpu.memory_space<vmem>>, vector<1x16x16x4xf32>,
    %c0_71 = arith.constant 0 : index
    %c0_72 = arith.constant 0 : index
    %c0_73 = arith.constant 0 : index
    %c0_74 = arith.constant 0 : index
    %60 = vector.load %arg9[%c0_71, %c0_72, %c0_73, %c0_74] : memref<1x16x16x4xf32, #tpu.memory_space<vmem>>, vector<1x16x16x4xf32>
    %61 = arith.truncf %60 : vector<1x16x16x4xf32> to vector<1x16x16x4xbf16>
    %c0_75 = arith.constant 0 : index
    %c0_76 = arith.constant 0 : index
    %c0_77 = arith.constant 0 : index
    %c0_78 = arith.constant 0 : index
    %62 = vector.load %arg5[%c0_75, %c0_76, %c0_77, %c0_78] : memref<1x16x16x4xbf16, #tpu.memory_space<vmem>>, vector<1x16x16x4xbf16>
    tpu.vector_store %arg5[%c0_75, %c0_76, %c0_77, %c0_78], %61 {strides = array<i32>} : memref<1x16x16x4xbf16, #tpu.memory_space<vmem>>, vector<1x16x16x4xbf16>,
    %cst_79 = arith.constant dense<0.000000e+00> : vector<1x4xf32>
    %63 = vector.multi_reduction <add>, %60, %cst_79 [1, 2] : vector<1x16x16x4xf32> to vector<1x4xf32>
    %64 = vector.shape_cast %63 : vector<1x4xf32> to vector<1x1x4xf32>
    %c0_80 = arith.constant 0 : index
    %c0_81 = arith.constant 0 : index
    %c0_82 = arith.constant 0 : index
    %65 = vector.load %arg6[%c0_80, %c0_81, %c0_82] : memref<1x1x4xf32, #tpu.memory_space<vmem>>, vector<1x1x4xf32>
    tpu.vector_store %arg6[%c0_80, %c0_81, %c0_82], %64 {strides = array<i32>} : memref<1x1x4xf32, #tpu.memory_space<vmem>>, vector<1x1x4xf32>,
    %66 = arith.mulf %60, %60 : vector<1x16x16x4xf32>
    %cst_83 = arith.constant dense<0.000000e+00> : vector<1x4xf32>
    %67 = vector.multi_reduction <add>, %66, %cst_83 [1, 2] : vector<1x16x16x4xf32> to vector<1x4xf32>
    %68 = vector.shape_cast %67 : vector<1x4xf32> to vector<1x1x4xf32>
    %c0_84 = arith.constant 0 : index
    %c0_85 = arith.constant 0 : index
    %c0_86 = arith.constant 0 : index
    %69 = vector.load %arg7[%c0_84, %c0_85, %c0_86] : memref<1x1x4xf32, #tpu.memory_space<vmem>>, vector<1x1x4xf32>
    tpu.vector_store %arg7[%c0_84, %c0_85, %c0_86], %68 {strides = array<i32>} : memref<1x1x4xf32, #tpu.memory_space<vmem>>, vector<1x1x4xf32>,
    return
  }
  func.func @transform_0(%arg0: i32) -> (i32, i32, i32, i32) {
    %c0_i32 = arith.constant 0 : i32
    %c0_i32_0 = arith.constant 0 : i32
    %c0_i32_1 = arith.constant 0 : i32
    %c0_i32_2 = arith.constant 0 : i32
    return %arg0, %c0_i32, %c0_i32_0, %c0_i32_1 : i32, i32, i32, i32
  }
  func.func @transform_1(%arg0: i32) -> (i32, i32, i32) {
    %c0_i32 = arith.constant 0 : i32
    %c0_i32_0 = arith.constant 0 : i32
    %c0_i32_1 = arith.constant 0 : i32
    %c0_i32_2 = arith.constant 0 : i32
    return %c0_i32, %c0_i32_0, %c0_i32_1 : i32, i32, i32
  }
  func.func @transform_2(%arg0: i32) -> (i32, i32) {
    %c0_i32 = arith.constant 0 : i32
    %c0_i32_0 = arith.constant 0 : i32
    %c0_i32_1 = arith.constant 0 : i32
    return %c0_i32, %c0_i32_0 : i32, i32
  }
  func.func @transform_3(%arg0: i32) -> (i32, i32) {
    %c0_i32 = arith.constant 0 : i32
    %c0_i32_0 = arith.constant 0 : i32
    %c0_i32_1 = arith.constant 0 : i32
    return %c0_i32, %c0_i32_0 : i32, i32
  }
  func.func @transform_4(%arg0: i32) -> (i32, i32, i32, i32) {
    %c0_i32 = arith.constant 0 : i32
    %c0_i32_0 = arith.constant 0 : i32
    %c0_i32_1 = arith.constant 0 : i32
    %c0_i32_2 = arith.constant 0 : i32
    return %arg0, %c0_i32, %c0_i32_0, %c0_i32_1 : i32, i32, i32, i32
  }
  func.func @transform_5(%arg0: i32) -> (i32, i32, i32) {
    %c0_i32 = arith.constant 0 : i32
    %c0_i32_0 = arith.constant 0 : i32
    %c0_i32_1 = arith.constant 0 : i32
    return %arg0, %c0_i32, %c0_i32_0 : i32, i32, i32
  }
  func.func @transform_6(%arg0: i32) -> (i32, i32, i32) {
    %c0_i32 = arith.constant 0 : i32
    %c0_i32_0 = arith.constant 0 : i32
    %c0_i32_1 = arith.constant 0 : i32
    return %arg0, %c0_i32, %c0_i32_0 : i32, i32, i32
  }
}

module attributes {stable_mosaic.version = 11 : i64} {
  func.func @_conv3x3_stats_kernel(%arg0: i32, %arg1: memref<1x16x16x4xbf16, #tpu.memory_space<vmem>>, %arg2: memref<9x4x8xbf16, #tpu.memory_space<vmem>>, %arg3: memref<1x4xf32, #tpu.memory_space<vmem>>, %arg4: memref<1x4xf32, #tpu.memory_space<vmem>>, %arg5: memref<1x16x16x8xf32, #tpu.memory_space<vmem>>, %arg6: memref<1x1x8xf32, #tpu.memory_space<vmem>>, %arg7: memref<1x1x8xf32, #tpu.memory_space<vmem>>, %arg8: memref<1x18x18x4xf32, #tpu.memory_space<vmem>>, %arg9: memref<1x16x16x8xf32, #tpu.memory_space<vmem>>) attributes {dimension_semantics = [#tpu.dimension_semantics<parallel>], iteration_bounds = array<i64: 2>, scalar_prefetch = 0 : i64, scratch_operands = 2 : i64, tpu.core_type = #tpu.core_type<tc>, window_params = [{transform_indices = @transform_0, window_bounds = array<i64: 1, 16, 16, 4>}, {pipeline_mode = #tpu.pipeline_mode<synchronous>, transform_indices = @transform_1, window_bounds = array<i64: 9, 4, 8>}, {pipeline_mode = #tpu.pipeline_mode<synchronous>, transform_indices = @transform_2, window_bounds = array<i64: 1, 4>}, {pipeline_mode = #tpu.pipeline_mode<synchronous>, transform_indices = @transform_3, window_bounds = array<i64: 1, 4>}, {transform_indices = @transform_4, window_bounds = array<i64: 1, 16, 16, 8>}, {transform_indices = @transform_5, window_bounds = array<i64: 1, 1, 8>}, {transform_indices = @transform_6, window_bounds = array<i64: 1, 1, 8>}]} {
    %c0 = arith.constant 0 : index
    %c0_0 = arith.constant 0 : index
    %c0_1 = arith.constant 0 : index
    %c0_2 = arith.constant 0 : index
    %0 = vector.load %arg1[%c0, %c0_0, %c0_1, %c0_2] : memref<1x16x16x4xbf16, #tpu.memory_space<vmem>>, vector<1x16x16x4xbf16>
    %1 = arith.extf %0 : vector<1x16x16x4xbf16> to vector<1x16x16x4xf32>
    %c0_3 = arith.constant 0 : index
    %c0_4 = arith.constant 0 : index
    %2 = vector.load %arg3[%c0_3, %c0_4] : memref<1x4xf32, #tpu.memory_space<vmem>>, vector<1x4xf32>
    %3 = vector.shape_cast %2 : vector<1x4xf32> to vector<1x1x1x4xf32>
    %c0_5 = arith.constant 0 : index
    %c0_6 = arith.constant 0 : index
    %4 = vector.load %arg4[%c0_5, %c0_6] : memref<1x4xf32, #tpu.memory_space<vmem>>, vector<1x4xf32>
    %5 = vector.shape_cast %4 : vector<1x4xf32> to vector<1x1x1x4xf32>
    %6 = vector.broadcast %3 : vector<1x1x1x4xf32> to vector<1x16x16x4xf32>
    %7 = arith.mulf %1, %6 : vector<1x16x16x4xf32>
    %8 = vector.broadcast %5 : vector<1x1x1x4xf32> to vector<1x16x16x4xf32>
    %9 = arith.addf %7, %8 : vector<1x16x16x4xf32>
    %cst = arith.constant 0.000000e+00 : f32
    %10 = vector.broadcast %cst : f32 to vector<1x16x16x4xf32>
    %11 = arith.maximumf %9, %10 : vector<1x16x16x4xf32>
    %cst_7 = arith.constant 0.000000e+00 : f32
    %12 = vector.broadcast %cst_7 : f32 to vector<1x18x18x4xf32>
    %c0_8 = arith.constant 0 : index
    %c0_9 = arith.constant 0 : index
    %c0_10 = arith.constant 0 : index
    %c0_11 = arith.constant 0 : index
    %13 = vector.load %arg8[%c0_8, %c0_9, %c0_10, %c0_11] : memref<1x18x18x4xf32, #tpu.memory_space<vmem>>, vector<1x18x18x4xf32>
    tpu.vector_store %arg8[%c0_8, %c0_9, %c0_10, %c0_11], %12 {strides = array<i32>} : memref<1x18x18x4xf32, #tpu.memory_space<vmem>>, vector<1x18x18x4xf32>,
    %c0_12 = arith.constant 0 : index
    %c1 = arith.constant 1 : index
    %c1_13 = arith.constant 1 : index
    %c0_14 = arith.constant 0 : index
    %14 = vector.load %arg8[%c0_12, %c1, %c1_13, %c0_14] : memref<1x18x18x4xf32, #tpu.memory_space<vmem>>, vector<1x16x16x4xf32>
    tpu.vector_store %arg8[%c0_12, %c1, %c1_13, %c0_14], %11 {strides = array<i32>} : memref<1x18x18x4xf32, #tpu.memory_space<vmem>>, vector<1x16x16x4xf32>,
    %c0_15 = arith.constant 0 : index
    %c0_16 = arith.constant 0 : index
    %c0_17 = arith.constant 0 : index
    %c0_18 = arith.constant 0 : index
    %15 = vector.load %arg8[%c0_15, %c0_16, %c0_17, %c0_18] : memref<1x18x18x4xf32, #tpu.memory_space<vmem>>, vector<1x18x16x4xf32>
    %16 = arith.truncf %15 : vector<1x18x16x4xf32> to vector<1x18x16x4xbf16>
    %17 = vector.extract_strided_slice %16 {offsets = [0, 0, 0, 0], sizes = [1, 16, 16, 4], strides = [1, 1, 1, 1]} : vector<1x18x16x4xbf16> to vector<1x16x16x4xbf16>
    %c0_19 = arith.constant 0 : index
    %c0_20 = arith.constant 0 : index
    %c0_21 = arith.constant 0 : index
    %18 = vector.load %arg2[%c0_19, %c0_20, %c0_21] : memref<9x4x8xbf16, #tpu.memory_space<vmem>>, vector<1x4x8xbf16>
    %19 = vector.shape_cast %18 : vector<1x4x8xbf16> to vector<4x8xbf16>
    %cst_22 = arith.constant dense<0.000000e+00> : vector<1x16x16x8xf32>
    %20 = tpu.matmul %17, %19, %cst_22 {dimension_numbers = #tpu.dot_dimension_numbers<[3], [0], [0, 1, 2], [1], [0, 0, 0, 1, 0, 2, 1, 1], [], []>} : vector<1x16x16x4xbf16>, vector<4x8xbf16>, vector<1x16x16x8xf32> -> vector<1x16x16x8xf32>
    %21 = vector.extract_strided_slice %16 {offsets = [0, 1, 0, 0], sizes = [1, 16, 16, 4], strides = [1, 1, 1, 1]} : vector<1x18x16x4xbf16> to vector<1x16x16x4xbf16>
    %c3 = arith.constant 3 : index
    %c0_23 = arith.constant 0 : index
    %c0_24 = arith.constant 0 : index
    %22 = vector.load %arg2[%c3, %c0_23, %c0_24] : memref<9x4x8xbf16, #tpu.memory_space<vmem>>, vector<1x4x8xbf16>
    %23 = vector.shape_cast %22 : vector<1x4x8xbf16> to vector<4x8xbf16>
    %cst_25 = arith.constant dense<0.000000e+00> : vector<1x16x16x8xf32>
    %24 = tpu.matmul %21, %23, %cst_25 {dimension_numbers = #tpu.dot_dimension_numbers<[3], [0], [0, 1, 2], [1], [0, 0, 0, 1, 0, 2, 1, 1], [], []>} : vector<1x16x16x4xbf16>, vector<4x8xbf16>, vector<1x16x16x8xf32> -> vector<1x16x16x8xf32>
    %25 = arith.addf %20, %24 : vector<1x16x16x8xf32>
    %26 = vector.extract_strided_slice %16 {offsets = [0, 2, 0, 0], sizes = [1, 16, 16, 4], strides = [1, 1, 1, 1]} : vector<1x18x16x4xbf16> to vector<1x16x16x4xbf16>
    %c6 = arith.constant 6 : index
    %c0_26 = arith.constant 0 : index
    %c0_27 = arith.constant 0 : index
    %27 = vector.load %arg2[%c6, %c0_26, %c0_27] : memref<9x4x8xbf16, #tpu.memory_space<vmem>>, vector<1x4x8xbf16>
    %28 = vector.shape_cast %27 : vector<1x4x8xbf16> to vector<4x8xbf16>
    %cst_28 = arith.constant dense<0.000000e+00> : vector<1x16x16x8xf32>
    %29 = tpu.matmul %26, %28, %cst_28 {dimension_numbers = #tpu.dot_dimension_numbers<[3], [0], [0, 1, 2], [1], [0, 0, 0, 1, 0, 2, 1, 1], [], []>} : vector<1x16x16x4xbf16>, vector<4x8xbf16>, vector<1x16x16x8xf32> -> vector<1x16x16x8xf32>
    %30 = arith.addf %25, %29 : vector<1x16x16x8xf32>
    %c0_29 = arith.constant 0 : index
    %c0_30 = arith.constant 0 : index
    %c0_31 = arith.constant 0 : index
    %c0_32 = arith.constant 0 : index
    %31 = vector.load %arg9[%c0_29, %c0_30, %c0_31, %c0_32] : memref<1x16x16x8xf32, #tpu.memory_space<vmem>>, vector<1x16x16x8xf32>
    tpu.vector_store %arg9[%c0_29, %c0_30, %c0_31, %c0_32], %30 {strides = array<i32>} : memref<1x16x16x8xf32, #tpu.memory_space<vmem>>, vector<1x16x16x8xf32>,
    %c0_33 = arith.constant 0 : index
    %c0_34 = arith.constant 0 : index
    %c1_35 = arith.constant 1 : index
    %c0_36 = arith.constant 0 : index
    %32 = vector.load %arg8[%c0_33, %c0_34, %c1_35, %c0_36] : memref<1x18x18x4xf32, #tpu.memory_space<vmem>>, vector<1x18x16x4xf32>
    %33 = arith.truncf %32 : vector<1x18x16x4xf32> to vector<1x18x16x4xbf16>
    %34 = vector.extract_strided_slice %33 {offsets = [0, 0, 0, 0], sizes = [1, 16, 16, 4], strides = [1, 1, 1, 1]} : vector<1x18x16x4xbf16> to vector<1x16x16x4xbf16>
    %c1_37 = arith.constant 1 : index
    %c0_38 = arith.constant 0 : index
    %c0_39 = arith.constant 0 : index
    %35 = vector.load %arg2[%c1_37, %c0_38, %c0_39] : memref<9x4x8xbf16, #tpu.memory_space<vmem>>, vector<1x4x8xbf16>
    %36 = vector.shape_cast %35 : vector<1x4x8xbf16> to vector<4x8xbf16>
    %cst_40 = arith.constant dense<0.000000e+00> : vector<1x16x16x8xf32>
    %37 = tpu.matmul %34, %36, %cst_40 {dimension_numbers = #tpu.dot_dimension_numbers<[3], [0], [0, 1, 2], [1], [0, 0, 0, 1, 0, 2, 1, 1], [], []>} : vector<1x16x16x4xbf16>, vector<4x8xbf16>, vector<1x16x16x8xf32> -> vector<1x16x16x8xf32>
    %38 = vector.extract_strided_slice %33 {offsets = [0, 1, 0, 0], sizes = [1, 16, 16, 4], strides = [1, 1, 1, 1]} : vector<1x18x16x4xbf16> to vector<1x16x16x4xbf16>
    %c4 = arith.constant 4 : index
    %c0_41 = arith.constant 0 : index
    %c0_42 = arith.constant 0 : index
    %39 = vector.load %arg2[%c4, %c0_41, %c0_42] : memref<9x4x8xbf16, #tpu.memory_space<vmem>>, vector<1x4x8xbf16>
    %40 = vector.shape_cast %39 : vector<1x4x8xbf16> to vector<4x8xbf16>
    %cst_43 = arith.constant dense<0.000000e+00> : vector<1x16x16x8xf32>
    %41 = tpu.matmul %38, %40, %cst_43 {dimension_numbers = #tpu.dot_dimension_numbers<[3], [0], [0, 1, 2], [1], [0, 0, 0, 1, 0, 2, 1, 1], [], []>} : vector<1x16x16x4xbf16>, vector<4x8xbf16>, vector<1x16x16x8xf32> -> vector<1x16x16x8xf32>
    %42 = arith.addf %37, %41 : vector<1x16x16x8xf32>
    %43 = vector.extract_strided_slice %33 {offsets = [0, 2, 0, 0], sizes = [1, 16, 16, 4], strides = [1, 1, 1, 1]} : vector<1x18x16x4xbf16> to vector<1x16x16x4xbf16>
    %c7 = arith.constant 7 : index
    %c0_44 = arith.constant 0 : index
    %c0_45 = arith.constant 0 : index
    %44 = vector.load %arg2[%c7, %c0_44, %c0_45] : memref<9x4x8xbf16, #tpu.memory_space<vmem>>, vector<1x4x8xbf16>
    %45 = vector.shape_cast %44 : vector<1x4x8xbf16> to vector<4x8xbf16>
    %cst_46 = arith.constant dense<0.000000e+00> : vector<1x16x16x8xf32>
    %46 = tpu.matmul %43, %45, %cst_46 {dimension_numbers = #tpu.dot_dimension_numbers<[3], [0], [0, 1, 2], [1], [0, 0, 0, 1, 0, 2, 1, 1], [], []>} : vector<1x16x16x4xbf16>, vector<4x8xbf16>, vector<1x16x16x8xf32> -> vector<1x16x16x8xf32>
    %47 = arith.addf %42, %46 : vector<1x16x16x8xf32>
    %c0_47 = arith.constant 0 : index
    %c0_48 = arith.constant 0 : index
    %c0_49 = arith.constant 0 : index
    %c0_50 = arith.constant 0 : index
    %48 = vector.load %arg9[%c0_47, %c0_48, %c0_49, %c0_50] : memref<1x16x16x8xf32, #tpu.memory_space<vmem>>, vector<1x16x16x8xf32>
    %49 = arith.addf %48, %47 : vector<1x16x16x8xf32>
    %c0_51 = arith.constant 0 : index
    %c0_52 = arith.constant 0 : index
    %c0_53 = arith.constant 0 : index
    %c0_54 = arith.constant 0 : index
    %50 = vector.load %arg9[%c0_51, %c0_52, %c0_53, %c0_54] : memref<1x16x16x8xf32, #tpu.memory_space<vmem>>, vector<1x16x16x8xf32>
    tpu.vector_store %arg9[%c0_51, %c0_52, %c0_53, %c0_54], %49 {strides = array<i32>} : memref<1x16x16x8xf32, #tpu.memory_space<vmem>>, vector<1x16x16x8xf32>,
    %c0_55 = arith.constant 0 : index
    %c0_56 = arith.constant 0 : index
    %c2 = arith.constant 2 : index
    %c0_57 = arith.constant 0 : index
    %51 = vector.load %arg8[%c0_55, %c0_56, %c2, %c0_57] : memref<1x18x18x4xf32, #tpu.memory_space<vmem>>, vector<1x18x16x4xf32>
    %52 = arith.truncf %51 : vector<1x18x16x4xf32> to vector<1x18x16x4xbf16>
    %53 = vector.extract_strided_slice %52 {offsets = [0, 0, 0, 0], sizes = [1, 16, 16, 4], strides = [1, 1, 1, 1]} : vector<1x18x16x4xbf16> to vector<1x16x16x4xbf16>
    %c2_58 = arith.constant 2 : index
    %c0_59 = arith.constant 0 : index
    %c0_60 = arith.constant 0 : index
    %54 = vector.load %arg2[%c2_58, %c0_59, %c0_60] : memref<9x4x8xbf16, #tpu.memory_space<vmem>>, vector<1x4x8xbf16>
    %55 = vector.shape_cast %54 : vector<1x4x8xbf16> to vector<4x8xbf16>
    %cst_61 = arith.constant dense<0.000000e+00> : vector<1x16x16x8xf32>
    %56 = tpu.matmul %53, %55, %cst_61 {dimension_numbers = #tpu.dot_dimension_numbers<[3], [0], [0, 1, 2], [1], [0, 0, 0, 1, 0, 2, 1, 1], [], []>} : vector<1x16x16x4xbf16>, vector<4x8xbf16>, vector<1x16x16x8xf32> -> vector<1x16x16x8xf32>
    %57 = vector.extract_strided_slice %52 {offsets = [0, 1, 0, 0], sizes = [1, 16, 16, 4], strides = [1, 1, 1, 1]} : vector<1x18x16x4xbf16> to vector<1x16x16x4xbf16>
    %c5 = arith.constant 5 : index
    %c0_62 = arith.constant 0 : index
    %c0_63 = arith.constant 0 : index
    %58 = vector.load %arg2[%c5, %c0_62, %c0_63] : memref<9x4x8xbf16, #tpu.memory_space<vmem>>, vector<1x4x8xbf16>
    %59 = vector.shape_cast %58 : vector<1x4x8xbf16> to vector<4x8xbf16>
    %cst_64 = arith.constant dense<0.000000e+00> : vector<1x16x16x8xf32>
    %60 = tpu.matmul %57, %59, %cst_64 {dimension_numbers = #tpu.dot_dimension_numbers<[3], [0], [0, 1, 2], [1], [0, 0, 0, 1, 0, 2, 1, 1], [], []>} : vector<1x16x16x4xbf16>, vector<4x8xbf16>, vector<1x16x16x8xf32> -> vector<1x16x16x8xf32>
    %61 = arith.addf %56, %60 : vector<1x16x16x8xf32>
    %62 = vector.extract_strided_slice %52 {offsets = [0, 2, 0, 0], sizes = [1, 16, 16, 4], strides = [1, 1, 1, 1]} : vector<1x18x16x4xbf16> to vector<1x16x16x4xbf16>
    %c8 = arith.constant 8 : index
    %c0_65 = arith.constant 0 : index
    %c0_66 = arith.constant 0 : index
    %63 = vector.load %arg2[%c8, %c0_65, %c0_66] : memref<9x4x8xbf16, #tpu.memory_space<vmem>>, vector<1x4x8xbf16>
    %64 = vector.shape_cast %63 : vector<1x4x8xbf16> to vector<4x8xbf16>
    %cst_67 = arith.constant dense<0.000000e+00> : vector<1x16x16x8xf32>
    %65 = tpu.matmul %62, %64, %cst_67 {dimension_numbers = #tpu.dot_dimension_numbers<[3], [0], [0, 1, 2], [1], [0, 0, 0, 1, 0, 2, 1, 1], [], []>} : vector<1x16x16x4xbf16>, vector<4x8xbf16>, vector<1x16x16x8xf32> -> vector<1x16x16x8xf32>
    %66 = arith.addf %61, %65 : vector<1x16x16x8xf32>
    %c0_68 = arith.constant 0 : index
    %c0_69 = arith.constant 0 : index
    %c0_70 = arith.constant 0 : index
    %c0_71 = arith.constant 0 : index
    %67 = vector.load %arg9[%c0_68, %c0_69, %c0_70, %c0_71] : memref<1x16x16x8xf32, #tpu.memory_space<vmem>>, vector<1x16x16x8xf32>
    %68 = arith.addf %67, %66 : vector<1x16x16x8xf32>
    %c0_72 = arith.constant 0 : index
    %c0_73 = arith.constant 0 : index
    %c0_74 = arith.constant 0 : index
    %c0_75 = arith.constant 0 : index
    %69 = vector.load %arg9[%c0_72, %c0_73, %c0_74, %c0_75] : memref<1x16x16x8xf32, #tpu.memory_space<vmem>>, vector<1x16x16x8xf32>
    tpu.vector_store %arg9[%c0_72, %c0_73, %c0_74, %c0_75], %68 {strides = array<i32>} : memref<1x16x16x8xf32, #tpu.memory_space<vmem>>, vector<1x16x16x8xf32>,
    %c0_76 = arith.constant 0 : index
    %c0_77 = arith.constant 0 : index
    %c0_78 = arith.constant 0 : index
    %c0_79 = arith.constant 0 : index
    %70 = vector.load %arg9[%c0_76, %c0_77, %c0_78, %c0_79] : memref<1x16x16x8xf32, #tpu.memory_space<vmem>>, vector<1x16x16x8xf32>
    %c0_80 = arith.constant 0 : index
    %c0_81 = arith.constant 0 : index
    %c0_82 = arith.constant 0 : index
    %c0_83 = arith.constant 0 : index
    %71 = vector.load %arg5[%c0_80, %c0_81, %c0_82, %c0_83] : memref<1x16x16x8xf32, #tpu.memory_space<vmem>>, vector<1x16x16x8xf32>
    tpu.vector_store %arg5[%c0_80, %c0_81, %c0_82, %c0_83], %70 {strides = array<i32>} : memref<1x16x16x8xf32, #tpu.memory_space<vmem>>, vector<1x16x16x8xf32>,
    %cst_84 = arith.constant dense<0.000000e+00> : vector<1x8xf32>
    %72 = vector.multi_reduction <add>, %70, %cst_84 [1, 2] : vector<1x16x16x8xf32> to vector<1x8xf32>
    %73 = vector.shape_cast %72 : vector<1x8xf32> to vector<1x1x8xf32>
    %c0_85 = arith.constant 0 : index
    %c0_86 = arith.constant 0 : index
    %c0_87 = arith.constant 0 : index
    %74 = vector.load %arg6[%c0_85, %c0_86, %c0_87] : memref<1x1x8xf32, #tpu.memory_space<vmem>>, vector<1x1x8xf32>
    tpu.vector_store %arg6[%c0_85, %c0_86, %c0_87], %73 {strides = array<i32>} : memref<1x1x8xf32, #tpu.memory_space<vmem>>, vector<1x1x8xf32>,
    %75 = arith.mulf %70, %70 : vector<1x16x16x8xf32>
    %cst_88 = arith.constant dense<0.000000e+00> : vector<1x8xf32>
    %76 = vector.multi_reduction <add>, %75, %cst_88 [1, 2] : vector<1x16x16x8xf32> to vector<1x8xf32>
    %77 = vector.shape_cast %76 : vector<1x8xf32> to vector<1x1x8xf32>
    %c0_89 = arith.constant 0 : index
    %c0_90 = arith.constant 0 : index
    %c0_91 = arith.constant 0 : index
    %78 = vector.load %arg7[%c0_89, %c0_90, %c0_91] : memref<1x1x8xf32, #tpu.memory_space<vmem>>, vector<1x1x8xf32>
    tpu.vector_store %arg7[%c0_89, %c0_90, %c0_91], %77 {strides = array<i32>} : memref<1x1x8xf32, #tpu.memory_space<vmem>>, vector<1x1x8xf32>,
    return
  }
  func.func @transform_0(%arg0: i32) -> (i32, i32, i32, i32) {
    %c0_i32 = arith.constant 0 : i32
    %c0_i32_0 = arith.constant 0 : i32
    %c0_i32_1 = arith.constant 0 : i32
    %c0_i32_2 = arith.constant 0 : i32
    return %arg0, %c0_i32, %c0_i32_0, %c0_i32_1 : i32, i32, i32, i32
  }
  func.func @transform_1(%arg0: i32) -> (i32, i32, i32) {
    %c0_i32 = arith.constant 0 : i32
    %c0_i32_0 = arith.constant 0 : i32
    %c0_i32_1 = arith.constant 0 : i32
    %c0_i32_2 = arith.constant 0 : i32
    return %c0_i32, %c0_i32_0, %c0_i32_1 : i32, i32, i32
  }
  func.func @transform_2(%arg0: i32) -> (i32, i32) {
    %c0_i32 = arith.constant 0 : i32
    %c0_i32_0 = arith.constant 0 : i32
    %c0_i32_1 = arith.constant 0 : i32
    return %c0_i32, %c0_i32_0 : i32, i32
  }
  func.func @transform_3(%arg0: i32) -> (i32, i32) {
    %c0_i32 = arith.constant 0 : i32
    %c0_i32_0 = arith.constant 0 : i32
    %c0_i32_1 = arith.constant 0 : i32
    return %c0_i32, %c0_i32_0 : i32, i32
  }
  func.func @transform_4(%arg0: i32) -> (i32, i32, i32, i32) {
    %c0_i32 = arith.constant 0 : i32
    %c0_i32_0 = arith.constant 0 : i32
    %c0_i32_1 = arith.constant 0 : i32
    %c0_i32_2 = arith.constant 0 : i32
    return %arg0, %c0_i32, %c0_i32_0, %c0_i32_1 : i32, i32, i32, i32
  }
  func.func @transform_5(%arg0: i32) -> (i32, i32, i32) {
    %c0_i32 = arith.constant 0 : i32
    %c0_i32_0 = arith.constant 0 : i32
    %c0_i32_1 = arith.constant 0 : i32
    return %arg0, %c0_i32, %c0_i32_0 : i32, i32, i32
  }
  func.func @transform_6(%arg0: i32) -> (i32, i32, i32) {
    %c0_i32 = arith.constant 0 : i32
    %c0_i32_0 = arith.constant 0 : i32
    %c0_i32_1 = arith.constant 0 : i32
    return %arg0, %c0_i32, %c0_i32_0 : i32, i32, i32
  }
}

module attributes {stable_mosaic.version = 11 : i64} {
  func.func @_bn_relu_kernel(%arg0: i32, %arg1: memref<1x16x16x8xf32, #tpu.memory_space<vmem>>, %arg2: memref<1x8xf32, #tpu.memory_space<vmem>>, %arg3: memref<1x8xf32, #tpu.memory_space<vmem>>, %arg4: memref<1x16x16x8xf32, #tpu.memory_space<vmem>>) attributes {dimension_semantics = [#tpu.dimension_semantics<parallel>], iteration_bounds = array<i64: 2>, scalar_prefetch = 0 : i64, scratch_operands = 0 : i64, tpu.core_type = #tpu.core_type<tc>, window_params = [{transform_indices = @transform_0, window_bounds = array<i64: 1, 16, 16, 8>}, {pipeline_mode = #tpu.pipeline_mode<synchronous>, transform_indices = @transform_1, window_bounds = array<i64: 1, 8>}, {pipeline_mode = #tpu.pipeline_mode<synchronous>, transform_indices = @transform_2, window_bounds = array<i64: 1, 8>}, {transform_indices = @transform_3, window_bounds = array<i64: 1, 16, 16, 8>}]} {
    %c0 = arith.constant 0 : index
    %c0_0 = arith.constant 0 : index
    %c0_1 = arith.constant 0 : index
    %c0_2 = arith.constant 0 : index
    %0 = vector.load %arg1[%c0, %c0_0, %c0_1, %c0_2] : memref<1x16x16x8xf32, #tpu.memory_space<vmem>>, vector<1x16x16x8xf32>
    %c0_3 = arith.constant 0 : index
    %c0_4 = arith.constant 0 : index
    %1 = vector.load %arg2[%c0_3, %c0_4] : memref<1x8xf32, #tpu.memory_space<vmem>>, vector<1x8xf32>
    %2 = vector.shape_cast %1 : vector<1x8xf32> to vector<1x1x1x8xf32>
    %c0_5 = arith.constant 0 : index
    %c0_6 = arith.constant 0 : index
    %3 = vector.load %arg3[%c0_5, %c0_6] : memref<1x8xf32, #tpu.memory_space<vmem>>, vector<1x8xf32>
    %4 = vector.shape_cast %3 : vector<1x8xf32> to vector<1x1x1x8xf32>
    %5 = vector.broadcast %2 : vector<1x1x1x8xf32> to vector<1x16x16x8xf32>
    %6 = arith.mulf %0, %5 : vector<1x16x16x8xf32>
    %7 = vector.broadcast %4 : vector<1x1x1x8xf32> to vector<1x16x16x8xf32>
    %8 = arith.addf %6, %7 : vector<1x16x16x8xf32>
    %cst = arith.constant 0.000000e+00 : f32
    %9 = vector.broadcast %cst : f32 to vector<1x16x16x8xf32>
    %10 = arith.maximumf %8, %9 : vector<1x16x16x8xf32>
    %c0_7 = arith.constant 0 : index
    %c0_8 = arith.constant 0 : index
    %c0_9 = arith.constant 0 : index
    %c0_10 = arith.constant 0 : index
    %11 = vector.load %arg4[%c0_7, %c0_8, %c0_9, %c0_10] : memref<1x16x16x8xf32, #tpu.memory_space<vmem>>, vector<1x16x16x8xf32>
    tpu.vector_store %arg4[%c0_7, %c0_8, %c0_9, %c0_10], %10 {strides = array<i32>} : memref<1x16x16x8xf32, #tpu.memory_space<vmem>>, vector<1x16x16x8xf32>,
    return
  }
  func.func @transform_0(%arg0: i32) -> (i32, i32, i32, i32) {
    %c0_i32 = arith.constant 0 : i32
    %c0_i32_0 = arith.constant 0 : i32
    %c0_i32_1 = arith.constant 0 : i32
    %c0_i32_2 = arith.constant 0 : i32
    return %arg0, %c0_i32, %c0_i32_0, %c0_i32_1 : i32, i32, i32, i32
  }
  func.func @transform_1(%arg0: i32) -> (i32, i32) {
    %c0_i32 = arith.constant 0 : i32
    %c0_i32_0 = arith.constant 0 : i32
    %c0_i32_1 = arith.constant 0 : i32
    return %c0_i32, %c0_i32_0 : i32, i32
  }
  func.func @transform_2(%arg0: i32) -> (i32, i32) {
    %c0_i32 = arith.constant 0 : i32
    %c0_i32_0 = arith.constant 0 : i32
    %c0_i32_1 = arith.constant 0 : i32
    return %c0_i32, %c0_i32_0 : i32, i32
  }
  func.func @transform_3(%arg0: i32) -> (i32, i32, i32, i32) {
    %c0_i32 = arith.constant 0 : i32
    %c0_i32_0 = arith.constant 0 : i32
    %c0_i32_1 = arith.constant 0 : i32
    %c0_i32_2 = arith.constant 0 : i32
    return %arg0, %c0_i32, %c0_i32_0, %c0_i32_1 : i32, i32, i32, i32
  }
}

</mosaic_0001>

<bundles_post_ra>
// kernel: up_forward.5
= control target key start
LH: loop header
LB: loop body
LE: loop exit
PB: predicated region body
PF: predicated region fallthrough
CT: control target
= control target key end

     0   :  { %s452_s12 = smov 0   ;;  %s643_s0 = inlined_call_operand.vmem [shape: f32[2,16,16,8], index: 0, kind: input, shape index: {}]   ;;  %s644_s1 = inlined_call_operand.vmem [shape: f32[1,8], index: 1, kind: input, shape index: {}]   ;;  %s645_s2 = inlined_call_operand.vmem [shape: f32[1,8], index: 2, kind: input, shape index: {}]   ;;  %s646_s3 = inlined_call_operand.vmem [shape: f32[2,16,16,8], index: 3, kind: output, shape index: {}]  }
   0x1 LB: > { %s401_s13 = sadd.s32 4294967295, %s430_s12   ;;  %p405_p0 = scmp.ge.s32.totalorder %s430_s12, 1  ;;  %s430_s12 = sphi %s452_s12, %s13_s12  }
   0x2   : > { %p137_p1 = scmp.lt.s32.totalorder %s430_s12, 3 }
   0x4   : > { %p138_p2 = pnand %p405_p0, %p137_p1 }
   0x5   : > { %p161_p3 = scmp.lt.s32.totalorder (!%p138_p2), %s401_s13, 1 }
   0x6   : > { %141 = sbr.rel (%p138_p2) target bundleno = 44 (0x2c), region = 32 }
   0xb   : > { %s648_s13 = smov (!%p161_p3, %s401_s13), 1  ;;  %v463_v0 = vld [vmem:[%s644_s1] ss:$0 sm:$0xff]  ;;  %vm313_vm0 = vcmask 64512  }
   0xc   : > { %s414_s14 = sshll.u32 %s648_s13, 8  ;;  %v473_v1 = vld [vmem:[%s645_s2] ss:$0 sm:$0xff] }
   0xd   : > { %s468_s19 = scalar_lea.vmem %s643_s0, %s414_s14  ;;  %s496_s24 = scalar_lea.vmem %s646_s3, %s414_s14 }
   0xe   : > { %v171_v2 = vld [vmem:[%s468_s19] sm:$0xff]  ;;  %v172_v3 = vld [vmem:[%s468_s19 + $0x8] sm:$0xff]  ;;  %v173_v4 = vld [vmem:[%s468_s19 + $0x10] sm:$0xff] }
   0xf   : > { %v211_v5 = vmul.f32 %v463_v0, %v171_v2  ;;  %v212_v6 = vmul.f32 %v463_v0, %v172_v3  ;;  %v213_v7 = vmul.f32 %v463_v0, %v173_v4  ;;  %v174_v8 = vld [vmem:[%s468_s19 + $0x18] sm:$0xff]  ;;  %v175_v9 = vld [vmem:[%s468_s19 + $0x20] sm:$0xff]  ;;  %v176_v10 = vld [vmem:[%s468_s19 + $0x28] sm:$0xff] }
  0x10   : > { %v214_v11 = vmul.f32 %v463_v0, %v174_v8  ;;  %v215_v12 = vmul.f32 %v463_v0, %v175_v9  ;;  %v216_v13 = vmul.f32 %v463_v0, %v176_v10  ;;  %v177_v14 = vld [vmem:[%s468_s19 + $0x30] sm:$0xff]  ;;  %v178_v15 = vld [vmem:[%s468_s19 + $0x38] sm:$0xff]  ;;  %v179_v24 = vld [vmem:[%s468_s19 + $0x40] sm:$0xff] }
  0x11   : > { %v249_v16 = vadd.f32 %v473_v1, %v211_v5  ;;  %v250_v17 = vadd.f32 %v473_v1, %v212_v6  ;;  %v251_v18 = vadd.f32 %v473_v1, %v213_v7  ;;  %v217_v19 = vmul.f32 %v463_v0, %v177_v14  ;;  %v180_v25 = vld [vmem:[%s468_s19 + $0x48] sm:$0xff]  ;;  %v181_v26 = vld [vmem:[%s468_s19 + $0x50] sm:$0xff]  ;;  %v182_v31 = vld [vmem:[%s468_s19 + $0x58] sm:$0xff] }
  0x12   : > { %v252_v20 = vadd.f32 %v473_v1, %v214_v11  ;;  %v253_v21 = vadd.f32 %v473_v1, %v215_v12  ;;  %v254_v22 = vadd.f32 %v473_v1, %v216_v13  ;;  %v218_v23 = vmul.f32 %v463_v0, %v178_v15  ;;  %v183_v32 = vld [vmem:[%s468_s19 + $0x60] sm:$0xff]  ;;  %v184_v33 = vld [vmem:[%s468_s19 + $0x68] sm:$0xff]  ;;  %v185_v38 = vld [vmem:[%s468_s19 + $0x70] sm:$0xff] }
  0x13   : > { %v281_v27 = vmax.f32 %v249_v16, 0.0  ;;  %v282_v28 = vmax.f32 %v250_v17, 0.0  ;;  %v283_v29 = vmax.f32 %v251_v18, 0.0  ;;  %v255_v30 = vadd.f32 %v473_v1, %v217_v19  ;;  %v186_v43 = vld [vmem:[%s468_s19 + $0x78] sm:$0xff]  ;;  %v187_v56 = vld [vmem:[%s468_s19 + $0x80] sm:$0xff]  ;;  %v188_v57 = vld [vmem:[%s468_s19 + $0x88] sm:$0xff] }
  0x14   : > { %v284_v34 = vmax.f32 %v252_v20, 0.0  ;;  %v285_v35 = vmax.f32 %v253_v21, 0.0  ;;  %v286_v36 = vmax.f32 %v254_v22, 0.0  ;;  %v256_v37 = vadd.f32 %v473_v1, %v218_v23  ;;  %v189_v58 = vld [vmem:[%s468_s19 + $0x90] sm:$0xff]  ;;  %v190_v63 = vld [vmem:[%s468_s19 + $0x98] sm:$0xff]  ;;  %v191_v2 = vld [vmem:[%s468_s19 + $0xa0] sm:$0xff] }
  0x15   : > { %314 = vst.msk [vmem:[%s496_s24] sm:$0xff] %vm313_vm0, %v281_v27  ;;  %315 = vst.msk [vmem:[%s496_s24 + $0x8] sm:$0xff] %vm313_vm0, %v282_v28  ;;  %v287_v39 = vmax.f32 %v255_v30, 0.0  ;;  %v219_v40 = vmul.f32 %v463_v0, %v179_v24  ;;  %v220_v41 = vmul.f32 %v463_v0, %v180_v25  ;;  %v221_v42 = vmul.f32 %v463_v0, %v181_v26  ;;  %v192_v3 = vld [vmem:[%s468_s19 + $0xa8] sm:$0xff]  ;;  %v193_v8 = vld [vmem:[%s468_s19 + $0xb0] sm:$0xff] }
  0x16   : > { %316 = vst.msk [vmem:[%s496_s24 + $0x10] sm:$0xff] %vm313_vm0, %v283_v29  ;;  %317 = vst.msk [vmem:[%s496_s24 + $0x18] sm:$0xff] %vm313_vm0, %v284_v34  ;;  %v288_v44 = vmax.f32 %v256_v37, 0.0  ;;  %v222_v45 = vmul.f32 %v463_v0, %v182_v31  ;;  %v223_v46 = vmul.f32 %v463_v0, %v183_v32  ;;  %v224_v47 = vmul.f32 %v463_v0, %v184_v33  ;;  %v194_v13 = vld [vmem:[%s468_s19 + $0xb8] sm:$0xff]  ;;  %v195_v26 = vld [vmem:[%s468_s19 + $0xc0] sm:$0xff] }
  0x17   : > { %318 = vst.msk [vmem:[%s496_s24 + $0x20] sm:$0xff] %vm313_vm0, %v285_v35  ;;  %319 = vst.msk [vmem:[%s496_s24 + $0x28] sm:$0xff] %vm313_vm0, %v286_v36  ;;  %v257_v48 = vadd.f32 %v473_v1, %v219_v40  ;;  %v258_v49 = vadd.f32 %v473_v1, %v220_v41  ;;  %v259_v50 = vadd.f32 %v473_v1, %v221_v42  ;;  %v196_v27 = vld [vmem:[%s468_s19 + $0xc8] sm:$0xff]  ;;  %v197_v28 = vld [vmem:[%s468_s19 + $0xd0] sm:$0xff] }
  0x18   : > { %320 = vst.msk [vmem:[%s496_s24 + $0x30] sm:$0xff] %vm313_vm0, %v287_v39  ;;  %v225_v51 = vmul.f32 %v463_v0, %v185_v38  ;;  %321 = vst.msk [vmem:[%s496_s24 + $0x38] sm:$0xff] %vm313_vm0, %v288_v44  ;;  %v260_v52 = vadd.f32 %v473_v1, %v222_v45  ;;  %v261_v53 = vadd.f32 %v473_v1, %v223_v46  ;;  %v198_v33 = vld [vmem:[%s468_s19 + $0xd8] sm:$0xff]  ;;  %v199_v34 = vld [vmem:[%s468_s19 + $0xe0] sm:$0xff] }
  0x19   : > { %v262_v54 = vadd.f32 %v473_v1, %v224_v47  ;;  %v226_v55 = vmul.f32 %v463_v0, %v186_v43  ;;  %v289_v59 = vmax.f32 %v257_v48, 0.0  ;;  %v290_v60 = vmax.f32 %v258_v49, 0.0  ;;  %v200_v35 = vld [vmem:[%s468_s19 + $0xe8] sm:$0xff]  ;;  %v201_v40 = vld [vmem:[%s468_s19 + $0xf0] sm:$0xff]  ;;  %v202_v45 = vld [vmem:[%s468_s19 + $0xf8] sm:$0xff] }
  0x1a   : > { %v291_v61 = vmax.f32 %v259_v50, 0.0  ;;  %v263_v62 = vadd.f32 %v473_v1, %v225_v51  ;;  %v292_v4 = vmax.f32 %v260_v52, 0.0  ;;  %v293_v5 = vmax.f32 %v261_v53, 0.0 }
  0x1b   : > { %v294_v6 = vmax.f32 %v262_v54, 0.0  ;;  %v264_v7 = vadd.f32 %v473_v1, %v226_v55  ;;  %322 = vst.msk [vmem:[%s496_s24 + $0x40] sm:$0xff] %vm313_vm0, %v289_v59  ;;  %323 = vst.msk [vmem:[%s496_s24 + $0x48] sm:$0xff] %vm313_vm0, %v290_v60  ;;  %v227_v10 = vmul.f32 %v463_v0, %v187_v56  ;;  %v228_v11 = vmul.f32 %v463_v0, %v188_v57 }
  0x1c   : > { %324 = vst.msk [vmem:[%s496_s24 + $0x50] sm:$0xff] %vm313_vm0, %v291_v61  ;;  %v295_v9 = vmax.f32 %v263_v62, 0.0  ;;  %v229_v12 = vmul.f32 %v463_v0, %v189_v58  ;;  %325 = vst.msk [vmem:[%s496_s24 + $0x58] sm:$0xff] %vm313_vm0, %v292_v4  ;;  %v230_v15 = vmul.f32 %v463_v0, %v190_v63  ;;  %v231_v16 = vmul.f32 %v463_v0, %v191_v2 }
  0x1d   : > { %326 = vst.msk [vmem:[%s496_s24 + $0x60] sm:$0xff] %vm313_vm0, %v293_v5  ;;  %327 = vst.msk [vmem:[%s496_s24 + $0x68] sm:$0xff] %vm313_vm0, %v294_v6  ;;  %v296_v14 = vmax.f32 %v264_v7, 0.0  ;;  %v232_v17 = vmul.f32 %v463_v0, %v192_v3  ;;  %v265_v18 = vadd.f32 %v473_v1, %v227_v10  ;;  %v266_v19 = vadd.f32 %v473_v1, %v228_v11 }
  0x1e   : > { %328 = vst.msk [vmem:[%s496_s24 + $0x70] sm:$0xff] %vm313_vm0, %v295_v9  ;;  %v267_v20 = vadd.f32 %v473_v1, %v229_v12  ;;  %v233_v21 = vmul.f32 %v463_v0, %v193_v8  ;;  %v268_v22 = vadd.f32 %v473_v1, %v230_v15  ;;  %v269_v23 = vadd.f32 %v473_v1, %v231_v16 }
  0x1f   : > { %329 = vst.msk [vmem:[%s496_s24 + $0x78] sm:$0xff] %vm313_vm0, %v296_v14  ;;  %v270_v24 = vadd.f32 %v473_v1, %v232_v17  ;;  %v234_v25 = vmul.f32 %v463_v0, %v194_v13  ;;  %v297_v29 = vmax.f32 %v265_v18, 0.0  ;;  %v298_v30 = vmax.f32 %v266_v19, 0.0 }
  0x20   : > { %v299_v31 = vmax.f32 %v267_v20, 0.0  ;;  %v271_v32 = vadd.f32 %v473_v1, %v233_v21  ;;  %v300_v36 = vmax.f32 %v268_v22, 0.0  ;;  %v301_v37 = vmax.f32 %v269_v23, 0.0 }
  0x21   : > { %v302_v38 = vmax.f32 %v270_v24, 0.0  ;;  %v272_v39 = vadd.f32 %v473_v1, %v234_v25  ;;  %330 = vst.msk [vmem:[%s496_s24 + $0x80] sm:$0xff] %vm313_vm0, %v297_v29  ;;  %331 = vst.msk [vmem:[%s496_s24 + $0x88] sm:$0xff] %vm313_vm0, %v298_v30  ;;  %v235_v42 = vmul.f32 %v463_v0, %v195_v26  ;;  %v236_v43 = vmul.f32 %v463_v0, %v196_v27 }
  0x22   : > { %332 = vst.msk [vmem:[%s496_s24 + $0x90] sm:$0xff] %vm313_vm0, %v299_v31  ;;  %v303_v41 = vmax.f32 %v271_v32, 0.0  ;;  %v237_v44 = vmul.f32 %v463_v0, %v197_v28  ;;  %333 = vst.msk [vmem:[%s496_s24 + $0x98] sm:$0xff] %vm313_vm0, %v300_v36  ;;  %v238_v47 = vmul.f32 %v463_v0, %v198_v33  ;;  %v239_v48 = vmul.f32 %v463_v0, %v199_v34 }
  0x23   : > { %334 = vst.msk [vmem:[%s496_s24 + $0xa0] sm:$0xff] %vm313_vm0, %v301_v37  ;;  %335 = vst.msk [vmem:[%s496_s24 + $0xa8] sm:$0xff] %vm313_vm0, %v302_v38  ;;  %v304_v46 = vmax.f32 %v272_v39, 0.0  ;;  %v240_v49 = vmul.f32 %v463_v0, %v200_v35  ;;  %v273_v50 = vadd.f32 %v473_v1, %v235_v42  ;;  %v274_v51 = vadd.f32 %v473_v1, %v236_v43 }
  0x24   : > { %336 = vst.msk [vmem:[%s496_s24 + $0xb0] sm:$0xff] %vm313_vm0, %v303_v41  ;;  %v275_v52 = vadd.f32 %v473_v1, %v237_v44  ;;  %v241_v53 = vmul.f32 %v463_v0, %v201_v40  ;;  %v276_v54 = vadd.f32 %v473_v1, %v238_v47  ;;  %v277_v55 = vadd.f32 %v473_v1, %v239_v48 }
  0x25   : > { %337 = vst.msk [vmem:[%s496_s24 + $0xb8] sm:$0xff] %vm313_vm0, %v304_v46  ;;  %v278_v56 = vadd.f32 %v473_v1, %v240_v49  ;;  %v242_v57 = vmul.f32 %v463_v0, %v202_v45  ;;  %v305_v58 = vmax.f32 %v273_v50, 0.0  ;;  %v306_v59 = vmax.f32 %v274_v51, 0.0 }
  0x26   : > { %v307_v60 = vmax.f32 %v275_v52, 0.0  ;;  %v279_v61 = vadd.f32 %v473_v1, %v241_v53  ;;  %v308_v62 = vmax.f32 %v276_v54, 0.0  ;;  %v309_v63 = vmax.f32 %v277_v55, 0.0 }
  0x27   : > { %v310_v2 = vmax.f32 %v278_v56, 0.0  ;;  %v280_v3 = vadd.f32 %v473_v1, %v242_v57  ;;  %338 = vst.msk [vmem:[%s496_s24 + $0xc0] sm:$0xff] %vm313_vm0, %v305_v58  ;;  %339 = vst.msk [vmem:[%s496_s24 + $0xc8] sm:$0xff] %vm313_vm0, %v306_v59 }
  0x28   : > { %340 = vst.msk [vmem:[%s496_s24 + $0xd0] sm:$0xff] %vm313_vm0, %v307_v60  ;;  %v311_v4 = vmax.f32 %v279_v61, 0.0  ;;  %341 = vst.msk [vmem:[%s496_s24 + $0xd8] sm:$0xff] %vm313_vm0, %v308_v62 }
  0x29   : > { %342 = vst.msk [vmem:[%s496_s24 + $0xe0] sm:$0xff] %vm313_vm0, %v309_v63  ;;  %343 = vst.msk [vmem:[%s496_s24 + $0xe8] sm:$0xff] %vm313_vm0, %v310_v2  ;;  %v312_v0 = vmax.f32 %v280_v3, 0.0 }
  0x2a   : > { %344 = vst.msk [vmem:[%s496_s24 + $0xf0] sm:$0xff] %vm313_vm0, %v311_v4 }
  0x2b   : > { %345 = vst.msk [vmem:[%s496_s24 + $0xf8] sm:$0xff] %vm313_vm0, %v312_v0 }
  0x2c PF: > { %s13_s12 = sadd.s32 1, %s430_s12  }
  0x2d   : > { %p10_p4 = scmp.ge.s32.totalorder %s13_s12, 4  }
  0x2f   :  { %12 = sbr.rel (!%p10_p4) target bundleno = 1 (0x1), region = 62 }

// kernel: up_forward.4
= control target key start
LH: loop header
LB: loop body
LE: loop exit
PB: predicated region body
PF: predicated region fallthrough
CT: control target
= control target key end

     0   :  { %s3784_s21 = smov 0   ;;  %s5026_s0 = inlined_call_operand.vmem [shape: bf16[2,16,16,4], index: 0, kind: input, shape index: {}]   ;;  %s5027_s1 = inlined_call_operand.vmem [shape: bf16[9,4,8], index: 1, kind: input, shape index: {}]   ;;  %s5028_s2 = inlined_call_operand.vmem [shape: f32[1,4], index: 2, kind: input, shape index: {}]   ;;  %s5029_s3 = inlined_call_operand.vmem [shape: f32[1,4], index: 3, kind: input, shape index: {}]   ;;  %s5030_s4 = inlined_call_operand.vmem [shape: f32[2,16,16,8], index: 4, kind: output, shape index: {0}]   ;;  %s5031_s5 = inlined_call_operand.vmem [shape: f32[2,1,8], index: 5, kind: output, shape index: {1}]   ;;  %s5032_s6 = inlined_call_operand.vmem [shape: f32[2,1,8], index: 6, kind: output, shape index: {2}]  }
   0x1 LB: > { %s3014_s22 = sadd.s32 4294967295, %s3746_s21   ;;  %p3018_p0 = scmp.ge.s32.totalorder %s3746_s21, 1  ;;  %s3746_s21 = sphi %s3784_s21, %s17_s21  }
   0x2   : > { %p217_p1 = scmp.lt.s32.totalorder %s3746_s21, 3 }
   0x4   : > { %p218_p2 = pnand %p3018_p0, %p217_p1 }
   0x6   : > { %221 = sbr.rel (%p218_p2) target bundleno = 568 (0x238), region = 36 }
   0xb   : > { %v3025_v0 = vld [vmem:[%s5027_s1 + $0x6] sm:$0x3]  ;;  %vm638_vm0 = vcmask 1041408   ;;  %p253_p3 = scmp.lt.s32.totalorder %s3014_s22, 1  ;;  %vm444_vm1 = vcmask 31744   ;;  %vm447_vm2 = vcmask 25600  }
   0xc   : > { %3722 = vmatprep.subr.msk.bf16.mxu1 %vm638_vm0, %v3025_v0  ;;  %3721 = vmatprep.subr.msk.bf16.mxu0 %vm638_vm0, %v3025_v0  ;;  %v640_v1 = vsel %vm638_vm0, %v3025_v0, 0  ;;  %v3748_v2 = vmov 0.0   ;;  %v587_v3 = vld [vmem:[%s5027_s1] sm:$0x3]  ;;  %v3058_v4 = vld [vmem:[%s5027_s1 + $0xc] sm:$0x3] }
   0xd   : > { %3720 = vmatpush3.bf16.msra.mxu1 %v640_v1  ;;  %3414 = vmatpush3.bf16.msra.mxu0 %v640_v1  ;;  %s5062_s22 = smov (!%p253_p3, %s3014_s22), 1  ;;  %449 = vst.msk [vmem:[#allocation2 + $0x18] sm:$0xff] %vm444_vm1, %v3748_v2  ;;  %450 = vst.msk [vmem:[#allocation2 + $0x20] sm:$0xff] %vm444_vm1, %v3748_v2  ;;  %v3871_v5 = vld [vmem:[%s5028_s2] ss:$0 sm:$0xff]  ;;  %v3877_v9 = vsel %vm638_vm0, %v587_v3, 0 }
   0xe   : > { %451 = vst.msk [vmem:[#allocation2 + $0x28] sm:$0x3] %vm447_vm2, %v3748_v2  ;;  %448 = vst.msk [vmem:[#allocation2 + $0x10] sm:$0x3] %vm447_vm2, %v3748_v2  ;;  %3723 = vmatprep.subr.msk.bf16.mxu1 %vm638_vm0, %v587_v3  ;;  %3724 = vmatprep.subr.msk.bf16.mxu0 %vm638_vm0, %v3058_v4  ;;  %s3179_s29 = sshll.u32 %s5062_s22, 7  ;;  %v3880_v10 = vsel %vm638_vm0, %v3058_v4, 0  ;;  %s265_s9 = scalar_lea.vmem %s5031_s5, %s5062_s22 }
   0xf   : > { %445 = vst.msk [vmem:[#allocation2] sm:$0xff] %vm444_vm1, %v3748_v2  ;;  %446 = vst.msk [vmem:[#allocation2 + $0x8] sm:$0xff] %vm444_vm1, %v3748_v2  ;;  %s3866_s8 = scalar_lea.vmem %s5026_s0, %s3179_s29  ;;  %v3886_v16 = vld [vmem:[%s5029_s3] ss:$0 sm:$0xff]  ;;  %vm1171_vm3 = vcmask 64512   ;;  %s3180_s27 = sshll.u32 %s5062_s22, 8 }
  0x10   : > { %452 = vst.msk [vmem:[#allocation2 + $0x30] sm:$0xff] %vm444_vm1, %v3748_v2  ;;  %453 = vst.msk [vmem:[#allocation2 + $0x38] sm:$0xff] %vm444_vm1, %v3748_v2  ;;  %v3182_v6 = vld [vmem:[%s3866_s8] sm:$0xff]   ;;  %v3245_v8 = vld [vmem:[%s3866_s8 + $0x8] sm:$0xff]   ;;  %s4818_s30 = scalar_lea.vmem %s5030_s4, %s3180_s27  ;;  %vm2805_vm4 = vcmask 57344   ;;  %s268_s12 = scalar_lea.vmem %s5032_s6, %s5062_s22 }
  0x11   : > { %454 = vst.msk [vmem:[#allocation2 + $0x40] sm:$0x3] %vm447_vm2, %v3748_v2  ;;  %457 = vst.msk [vmem:[#allocation2 + $0x58] sm:$0x3] %vm447_vm2, %v3748_v2  ;;  %v3252_v7 = vld [vmem:[%s3866_s8 + $0x40] sm:$0xff]   ;;  %v3183_v11 = vunpack.c.l.bf16 %v3182_v6  ;;  %v3184_v12 = vunpack.c.h.bf16 %v3182_v6  ;;  %v3253_v15 = vld [vmem:[%s3866_s8 + $0x48] sm:$0xff]   ;;  %v3187_v17 = vunpack.c.l.bf16 %v3245_v8  ;;  %v3188_v18 = vunpack.c.h.bf16 %v3245_v8 }
  0x12   : > { %455 = vst.msk [vmem:[#allocation2 + $0x48] sm:$0xff] %vm444_vm1, %v3748_v2  ;;  %456 = vst.msk [vmem:[#allocation2 + $0x50] sm:$0xff] %vm444_vm1, %v3748_v2  ;;  %v3215_v13 = vunpack.c.l.bf16 %v3252_v7  ;;  %v3216_v14 = vunpack.c.h.bf16 %v3252_v7  ;;  %v3219_v19 = vunpack.c.l.bf16 %v3253_v15  ;;  %v3220_v20 = vunpack.c.h.bf16 %v3253_v15  ;;  %v3246_v37 = vld [vmem:[%s3866_s8 + $0x10] sm:$0xff]   ;;  %v3247_v43 = vld [vmem:[%s3866_s8 + $0x18] sm:$0xff]  }
  0x13   : > { %458 = vst.msk [vmem:[#allocation2 + $0x60] sm:$0xff] %vm444_vm1, %v3748_v2  ;;  %459 = vst.msk [vmem:[#allocation2 + $0x68] sm:$0xff] %vm444_vm1, %v3748_v2  ;;  %v342_v21 = vmul.f32 %v3183_v11, %v3871_v5  ;;  %v343_v22 = vmul.f32 %v3184_v12, %v3871_v5  ;;  %v344_v25 = vmul.f32 %v3187_v17, %v3871_v5  ;;  %v3254_v38 = vld [vmem:[%s3866_s8 + $0x50] sm:$0xff]   ;;  %v3255_v44 = vld [vmem:[%s3866_s8 + $0x58] sm:$0xff]   ;;  %v3191_v49 = vunpack.c.l.bf16 %v3246_v37 }
  0x14   : > { %460 = vst.msk [vmem:[#allocation2 + $0x70] sm:$0x3] %vm447_vm2, %v3748_v2  ;;  %463 = vst.msk [vmem:[#allocation2 + $0x88] sm:$0x3] %vm447_vm2, %v3748_v2  ;;  %v358_v23 = vmul.f32 %v3215_v13, %v3871_v5  ;;  %v359_v24 = vmul.f32 %v3216_v14, %v3871_v5  ;;  %v345_v26 = vmul.f32 %v3188_v18, %v3871_v5  ;;  %v3192_v50 = vunpack.c.h.bf16 %v3246_v37  ;;  %v3248_v6 = vld [vmem:[%s3866_s8 + $0x20] sm:$0xff]  }
  0x15   : > { %461 = vst.msk [vmem:[#allocation2 + $0x78] sm:$0xff] %vm444_vm1, %v3748_v2  ;;  %462 = vst.msk [vmem:[#allocation2 + $0x80] sm:$0xff] %vm444_vm1, %v3748_v2  ;;  %v360_v27 = vmul.f32 %v3219_v19, %v3871_v5  ;;  %v361_v28 = vmul.f32 %v3220_v20, %v3871_v5  ;;  %v380_v29 = vadd.f32 %v3886_v16, %v342_v21  ;;  %v3223_v51 = vunpack.c.l.bf16 %v3254_v38  ;;  %v3256_v13 = vld [vmem:[%s3866_s8 + $0x60] sm:$0xff]   ;;  %v3249_v19 = vld [vmem:[%s3866_s8 + $0x28] sm:$0xff]  }
  0x16   : > { %464 = vst.msk [vmem:[#allocation2 + $0x90] sm:$0xff] %vm444_vm1, %v3748_v2  ;;  %465 = vst.msk [vmem:[#allocation2 + $0x98] sm:$0xff] %vm444_vm1, %v3748_v2  ;;  %v381_v30 = vadd.f32 %v3886_v16, %v343_v22  ;;  %v396_v31 = vadd.f32 %v3886_v16, %v358_v23  ;;  %v397_v32 = vadd.f32 %v3886_v16, %v359_v24  ;;  %v3224_v52 = vunpack.c.h.bf16 %v3254_v38  ;;  %v3257_v20 = vld [vmem:[%s3866_s8 + $0x68] sm:$0xff]  }
  0x17   : > { %466 = vst.msk [vmem:[#allocation2 + $0xa0] sm:$0x3] %vm447_vm2, %v3748_v2  ;;  %469 = vst.msk [vmem:[#allocation2 + $0xb8] sm:$0x3] %vm447_vm2, %v3748_v2  ;;  %v382_v33 = vadd.f32 %v3886_v16, %v344_v25  ;;  %v383_v34 = vadd.f32 %v3886_v16, %v345_v26  ;;  %v398_v35 = vadd.f32 %v3886_v16, %v360_v27  ;;  %v412_v39 = vmax.f32 %v380_v29, 0.0 }
  0x18   : > { %467 = vst.msk [vmem:[#allocation2 + $0xa8] sm:$0xff] %vm444_vm1, %v3748_v2  ;;  %468 = vst.msk [vmem:[#allocation2 + $0xb0] sm:$0xff] %vm444_vm1, %v3748_v2  ;;  %v399_v36 = vadd.f32 %v3886_v16, %v361_v28  ;;  %v413_v40 = vmax.f32 %v381_v30, 0.0  ;;  %v428_v41 = vmax.f32 %v396_v31, 0.0  ;;  %v429_v42 = vmax.f32 %v397_v32, 0.0 }
  0x19   : > { %470 = vst.msk [vmem:[#allocation2 + $0xc0] sm:$0xff] %vm444_vm1, %v3748_v2  ;;  %471 = vst.msk [vmem:[#allocation2 + $0xc8] sm:$0xff] %vm444_vm1, %v3748_v2  ;;  %v414_v45 = vmax.f32 %v382_v33, 0.0  ;;  %v415_v46 = vmax.f32 %v383_v34, 0.0  ;;  %v430_v47 = vmax.f32 %v398_v35, 0.0  ;;  %v3195_v53 = vunpack.c.l.bf16 %v3247_v43 }
  0x1a   : > { %472 = vst.msk [vmem:[#allocation2 + $0xd0] sm:$0x3] %vm447_vm2, %v3748_v2  ;;  %475 = vst.msk [vmem:[#allocation2 + $0xe8] sm:$0x3] %vm447_vm2, %v3748_v2  ;;  %v431_v48 = vmax.f32 %v399_v36, 0.0  ;;  %v3196_v54 = vunpack.c.h.bf16 %v3247_v43  ;;  %v3227_v55 = vunpack.c.l.bf16 %v3255_v44  ;;  %v3228_v56 = vunpack.c.h.bf16 %v3255_v44 }
  0x1b   : > { %473 = vst.msk [vmem:[#allocation2 + $0xd8] sm:$0xff] %vm444_vm1, %v3748_v2  ;;  %474 = vst.msk [vmem:[#allocation2 + $0xe0] sm:$0xff] %vm444_vm1, %v3748_v2  ;;  %v346_v57 = vmul.f32 %v3191_v49, %v3871_v5  ;;  %v347_v58 = vmul.f32 %v3192_v50, %v3871_v5  ;;  %v362_v59 = vmul.f32 %v3223_v51, %v3871_v5  ;;  %v3199_v27 = vunpack.c.l.bf16 %v3248_v6  ;;  %v3971_v50 = vld [vmem:[%s5027_s1 + $0x8] sm:$0x3] }
  0x1c   : > { %476 = vst.msk [vmem:[#allocation2 + $0xf0] sm:$0xff] %vm444_vm1, %v3748_v2  ;;  %477 = vst.msk [vmem:[#allocation2 + $0xf8] sm:$0xff] %vm444_vm1, %v3748_v2  ;;  %v363_v60 = vmul.f32 %v3224_v52, %v3871_v5  ;;  %v348_v61 = vmul.f32 %v3195_v53, %v3871_v5  ;;  %v349_v62 = vmul.f32 %v3196_v54, %v3871_v5  ;;  %v3200_v33 = vunpack.c.h.bf16 %v3248_v6 }
  0x1d   : > { %478 = vst.msk [vmem:[#allocation2 + $0x100] sm:$0x3] %vm447_vm2, %v3748_v2  ;;  %481 = vst.msk [vmem:[#allocation2 + $0x118] sm:$0x3] %vm447_vm2, %v3748_v2  ;;  %v364_v63 = vmul.f32 %v3227_v55, %v3871_v5  ;;  %v365_v0 = vmul.f32 %v3228_v56, %v3871_v5  ;;  %v384_v1 = vadd.f32 %v3886_v16, %v346_v57  ;;  %v3231_v34 = vunpack.c.l.bf16 %v3256_v13  ;;  %v3250_v55 = vld [vmem:[%s3866_s8 + $0x30] sm:$0xff]  }
  0x1e   : > { %479 = vst.msk [vmem:[#allocation2 + $0x108] sm:$0xff] %vm444_vm1, %v3748_v2  ;;  %480 = vst.msk [vmem:[#allocation2 + $0x110] sm:$0xff] %vm444_vm1, %v3748_v2  ;;  %v400_v3 = vadd.f32 %v3886_v16, %v362_v59  ;;  %v401_v4 = vadd.f32 %v3886_v16, %v363_v60  ;;  %v386_v7 = vadd.f32 %v3886_v16, %v348_v61  ;;  %v3203_v44 = vunpack.c.l.bf16 %v3249_v19 }
  0x1f   : > { %482 = vst.msk [vmem:[#allocation2 + $0x120] sm:$0xff] %vm444_vm1, %v3748_v2  ;;  %483 = vst.msk [vmem:[#allocation2 + $0x128] sm:$0xff] %vm444_vm1, %v3748_v2  ;;  %v387_v8 = vadd.f32 %v3886_v16, %v349_v62  ;;  %v402_v11 = vadd.f32 %v3886_v16, %v364_v63  ;;  %v403_v12 = vadd.f32 %v3886_v16, %v365_v0  ;;  %v416_v14 = vmax.f32 %v384_v1, 0.0  ;;  %v3258_v63 = vld [vmem:[%s3866_s8 + $0x70] sm:$0xff]   ;;  %v3251_v0 = vld [vmem:[%s3866_s8 + $0x38] sm:$0xff]  }
  0x20   : > { %484 = vst.msk [vmem:[#allocation2 + $0x130] sm:$0x3] %vm447_vm2, %v3748_v2  ;;  %487 = vst.msk [vmem:[#allocation2 + $0x148] sm:$0x3] %vm447_vm2, %v3748_v2  ;;  %v432_v17 = vmax.f32 %v400_v3, 0.0  ;;  %v433_v18 = vmax.f32 %v401_v4, 0.0  ;;  %v366_v43 = vmul.f32 %v3231_v34, %v3871_v5  ;;  %v3235_v49 = vunpack.c.l.bf16 %v3257_v20 }
  0x21   : > { %485 = vst.msk [vmem:[#allocation2 + $0x138] sm:$0xff] %vm444_vm1, %v3748_v2  ;;  %486 = vst.msk [vmem:[#allocation2 + $0x140] sm:$0xff] %vm444_vm1, %v3748_v2  ;;  %v418_v24 = vmax.f32 %v386_v7, 0.0  ;;  %v419_v25 = vmax.f32 %v387_v8, 0.0  ;;  %v434_v26 = vmax.f32 %v402_v11, 0.0  ;;  %v435_v32 = vmax.f32 %v403_v12, 0.0 }
  0x22   : > { %488 = vst.msk [vmem:[#allocation2 + $0x150] sm:$0xff] %vm444_vm1, %v3748_v2  ;;  %489 = vst.msk [vmem:[#allocation2 + $0x158] sm:$0xff] %vm444_vm1, %v3748_v2  ;;  %v404_v52 = vadd.f32 %v3886_v16, %v366_v43  ;;  %v352_v53 = vmul.f32 %v3203_v44, %v3871_v5  ;;  %v3236_v54 = vunpack.c.h.bf16 %v3257_v20  ;;  %v368_v59 = vmul.f32 %v3235_v49, %v3871_v5 }
  0x23   : > { %490 = vst.msk [vmem:[#allocation2 + $0x160] sm:$0x3] %vm447_vm2, %v3748_v2  ;;  %493 = vst.msk [vmem:[#allocation2 + $0x178] sm:$0x3] %vm447_vm2, %v3748_v2  ;;  %v3207_v7 = vunpack.c.l.bf16 %v3250_v55 }
  0x24   : > { %491 = vst.msk [vmem:[#allocation2 + $0x168] sm:$0xff] %vm444_vm1, %v3748_v2  ;;  %492 = vst.msk [vmem:[#allocation2 + $0x170] sm:$0xff] %vm444_vm1, %v3748_v2  ;;  %v436_v60 = vmax.f32 %v404_v52, 0.0  ;;  %v390_v61 = vadd.f32 %v3886_v16, %v352_v53  ;;  %v369_v62 = vmul.f32 %v3236_v54, %v3871_v5  ;;  %v406_v6 = vadd.f32 %v3886_v16, %v368_v59 }
  0x25   : > { %494 = vst.msk [vmem:[#allocation2 + $0x180] sm:$0xff] %vm444_vm1, %v3748_v2  ;;  %495 = vst.msk [vmem:[#allocation2 + $0x188] sm:$0xff] %vm444_vm1, %v3748_v2 }
  0x26   : > { %496 = vst.msk [vmem:[#allocation2 + $0x190] sm:$0x3] %vm447_vm2, %v3748_v2  ;;  %499 = vst.msk [vmem:[#allocation2 + $0x1a8] sm:$0x3] %vm447_vm2, %v3748_v2 }
  0x27   : > { %497 = vst.msk [vmem:[#allocation2 + $0x198] sm:$0xff] %vm444_vm1, %v3748_v2  ;;  %498 = vst.msk [vmem:[#allocation2 + $0x1a0] sm:$0xff] %vm444_vm1, %v3748_v2  ;;  %v385_v2 = vadd.f32 %v3886_v16, %v347_v58 }
  0x28   : > { %501 = vst.msk [vmem:[#allocation2 + $0x19] sm:$0xff] %vm444_vm1, %v412_v39  ;;  %502 = vst.msk [vmem:[#allocation2 + $0x21] sm:$0xff] %vm444_vm1, %v413_v40  ;;  %v350_v39 = vmul.f32 %v3199_v27, %v3871_v5  ;;  %v3232_v40 = vunpack.c.h.bf16 %v3256_v13  ;;  %v354_v27 = vmul.f32 %v3207_v7, %v3871_v5 }
  0x29   : > { %517 = vst.msk [vmem:[#allocation2 + $0xd9] sm:$0xff] %vm444_vm1, %v428_v41  ;;  %518 = vst.msk [vmem:[#allocation2 + $0xe1] sm:$0xff] %vm444_vm1, %v429_v42  ;;  %v417_v15 = vmax.f32 %v385_v2, 0.0  ;;  %v351_v42 = vmul.f32 %v3200_v33, %v3871_v5  ;;  %v3212_v33 = vunpack.c.h.bf16 %v3251_v0 }
  0x2a   : > { %503 = vst.msk [vmem:[#allocation2 + $0x31] sm:$0xff] %vm444_vm1, %v414_v45  ;;  %504 = vst.msk [vmem:[#allocation2 + $0x39] sm:$0xff] %vm444_vm1, %v415_v46  ;;  %v3960_v45 = vld [vmem:[%s5027_s1 + $0x2] sm:$0x3]  ;;  %v388_v46 = vadd.f32 %v3886_v16, %v350_v39  ;;  %v392_v34 = vadd.f32 %v3886_v16, %v354_v27 }
  0x2b   : > { %519 = vst.msk [vmem:[#allocation2 + $0xf1] sm:$0xff] %vm444_vm1, %v430_v47  ;;  %520 = vst.msk [vmem:[#allocation2 + $0xf9] sm:$0xff] %vm444_vm1, %v431_v48  ;;  %v367_v47 = vmul.f32 %v3232_v40, %v3871_v5  ;;  %v3204_v48 = vunpack.c.h.bf16 %v3249_v19  ;;  %v389_v51 = vadd.f32 %v3886_v16, %v351_v42  ;;  %v357_v44 = vmul.f32 %v3212_v33, %v3871_v5  ;;  %v3109_v33 = vld [vmem:[%s5027_s1 + $0xe] sm:$0x3] }
  0x2c   : > { %505 = vst.msk [vmem:[#allocation2 + $0x49] sm:$0xff] %vm444_vm1, %v416_v14  ;;  %506 = vst.msk [vmem:[#allocation2 + $0x51] sm:$0xff] %vm444_vm1, %v417_v15  ;;  %v420_v56 = vmax.f32 %v388_v46, 0.0  ;;  %v422_v14 = vmax.f32 %v390_v61, 0.0  ;;  %v407_v15 = vadd.f32 %v3886_v16, %v369_v62 }
  0x2d   : > { %521 = vst.msk [vmem:[#allocation2 + $0x109] sm:$0xff] %vm444_vm1, %v432_v17  ;;  %522 = vst.msk [vmem:[#allocation2 + $0x111] sm:$0xff] %vm444_vm1, %v433_v18  ;;  %v405_v57 = vadd.f32 %v3886_v16, %v367_v47  ;;  %v353_v58 = vmul.f32 %v3204_v48, %v3871_v5  ;;  %v3208_v17 = vunpack.c.h.bf16 %v3250_v55  ;;  %v424_v47 = vmax.f32 %v392_v34, 0.0  ;;  %v3127_v34 = vld [vmem:[%s5027_s1 + $0xa] sm:$0x3] }
  0x2e   : > { %507 = vst.msk [vmem:[#allocation2 + $0x61] sm:$0xff] %vm444_vm1, %v418_v24  ;;  %508 = vst.msk [vmem:[#allocation2 + $0x69] sm:$0xff] %vm444_vm1, %v419_v25  ;;  %v3259_v24 = vld [vmem:[%s3866_s8 + $0x78] sm:$0xff]  }
  0x2f   : > { %v535_v21 = vld [vmem:[#allocation2 + $0x18] sm:$0xff]  ;;  %v536_v22 = vld [vmem:[#allocation2 + $0x20] sm:$0xff]  ;;  %523 = vst.msk [vmem:[#allocation2 + $0x121] sm:$0xff] %vm444_vm1, %v434_v26  ;;  %524 = vst.msk [vmem:[#allocation2 + $0x129] sm:$0xff] %vm444_vm1, %v435_v32  ;;  %v437_v3 = vmax.f32 %v405_v57, 0.0  ;;  %v391_v4 = vadd.f32 %v3886_v16, %v353_v58  ;;  %v439_v26 = vmax.f32 %v407_v15, 0.0  ;;  %v3211_v32 = vunpack.c.l.bf16 %v3251_v0 }
  0x30   : > { %v551_v23 = vld [vmem:[#allocation2 + $0xd8] sm:$0xff]  ;;  %v3936_v28 = vpack.c.bf16 %v536_v22, %v535_v21  ;;  %v552_v29 = vld [vmem:[#allocation2 + $0xe0] sm:$0xff]  ;;  %509 = vst.msk [vmem:[#allocation2 + $0x79] sm:$0xff] %vm444_vm1, %v420_v56  ;;  %525 = vst.msk [vmem:[#allocation2 + $0x139] sm:$0xff] %vm444_vm1, %v436_v60  ;;  %v3244_v39 = vunpack.c.h.bf16 %v3259_v24  ;;  %v395_v57 = vadd.f32 %v3886_v16, %v357_v44 }
  0x31   : > { %v537_v30 = vld [vmem:[#allocation2 + $0x30] sm:$0xff]  ;;  %v538_v31 = vld [vmem:[#allocation2 + $0x38] sm:$0xff]  ;;  %v3942_v35 = vpack.c.bf16 %v552_v29, %v551_v23  ;;  %526 = vst.msk [vmem:[#allocation2 + $0x141] sm:$0xff] %vm444_vm1, %v437_v3  ;;  %v423_v22 = vmax.f32 %v391_v4, 0.0  ;;  %v438_v23 = vmax.f32 %v406_v6, 0.0  ;;  %511 = vst.msk [vmem:[#allocation2 + $0x91] sm:$0xff] %vm444_vm1, %v422_v14  ;;  %v355_v29 = vmul.f32 %v3208_v17, %v3871_v5 }
  0x32   : > { %v3944_v36 = vpack.c.bf16 %v538_v31, %v537_v30  ;;  %v553_v37 = vld [vmem:[#allocation2 + $0xf0] sm:$0xff]  ;;  %v554_v38 = vld [vmem:[#allocation2 + $0xf8] sm:$0xff]  ;;  %3415 = vmatprep.mubr.msk.bf16.mxu0 %vm444_vm1, %v3936_v28  ;;  %v3239_v30 = vunpack.c.l.bf16 %v3258_v63  ;;  %v3240_v31 = vunpack.c.h.bf16 %v3258_v63  ;;  %528 = vst.msk [vmem:[#allocation2 + $0x159] sm:$0xff] %vm444_vm1, %v439_v26  ;;  %v356_v43 = vmul.f32 %v3211_v32, %v3871_v5  ;;  %513 = vst.msk [vmem:[#allocation2 + $0xa9] sm:$0xff] %vm444_vm1, %v424_v47 }
  0x33   : > { %v3952_v41 = vpack.c.bf16 %v554_v38, %v553_v37  ;;  %3431 = vmatprep.mubr.msk.bf16.mxu1 %vm444_vm1, %v3942_v35  ;;  %v540_v1 = vld [vmem:[#allocation2 + $0x50] sm:$0xff]  ;;  %512 = vst.msk [vmem:[#allocation2 + $0x99] sm:$0xff] %vm444_vm1, %v423_v22  ;;  %527 = vst.msk [vmem:[#allocation2 + $0x151] sm:$0xff] %vm444_vm1, %v438_v23  ;;  %v393_v37 = vadd.f32 %v3886_v16, %v355_v29  ;;  %v3243_v38 = vunpack.c.l.bf16 %v3259_v24  ;;  %v533_v14 = vld [vmem:[#allocation2] sm:$0xff]  ;;  %v1478_v32 = vsel %vm638_vm0, %v3960_v45, 0 }
  0x34   : > { %3416 = vmatmul.mubr.msk.bf16.vlgmr.msra.gmra.mxu0 %vm444_vm1, %v3944_v36  ;;  %v555_v2 = vld [vmem:[#allocation2 + $0x108] sm:$0xff]  ;;  %v556_v11 = vld [vmem:[#allocation2 + $0x110] sm:$0xff]  ;;  %v370_v40 = vmul.f32 %v3239_v30, %v3871_v5  ;;  %v371_v42 = vmul.f32 %v3240_v31, %v3871_v5  ;;  %v394_v56 = vadd.f32 %v3886_v16, %v356_v43  ;;  %v1311_v31 = vsel %vm638_vm0, %v3971_v50, 0 }
  0x35   : > { %3432 = vmatmul.mubr.msk.bf16.vlgmr.msra.gmra.mxu1 %vm444_vm1, %v3952_v41  ;;  %3482 = vmatpush3.bf16.msra.mxu0 %v3880_v10  ;;  %v421_v10 = vmax.f32 %v389_v51, 0.0  ;;  %v541_v12 = vld [vmem:[#allocation2 + $0x60] sm:$0xff]  ;;  %v542_v13 = vld [vmem:[#allocation2 + $0x68] sm:$0xff]  ;;  %v4000_v18 = vpack.c.bf16 %v556_v11, %v555_v2  ;;  %v425_v48 = vmax.f32 %v393_v37, 0.0  ;;  %v372_v49 = vmul.f32 %v3243_v38, %v3871_v5  ;;  %v4140_v47 = vld [vmem:[%s5027_s1 + $0x10] sm:$0x3] }
  0x36   : > { %3448 = vmatpush3.bf16.msra.mxu1 %v3877_v9  ;;  %3726 = vmatprep.subr.msk.bf16.mxu0 %vm638_vm0, %v3960_v45  ;;  %v539_v9 = vld [vmem:[#allocation2 + $0x48] sm:$0xff]  ;;  %v4002_v19 = vpack.c.bf16 %v542_v13, %v541_v12  ;;  %v557_v20 = vld [vmem:[#allocation2 + $0x120] sm:$0xff]  ;;  %v373_v51 = vmul.f32 %v3244_v39, %v3871_v5  ;;  %v408_v54 = vadd.f32 %v3886_v16, %v370_v40  ;;  %v426_v0 = vmax.f32 %v394_v56, 0.0  ;;  %v1211_v39 = vld [vmem:[#allocation2 + $0x51] sm:$0xff] }
  0x37   : > { %3725 = vmatprep.subr.msk.bf16.mxu1 %vm638_vm0, %v3971_v50  ;;  %v3995_v8 = vpack.c.bf16 %v540_v1, %v539_v9  ;;  %510 = vst.msk [vmem:[#allocation2 + $0x81] sm:$0xff] %vm444_vm1, %v421_v10  ;;  %v558_v21 = vld [vmem:[#allocation2 + $0x128] sm:$0xff]  ;;  %3435 = vmatprep.mubr.msk.bf16.mxu1 %vm444_vm1, %v4000_v18  ;;  %v543_v46 = vld [vmem:[#allocation2 + $0x78] sm:$0xff]  ;;  %v409_v55 = vadd.f32 %v3886_v16, %v371_v42  ;;  %514 = vst.msk [vmem:[#allocation2 + $0xb1] sm:$0xff] %vm444_vm1, %v425_v48  ;;  %v427_v2 = vmax.f32 %v395_v57, 0.0 }
  0x38   : > { %v4008_v25 = vpack.c.bf16 %v558_v21, %v557_v20  ;;  %v559_v53 = vld [vmem:[#allocation2 + $0x138] sm:$0xff]  ;;  %v560_v59 = vld [vmem:[#allocation2 + $0x140] sm:$0xff]  ;;  %v410_v10 = vadd.f32 %v3886_v16, %v372_v49  ;;  %v411_v5 = vadd.f32 %v3886_v16, %v373_v51  ;;  %v545_v61 = vld [vmem:[#allocation2 + $0x90] sm:$0xff]  ;;  %v440_v62 = vmax.f32 %v408_v54, 0.0  ;;  %515 = vst.msk [vmem:[#allocation2 + $0xc1] sm:$0xff] %vm444_vm1, %v426_v0 }
  0x39   : > { %3419 = vmatprep.mubr.msk.bf16.mxu0 %vm444_vm1, %v3995_v8  ;;  %v4040_v60 = vpack.c.bf16 %v560_v59, %v559_v53  ;;  %v441_v63 = vmax.f32 %v409_v55, 0.0  ;;  %516 = vst.msk [vmem:[#allocation2 + $0xc9] sm:$0xff] %vm444_vm1, %v427_v2  ;;  %v547_v11 = vld [vmem:[#allocation2 + $0xa8] sm:$0xff]  ;;  %v1209_v37 = vld [vmem:[#allocation2 + $0x39] sm:$0xff]  ;;  %v1647_v42 = vsel %vm638_vm0, %v3109_v33, 0  ;;  %v2045_v43 = vsel %vm638_vm0, %v3127_v34, 0 }
  0x3a   : > { %v546_v9 = vld [vmem:[#allocation2 + $0x98] sm:$0xff]  ;;  %v561_v1 = vld [vmem:[#allocation2 + $0x150] sm:$0xff]  ;;  %v442_v3 = vmax.f32 %v410_v10, 0.0  ;;  %v443_v4 = vmax.f32 %v411_v5, 0.0  ;;  %529 = vst.msk [vmem:[#allocation2 + $0x169] sm:$0xff] %vm444_vm1, %v440_v62  ;;  %v534_v15 = vld [vmem:[#allocation2 + $0x8] sm:$0xff] }
  0x3b   : > { %v575_v6 = vpack.c.bf16 %v546_v9, %v545_v61  ;;  %v562_v7 = vld [vmem:[#allocation2 + $0x158] sm:$0xff]  ;;  %530 = vst.msk [vmem:[#allocation2 + $0x171] sm:$0xff] %vm444_vm1, %v441_v63  ;;  %v569_v27 = vpack.c.bf16 %v534_v15, %v533_v14  ;;  %v1207_v45 = vld [vmem:[#allocation2 + $0x21] sm:$0xff]  ;;  %v1205_v50 = vld [vmem:[#allocation2 + $0x9] sm:$0xff] }
  0x3c   : > { %3420 = vmatmul.mubr.msk.bf16.gmra.mxu0 %vm444_vm1, %v4002_v19  ;;  %v583_v16 = vpack.c.bf16 %v562_v7, %v561_v1  ;;  %531 = vst.msk [vmem:[#allocation2 + $0x181] sm:$0xff] %vm444_vm1, %v442_v3  ;;  %532 = vst.msk [vmem:[#allocation2 + $0x189] sm:$0xff] %vm444_vm1, %v443_v4  ;;  %v1210_v38 = vld [vmem:[#allocation2 + $0x49] sm:$0xff]  ;;  %v1212_v48 = vld [vmem:[#allocation2 + $0x61] sm:$0xff] }
  0x3d   : > { %3436 = vmatmul.mubr.msk.bf16.gmra.mxu1 %vm444_vm1, %v4008_v25  ;;  %v4127_v44 = vpack.c.bf16 %v1211_v39, %v1210_v38  ;;  %v1213_v49 = vld [vmem:[#allocation2 + $0x69] sm:$0xff]  ;;  %v1214_v51 = vld [vmem:[#allocation2 + $0x79] sm:$0xff]  ;;  %v1216_v55 = vld [vmem:[#allocation2 + $0x91] sm:$0xff] }
  0x3e   : > { %v544_v52 = vld [vmem:[#allocation2 + $0x80] sm:$0xff]  ;;  %3439 = vmatprep.mubr.msk.bf16.mxu1 %vm444_vm1, %v4040_v60  ;;  %v548_v12 = vld [vmem:[#allocation2 + $0xb0] sm:$0xff]  ;;  %v4150_v53 = vpack.c.bf16 %v1213_v49, %v1212_v48 }
  0x3f   : > { %v4034_v58 = vpack.c.bf16 %v544_v52, %v543_v46  ;;  %v576_v13 = vpack.c.bf16 %v548_v12, %v547_v11  ;;  %v549_v21 = vld [vmem:[#allocation2 + $0xc0] sm:$0xff]  ;;  %v1218_v57 = vld [vmem:[#allocation2 + $0xa9] sm:$0xff]  ;;  %v1224_v9 = vld [vmem:[#allocation2 + $0xf1] sm:$0xff] }
  0x40   : > { %v550_v23 = vld [vmem:[#allocation2 + $0xc8] sm:$0xff]  ;;  %v4135_v46 = vld [vmem:[%s5027_s1 + $0x4] sm:$0x3]  ;;  %v1217_v56 = vld [vmem:[#allocation2 + $0x99] sm:$0xff] }
  0x41   : > { %3423 = vmatprep.mubr.msk.bf16.mxu0 %vm444_vm1, %v4034_v58  ;;  %v563_v17 = vld [vmem:[#allocation2 + $0x168] sm:$0xff]  ;;  %v577_v29 = vpack.c.bf16 %v550_v23, %v549_v21  ;;  %v4162_v59 = vpack.c.bf16 %v1217_v56, %v1216_v55  ;;  %v1222_v61 = vld [vmem:[#allocation2 + $0xd9] sm:$0xff]  ;;  %v1227_v3 = vld [vmem:[#allocation2 + $0x111] sm:$0xff] }
  0x42   : > { %v564_v20 = vld [vmem:[#allocation2 + $0x170] sm:$0xff]  ;;  %v1215_v52 = vld [vmem:[#allocation2 + $0x81] sm:$0xff]  ;;  %v1225_v1 = vld [vmem:[#allocation2 + $0xf9] sm:$0xff] }
  0x43   : > { %v584_v22 = vpack.c.bf16 %v564_v20, %v563_v17  ;;  %v565_v24 = vld [vmem:[#allocation2 + $0x180] sm:$0xff]  ;;  %v566_v26 = vld [vmem:[#allocation2 + $0x188] sm:$0xff]  ;;  %v4152_v54 = vpack.c.bf16 %v1215_v52, %v1214_v51  ;;  %v4186_v4 = vpack.c.bf16 %v1225_v1, %v1224_v9  ;;  %v1232_v15 = vld [vmem:[#allocation2 + $0x151] sm:$0xff] }
  0x44   : > { %3424 = vmatmul.mubr.msk.bf16.gmra.mxu0 %vm444_vm1, %v575_v6  ;;  %v585_v30 = vpack.c.bf16 %v566_v26, %v565_v24  ;;  %v1220_v5 = vld [vmem:[#allocation2 + $0xc1] sm:$0xff]  ;;  %v1226_v2 = vld [vmem:[#allocation2 + $0x109] sm:$0xff]  ;;  %v1230_v11 = vld [vmem:[#allocation2 + $0x139] sm:$0xff] }
  0x45   : > { %3440 = vmatmul.mubr.msk.bf16.gmra.mxu1 %vm444_vm1, %v583_v16  ;;  %3427 = vmatprep.mubr.msk.bf16.mxu0 %vm444_vm1, %v576_v13  ;;  %v1223_v62 = vld [vmem:[#allocation2 + $0xe1] sm:$0xff]  ;;  %v1233_v17 = vld [vmem:[#allocation2 + $0x159] sm:$0xff]  ;;  %v1234_v20 = vld [vmem:[#allocation2 + $0x169] sm:$0xff] }
  0x46   : > { %3443 = vmatprep.mubr.msk.bf16.mxu1 %vm444_vm1, %v584_v22  ;;  %v4176_v0 = vpack.c.bf16 %v1223_v62, %v1222_v61  ;;  %v1228_v7 = vld [vmem:[#allocation2 + $0x121] sm:$0xff]  ;;  %v1235_v21 = vld [vmem:[#allocation2 + $0x171] sm:$0xff]  ;;  %v1237_v26 = vld [vmem:[#allocation2 + $0x189] sm:$0xff] }
  0x47   : > { %v1231_v12 = vld [vmem:[#allocation2 + $0x141] sm:$0xff]  ;;  %v4212_v23 = vpack.c.bf16 %v1235_v21, %v1234_v20  ;;  %v1950_v38 = vld [vmem:[#allocation2 + $0x92] sm:$0xff]  ;;  %v1960_v55 = vld [vmem:[#allocation2 + $0x10a] sm:$0xff] }
  0x48   : > { %v4200_v14 = vpack.c.bf16 %v1231_v12, %v1230_v11  ;;  %v1236_v24 = vld [vmem:[#allocation2 + $0x181] sm:$0xff]  ;;  %v1961_v56 = vld [vmem:[#allocation2 + $0x112] sm:$0xff]  ;;  %v1968_v21 = vld [vmem:[#allocation2 + $0x16a] sm:$0xff] }
  0x49   : > { %v1951_v39 = vld [vmem:[#allocation2 + $0x9a] sm:$0xff]  ;;  %v1957_v49 = vld [vmem:[#allocation2 + $0xe2] sm:$0xff] }
  0x4a   : > { %v1956_v48 = vld [vmem:[#allocation2 + $0xda] sm:$0xff]  ;;  %v1962_v62 = vld [vmem:[#allocation2 + $0x122] sm:$0xff] }
  0x4b   : > { %v4276_v52 = vpack.c.bf16 %v1957_v49, %v1956_v48  ;;  %v1964_v9 = vld [vmem:[#allocation2 + $0x13a] sm:$0xff]  ;;  %v1965_v1 = vld [vmem:[#allocation2 + $0x142] sm:$0xff] }
  0x4c   : > { %3428 = vmatmul.mubr.msk.bf16.gmra.mxu0 %vm444_vm1, %v577_v29 }
  0x4d   : > { %3444 = vmatmul.mubr.msk.bf16.gmra.mxu1 %vm444_vm1, %v585_v30  ;;  %3483 = vmatprep.mubr.msk.bf16.mxu0 %vm444_vm1, %v3944_v36 }
  0x4e   : > { %3449 = vmatprep.mubr.msk.bf16.mxu1 %vm444_vm1, %v569_v27  ;;  %v1940_v27 = vld [vmem:[#allocation2 + $0x1a] sm:$0xff] }
  0x54   : > { %3484 = vmatmul.mubr.msk.bf16.vlgmr.msra.gmra.mxu0 %vm444_vm1, %v3995_v8 }
  0x55   : > { %3450 = vmatmul.mubr.msk.bf16.vlgmr.msra.gmra.mxu1 %vm444_vm1, %v3936_v28  ;;  %3550 = vmatpush3.bf16.msra.mxu0 %v1478_v32  ;;  %v567_v28 = vld [vmem:[#allocation2 + $0x198] sm:$0xff] }
  0x56   : > { %3516 = vmatpush3.bf16.msra.mxu1 %v1311_v31  ;;  %3453 = vmatprep.mubr.msk.bf16.mxu1 %vm444_vm1, %v3944_v36  ;;  %v1204_v36 = vld [vmem:[#allocation2 + $0x1] sm:$0xff]  ;;  %v1942_v32 = vld [vmem:[#allocation2 + $0x32] sm:$0xff] }
  0x57   : > { %3487 = vmatprep.mubr.msk.bf16.mxu0 %vm444_vm1, %v4002_v19  ;;  %3727 = vmatprep.subr.msk.bf16.mxu1 %vm638_vm0, %v3109_v33  ;;  %v1943_v33 = vld [vmem:[#allocation2 + $0x3a] sm:$0xff] }
  0x58   : > { %3728 = vmatprep.subr.msk.bf16.mxu0 %vm638_vm0, %v3127_v34  ;;  %v1944_v34 = vld [vmem:[#allocation2 + $0x4a] sm:$0xff] }
  0x5c   : > { %3488 = vmatmul.mubr.msk.bf16.gmra.mxu0 %vm444_vm1, %v4034_v58 }
  0x5d   : > { %3454 = vmatmul.mubr.msk.bf16.gmra.mxu1 %vm444_vm1, %v3995_v8  ;;  %3491 = vmatprep.mubr.msk.bf16.mxu0 %vm444_vm1, %v575_v6 }
  0x5e   : > { %3457 = vmatprep.mubr.msk.bf16.mxu1 %vm444_vm1, %v4002_v19  ;;  %v1240_v19 = vpack.c.bf16 %v1205_v50, %v1204_v36  ;;  %v2212_v36 = vsel %vm638_vm0, %v4135_v46, 0  ;;  %v1946_v50 = vld [vmem:[#allocation2 + $0x62] sm:$0xff] }
  0x64   : > { %3492 = vmatmul.mubr.msk.bf16.gmra.mxu0 %vm444_vm1, %v576_v13 }
  0x65   : > { %3458 = vmatmul.mubr.msk.bf16.gmra.mxu1 %vm444_vm1, %v4034_v58  ;;  %3495 = vmatprep.mubr.msk.bf16.mxu0 %vm444_vm1, %v577_v29  ;;  %v1219_v58 = vld [vmem:[#allocation2 + $0xb1] sm:$0xff] }
  0x66   : > { %3461 = vmatprep.mubr.msk.bf16.mxu1 %vm444_vm1, %v575_v6  ;;  %v4164_v10 = vpack.c.bf16 %v1219_v58, %v1218_v57  ;;  %v4188_v6 = vpack.c.bf16 %v1227_v3, %v1226_v2 }
  0x6c   : > { %3496 = vmatmul.mubr.msk.bf16.gmra.mxu0 %vm444_vm1, %v3942_v35 }
  0x6d   : > { %3462 = vmatmul.mubr.msk.bf16.gmra.mxu1 %vm444_vm1, %v576_v13  ;;  %3499 = vmatprep.mubr.msk.bf16.mxu0 %vm444_vm1, %v3952_v41 }
  0x6e   : > { %3465 = vmatprep.mubr.msk.bf16.mxu1 %vm444_vm1, %v577_v29  ;;  %v1941_v29 = vld [vmem:[#allocation2 + $0x22] sm:$0xff] }
  0x6f   : > { %v4224_v31 = vpack.c.bf16 %v1941_v29, %v1940_v27 }
  0x74   : > { %3500 = vmatmul.mubr.msk.bf16.gmra.mxu0 %vm444_vm1, %v4000_v18 }
  0x75   : > { %3466 = vmatmul.mubr.msk.bf16.gmra.mxu1 %vm444_vm1, %v3942_v35  ;;  %3503 = vmatprep.mubr.msk.bf16.mxu0 %vm444_vm1, %v4008_v25  ;;  %v568_v35 = vld [vmem:[#allocation2 + $0x1a0] sm:$0xff] }
  0x76   : > { %3469 = vmatprep.mubr.msk.bf16.mxu1 %vm444_vm1, %v3952_v41  ;;  %v1206_v41 = vld [vmem:[#allocation2 + $0x19] sm:$0xff]  ;;  %v586_v8 = vpack.c.bf16 %v568_v35, %v567_v28  ;;  %v4234_v35 = vpack.c.bf16 %v1943_v33, %v1942_v32 }
  0x77   : > { %v1945_v28 = vld [vmem:[#allocation2 + $0x52] sm:$0xff] }
  0x78   : > { %v1238_v33 = vld [vmem:[#allocation2 + $0x199] sm:$0xff] }
  0x7c   : > { %3504 = vmatmul.mubr.msk.bf16.gmra.mxu0 %vm444_vm1, %v4040_v60 }
  0x7d   : > { %3470 = vmatmul.mubr.msk.bf16.gmra.mxu1 %vm444_vm1, %v4000_v18  ;;  %3507 = vmatprep.mubr.msk.bf16.mxu0 %vm444_vm1, %v583_v16  ;;  %v1241_v18 = vpack.c.bf16 %v1207_v45, %v1206_v41  ;;  %v2381_v41 = vsel %vm638_vm0, %v4140_v47, 0  ;;  %v4240_v45 = vpack.c.bf16 %v1945_v28, %v1944_v34  ;;  %v1239_v28 = vld [vmem:[#allocation2 + $0x1a1] sm:$0xff] }
  0x7e   : > { %3473 = vmatprep.mubr.msk.bf16.mxu1 %vm444_vm1, %v4008_v25  ;;  %v1208_v25 = vld [vmem:[#allocation2 + $0x31] sm:$0xff] }
  0x7f   : > { %v4123_v40 = vpack.c.bf16 %v1209_v37, %v1208_v25 }
  0x84   : > { %3508 = vmatmul.mubr.msk.bf16.gmra.mxu0 %vm444_vm1, %v584_v22 }
  0x85   : > { %3474 = vmatmul.mubr.msk.bf16.gmra.mxu1 %vm444_vm1, %v4040_v60  ;;  %3511 = vmatprep.mubr.msk.bf16.mxu0 %vm444_vm1, %v585_v30  ;;  %v1221_v60 = vld [vmem:[#allocation2 + $0xc9] sm:$0xff]  ;;  %v4222_v30 = vpack.c.bf16 %v1237_v26, %v1236_v24  ;;  %v1969_v24 = vld [vmem:[#allocation2 + $0x172] sm:$0xff] }
  0x86   : > { %3477 = vmatprep.mubr.msk.bf16.mxu1 %vm444_vm1, %v583_v16  ;;  %v4174_v63 = vpack.c.bf16 %v1221_v60, %v1220_v5  ;;  %v1229_v16 = vld [vmem:[#allocation2 + $0x129] sm:$0xff]  ;;  %v4344_v29 = vpack.c.bf16 %v1969_v24, %v1968_v21 }
  0x87   : > { %v4198_v13 = vpack.c.bf16 %v1229_v16, %v1228_v7  ;;  %v4318_v7 = vpack.c.bf16 %v1965_v1, %v1964_v9 }
  0x8c   : > { %3512 = vmatmul.mubr.msk.bf16.gmra.mxu0 %vm444_vm1, %v586_v8  ;;  %v1947_v8 = vld [vmem:[#allocation2 + $0x6a] sm:$0xff] }
  0x8d   : > { %3478 = vmatmul.mubr.msk.bf16.gmra.mxu1 %vm444_vm1, %v584_v22  ;;  %3551 = vmatprep.mubr.msk.bf16.mxu0 %vm444_vm1, %v1240_v19  ;;  %v4210_v22 = vpack.c.bf16 %v1233_v17, %v1232_v15  ;;  %v1949_v19 = vld [vmem:[#allocation2 + $0x82] sm:$0xff]  ;;  %v4250_v25 = vpack.c.bf16 %v1947_v8, %v1946_v50  ;;  %v1966_v15 = vld [vmem:[#allocation2 + $0x152] sm:$0xff]  ;;  %v1967_v17 = vld [vmem:[#allocation2 + $0x15a] sm:$0xff] }
  0x8e   : > { %3517 = vmatprep.mubr.msk.bf16.mxu1 %vm444_vm1, %v1241_v18  ;;  %v4342_v27 = vpack.c.bf16 %v1967_v17, %v1966_v15  ;;  %v1938_v8 = vld [vmem:[#allocation2 + $0x2] sm:$0xff] }
  0x94   : > { %3552 = vmatmul.mubr.msk.bf16.vlgmr.msra.gmra.mxu0 %vm444_vm1, %v1241_v18  ;;  %v1948_v18 = vld [vmem:[#allocation2 + $0x7a] sm:$0xff] }
  0x95   : > { %3518 = vmatmul.mubr.msk.bf16.vlgmr.msra.gmra.mxu1 %vm444_vm1, %v4123_v40  ;;  %3618 = vmatpush3.bf16.msra.mxu0 %v2045_v43  ;;  %v4252_v37 = vpack.c.bf16 %v1949_v19, %v1948_v18  ;;  %v4262_v43 = vpack.c.bf16 %v1951_v39, %v1950_v38  ;;  %v1939_v18 = vld [vmem:[#allocation2 + $0xa] sm:$0xff]  ;;  %v1257_v38 = vpack.c.bf16 %v1239_v28, %v1238_v33 }
  0x96   : > { %3584 = vmatpush3.bf16.msra.mxu1 %v1647_v42  ;;  %3521 = vmatprep.mubr.msk.bf16.mxu1 %vm444_vm1, %v4127_v44  ;;  %v1953_v42 = vld [vmem:[#allocation2 + $0xb2] sm:$0xff] }
  0x97   : > { %3555 = vmatprep.mubr.msk.bf16.mxu0 %vm444_vm1, %v4123_v40  ;;  %3729 = vmatprep.subr.msk.bf16.mxu1 %vm638_vm0, %v4135_v46  ;;  %v1954_v46 = vld [vmem:[#allocation2 + $0xc2] sm:$0xff] }
  0x98   : > { %3730 = vmatprep.subr.msk.bf16.mxu0 %vm638_vm0, %v4140_v47  ;;  %v1955_v47 = vld [vmem:[#allocation2 + $0xca] sm:$0xff] }
  0x99   : > { %v4274_v51 = vpack.c.bf16 %v1955_v47, %v1954_v46 }
  0x9c   : > { %3556 = vmatmul.mubr.msk.bf16.gmra.mxu0 %vm444_vm1, %v4127_v44 }
  0x9d   : > { %3522 = vmatmul.mubr.msk.bf16.gmra.mxu1 %vm444_vm1, %v4150_v53  ;;  %3559 = vmatprep.mubr.msk.bf16.mxu0 %vm444_vm1, %v4150_v53 }
  0x9e   : > { %3525 = vmatprep.mubr.msk.bf16.mxu1 %vm444_vm1, %v4152_v54 }
  0xa4   : > { %3560 = vmatmul.mubr.msk.bf16.gmra.mxu0 %vm444_vm1, %v4152_v54 }
  0xa5   : > { %3526 = vmatmul.mubr.msk.bf16.gmra.mxu1 %vm444_vm1, %v4162_v59  ;;  %3563 = vmatprep.mubr.msk.bf16.mxu0 %vm444_vm1, %v4162_v59 }
  0xa6   : > { %3529 = vmatprep.mubr.msk.bf16.mxu1 %vm444_vm1, %v4164_v10 }
  0xac   : > { %3564 = vmatmul.mubr.msk.bf16.gmra.mxu0 %vm444_vm1, %v4164_v10 }
  0xad   : > { %3530 = vmatmul.mubr.msk.bf16.gmra.mxu1 %vm444_vm1, %v4174_v63  ;;  %3567 = vmatprep.mubr.msk.bf16.mxu0 %vm444_vm1, %v4174_v63 }
  0xae   : > { %3533 = vmatprep.mubr.msk.bf16.mxu1 %vm444_vm1, %v4176_v0 }
  0xb4   : > { %3568 = vmatmul.mubr.msk.bf16.gmra.mxu0 %vm444_vm1, %v4176_v0 }
  0xb5   : > { %3534 = vmatmul.mubr.msk.bf16.gmra.mxu1 %vm444_vm1, %v4186_v4  ;;  %3571 = vmatprep.mubr.msk.bf16.mxu0 %vm444_vm1, %v4186_v4 }
  0xb6   : > { %3537 = vmatprep.mubr.msk.bf16.mxu1 %vm444_vm1, %v4188_v6 }
  0xbc   : > { %3572 = vmatmul.mubr.msk.bf16.gmra.mxu0 %vm444_vm1, %v4188_v6 }
  0xbd   : > { %3538 = vmatmul.mubr.msk.bf16.gmra.mxu1 %vm444_vm1, %v4198_v13  ;;  %3575 = vmatprep.mubr.msk.bf16.mxu0 %vm444_vm1, %v4198_v13 }
  0xbe   : > { %3541 = vmatprep.mubr.msk.bf16.mxu1 %vm444_vm1, %v4200_v14 }
  0xc4   : > { %3576 = vmatmul.mubr.msk.bf16.gmra.mxu0 %vm444_vm1, %v4200_v14 }
  0xc5   : > { %3542 = vmatmul.mubr.msk.bf16.gmra.mxu1 %vm444_vm1, %v4210_v22  ;;  %3579 = vmatprep.mubr.msk.bf16.mxu0 %vm444_vm1, %v4210_v22 }
  0xc6   : > { %3545 = vmatprep.mubr.msk.bf16.mxu1 %vm444_vm1, %v4212_v23 }
  0xcc   : > { %3580 = vmatmul.mubr.msk.bf16.gmra.mxu0 %vm444_vm1, %v4212_v23 }
  0xcd   : > { %3546 = vmatmul.mubr.msk.bf16.gmra.mxu1 %vm444_vm1, %v4222_v30  ;;  %3619 = vmatprep.mubr.msk.bf16.mxu0 %vm444_vm1, %v4224_v31 }
  0xce   : > { %3585 = vmatprep.mubr.msk.bf16.mxu1 %vm444_vm1, %v4123_v40  ;;  %v1952_v40 = vld [vmem:[#allocation2 + $0xaa] sm:$0xff] }
  0xd4   : > { %3620 = vmatmul.mubr.msk.bf16.vlgmr.msra.gmra.mxu0 %vm444_vm1, %v4234_v35 }
  0xd5   : > { %3586 = vmatmul.mubr.msk.bf16.vlgmr.msra.gmra.mxu1 %vm444_vm1, %v4127_v44  ;;  %3686 = vmatpush3.bf16.msra.mxu0 %v2381_v41  ;;  %v4264_v44 = vpack.c.bf16 %v1953_v42, %v1952_v40  ;;  %v1971_v41 = vld [vmem:[#allocation2 + $0x18a] sm:$0xff] }
  0xd6   : > { %3652 = vmatpush3.bf16.msra.mxu1 %v2212_v36  ;;  %3589 = vmatprep.mubr.msk.bf16.mxu1 %vm444_vm1, %v4150_v53  ;;  %v1958_v53 = vld [vmem:[#allocation2 + $0xf2] sm:$0xff]  ;;  %v1970_v36 = vld [vmem:[#allocation2 + $0x182] sm:$0xff] }
  0xd7   : > { %3623 = vmatprep.mubr.msk.bf16.mxu0 %vm444_vm1, %v4240_v45  ;;  %v4366_v39 = vpack.c.bf16 %v1971_v41, %v1970_v36 }
  0xdc   : > { %3624 = vmatmul.mubr.msk.bf16.gmra.mxu0 %vm444_vm1, %v4250_v25 }
  0xdd   : > { %3590 = vmatmul.mubr.msk.bf16.gmra.mxu1 %vm444_vm1, %v4152_v54  ;;  %3627 = vmatprep.mubr.msk.bf16.mxu0 %vm444_vm1, %v4252_v37  ;;  %v1959_v54 = vld [vmem:[#allocation2 + $0xfa] sm:$0xff] }
  0xde   : > { %3593 = vmatprep.mubr.msk.bf16.mxu1 %vm444_vm1, %v4162_v59  ;;  %v4286_v57 = vpack.c.bf16 %v1959_v54, %v1958_v53  ;;  %v4290_v59 = vpack.c.bf16 %v1961_v56, %v1960_v55 }
  0xe4   : > { %3628 = vmatmul.mubr.msk.bf16.gmra.mxu0 %vm444_vm1, %v4262_v43 }
  0xe5   : > { %3594 = vmatmul.mubr.msk.bf16.gmra.mxu1 %vm444_vm1, %v4164_v10  ;;  %3631 = vmatprep.mubr.msk.bf16.mxu0 %vm444_vm1, %v4264_v44 }
  0xe6   : > { %3597 = vmatprep.mubr.msk.bf16.mxu1 %vm444_vm1, %v4174_v63  ;;  %v1963_v63 = vld [vmem:[#allocation2 + $0x12a] sm:$0xff] }
  0xec   : > { %3632 = vmatmul.mubr.msk.bf16.gmra.mxu0 %vm444_vm1, %v4274_v51 }
  0xed   : > { %3598 = vmatmul.mubr.msk.bf16.gmra.mxu1 %vm444_vm1, %v4176_v0  ;;  %3635 = vmatprep.mubr.msk.bf16.mxu0 %vm444_vm1, %v4276_v52 }
  0xee   : > { %3601 = vmatprep.mubr.msk.bf16.mxu1 %vm444_vm1, %v4186_v4  ;;  %v4314_v4 = vpack.c.bf16 %v1963_v63, %v1962_v62 }
  0xf4   : > { %v4288_v58 = vpop.f32.mrf.mxu0  ;;  %3636 = vmatmul.mubr.msk.bf16.gmra.mxu0 %vm444_vm1, %v4286_v57 }
  0xf5   : > { %v4292_v10 = vpop.f32.mrf.mxu1  ;;  %3602 = vmatmul.mubr.msk.bf16.gmra.mxu1 %vm444_vm1, %v4188_v6  ;;  %3639 = vmatprep.mubr.msk.bf16.mxu0 %vm444_vm1, %v4290_v59 }
  0xf6   : > { %v4294_v5 = vpop.f32.mrf.mxu0  ;;  %3605 = vmatprep.mubr.msk.bf16.mxu1 %vm444_vm1, %v4198_v13 }
  0xf7   : > { %v4300_v60 = vpop.f32.mrf.mxu1 }
  0xf8   : > { %v4302_v61 = vpop.f32.mrf.mxu0 }
  0xf9   : > { %v4308_v0 = vpop.f32.mrf.mxu1 }
  0xfa   : > { %v4310_v2 = vpop.f32.mrf.mxu0 }
  0xfb   : > { %v4312_v3 = vpop.f32.mrf.mxu1 }
  0xfc   : > { %v4316_v6 = vpop.f32.mrf.mxu0  ;;  %3640 = vmatmul.mubr.msk.bf16.gmra.mxu0 %vm444_vm1, %v4314_v4 }
  0xfd   : > { %v4320_v16 = vpop.f32.mrf.mxu1  ;;  %3606 = vmatmul.mubr.msk.bf16.gmra.mxu1 %vm444_vm1, %v4200_v14  ;;  %3643 = vmatprep.mubr.msk.bf16.mxu0 %vm444_vm1, %v4318_v7 }
  0xfe   : > { %v4322_v11 = vpop.f32.mrf.mxu0  ;;  %3609 = vmatprep.mubr.msk.bf16.mxu1 %vm444_vm1, %v4210_v22 }
  0xff   : > { %v4328_v12 = vpop.f32.mrf.mxu1 }
 0x100   : > { %v4330_v13 = vpop.f32.mrf.mxu0 }
 0x101   : > { %v4336_v20 = vpop.f32.mrf.mxu1 }
 0x102   : > { %v4338_v14 = vpop.f32.mrf.mxu0 }
 0x103   : > { %v4340_v26 = vpop.f32.mrf.mxu1 }
 0x104   : > { %v4346_v32 = vpop.f32.mrf.mxu0  ;;  %3644 = vmatmul.mubr.msk.bf16.gmra.mxu0 %vm444_vm1, %v4342_v27 }
 0x105   : > { %v4348_v22 = vpop.f32.mrf.mxu1  ;;  %3610 = vmatmul.mubr.msk.bf16.gmra.mxu1 %vm444_vm1, %v4212_v23  ;;  %3647 = vmatprep.mubr.msk.bf16.mxu0 %vm444_vm1, %v4344_v29 }
 0x106   : > { %v4354_v34 = vpop.f32.mrf.mxu0  ;;  %3613 = vmatprep.mubr.msk.bf16.mxu1 %vm444_vm1, %v4222_v30  ;;  %v1974_v30 = vpack.c.bf16 %v1939_v18, %v1938_v8 }
 0x107   : > { %v4360_v50 = vpop.f32.mrf.mxu1 }
 0x108   : > { %v4362_v23 = vpop.f32.mrf.mxu0 }
 0x109   : > { %v4364_v19 = vpop.f32.mrf.mxu1 }
 0x10a   : > { %v4368_v40 = vpop.f32.mrf.mxu0 }
 0x10b   : > { %v4370_v42 = vpop.f32.mrf.mxu1 }
 0x10c   : > { %v4372_v46 = vpop.f32.mrf.mxu0  ;;  %3648 = vmatmul.mubr.msk.bf16.gmra.mxu0 %vm444_vm1, %v4366_v39 }
 0x10d   : > { %v4374_v47 = vpop.f32.mrf.mxu1  ;;  %3614 = vmatmul.mubr.msk.bf16.gmra.mxu1 %vm444_vm1, %v1257_v38  ;;  %3687 = vmatprep.mubr.msk.bf16.mxu0 %vm444_vm1, %v4234_v35 }
 0x10e   : > { %3653 = vmatprep.mubr.msk.bf16.mxu1 %vm444_vm1, %v1974_v30  ;;  %v4382_v48 = vpop.f32.mrf.mxu0 }
 0x10f   : > { %v4384_v49 = vpop.f32.mrf.mxu1 }
 0x110   : > { %v4386_v53 = vpop.f32.mrf.mxu0 }
 0x111   : > { %v4388_v54 = vpop.f32.mrf.mxu1 }
 0x112   : > { %v4390_v55 = vpop.f32.mrf.mxu0 }
 0x113   : > { %v4392_v56 = vpop.f32.mrf.mxu1 }
 0x114   : > { %v3485_v63 = vpop.f32.mrf.mxu0  ;;  %3688 = vmatmul.mubr.msk.bf16.vlgmr.msra.gmra.mxu0 %vm444_vm1, %v4240_v45 }
 0x115   : > { %v3451_v62 = vpop.f32.mrf.mxu1  ;;  %3654 = vmatmul.mubr.msk.bf16.vlgmr.msra.gmra.mxu1 %vm444_vm1, %v4224_v31  ;;  %3691 = vmatprep.mubr.msk.bf16.mxu0 %vm444_vm1, %v4250_v25 }
 0x116   : > { %v852_v9 = vadd.f32 %v3451_v62, %v4288_v58  ;;  %3657 = vmatprep.mubr.msk.bf16.mxu1 %vm444_vm1, %v4234_v35  ;;  %v1012_v15 = vpop.f32.mrf.mxu0 }
 0x117   : > { %v843_v1 = vpop.f32.mrf.mxu1 }
 0x118   : > { %v1141_v17 = vadd.f32 %v3485_v63, %v852_v9  ;;  %v844_v21 = vadd.f32 %v843_v1, %v4294_v5  ;;  %v3486_v33 = vpop.f32.mrf.mxu0 }
 0x119   : > { %v3452_v24 = vpop.f32.mrf.mxu1 }
 0x11a   : > { %1174 = vst.msk [vmem:[#allocation3 + $0x10] sm:$0xff] %vm1171_vm3, %v1141_v17  ;;  %v1139_v31 = vadd.f32 %v1012_v15, %v844_v21  ;;  %v855_v28 = vadd.f32 %v3452_v24, %v4302_v61  ;;  %v1015_v36 = vpop.f32.mrf.mxu0 }
 0x11b   : > { %v846_v58 = vpop.f32.mrf.mxu1 }
 0x11c   : > { %1172 = vst.msk [vmem:[#allocation3] sm:$0xff] %vm1171_vm3, %v1139_v31  ;;  %v1142_v35 = vadd.f32 %v3486_v33, %v855_v28  ;;  %v847_v41 = vadd.f32 %v846_v58, %v4310_v2  ;;  %v3489_v18 = vpop.f32.mrf.mxu0  ;;  %3692 = vmatmul.mubr.msk.bf16.gmra.mxu0 %vm444_vm1, %v4252_v37 }
 0x11d   : > { %v3455_v8 = vpop.f32.mrf.mxu1  ;;  %3658 = vmatmul.mubr.msk.bf16.gmra.mxu1 %vm444_vm1, %v4240_v45  ;;  %3695 = vmatprep.mubr.msk.bf16.mxu0 %vm444_vm1, %v4262_v43 }
 0x11e   : > { %1175 = vst.msk [vmem:[#allocation3 + $0x18] sm:$0xff] %vm1171_vm3, %v1142_v35  ;;  %v1140_v5 = vadd.f32 %v1015_v36, %v847_v41  ;;  %v868_v61 = vadd.f32 %v3455_v8, %v4316_v6  ;;  %3661 = vmatprep.mubr.msk.bf16.mxu1 %vm444_vm1, %v4250_v25  ;;  %v1028_v38 = vpop.f32.mrf.mxu0 }
 0x11f   : > { %v859_v2 = vpop.f32.mrf.mxu1 }
 0x120   : > { %1173 = vst.msk [vmem:[#allocation3 + $0x8] sm:$0xff] %vm1171_vm3, %v1140_v5  ;;  %v1145_v30 = vadd.f32 %v3489_v18, %v868_v61  ;;  %v860_v45 = vadd.f32 %v859_v2, %v4322_v11  ;;  %v3490_v63 = vpop.f32.mrf.mxu0 }
 0x121   : > { %v3456_v62 = vpop.f32.mrf.mxu1 }
 0x122   : > { %1178 = vst.msk [vmem:[#allocation3 + $0x30] sm:$0xff] %vm1171_vm3, %v1145_v30  ;;  %v1143_v9 = vadd.f32 %v1028_v38, %v860_v45  ;;  %v871_v6 = vadd.f32 %v3456_v62, %v4330_v13  ;;  %v1031_v15 = vpop.f32.mrf.mxu0 }
 0x123   : > { %v862_v1 = vpop.f32.mrf.mxu1 }
 0x124   : > { %1176 = vst.msk [vmem:[#allocation3 + $0x20] sm:$0xff] %vm1171_vm3, %v1143_v9  ;;  %v1146_v25 = vadd.f32 %v3490_v63, %v871_v6  ;;  %v863_v17 = vadd.f32 %v862_v1, %v4338_v14  ;;  %v3493_v24 = vpop.f32.mrf.mxu0  ;;  %3696 = vmatmul.mubr.msk.bf16.gmra.mxu0 %vm444_vm1, %v4264_v44 }
 0x125   : > { %v3459_v21 = vpop.f32.mrf.mxu1  ;;  %3662 = vmatmul.mubr.msk.bf16.gmra.mxu1 %vm444_vm1, %v4252_v37  ;;  %3699 = vmatprep.mubr.msk.bf16.mxu0 %vm444_vm1, %v4274_v51 }
 0x126   : > { %1179 = vst.msk [vmem:[#allocation3 + $0x38] sm:$0xff] %vm1171_vm3, %v1146_v25  ;;  %v1144_v11 = vadd.f32 %v1031_v15, %v863_v17  ;;  %v884_v13 = vadd.f32 %v3459_v21, %v4346_v32  ;;  %3665 = vmatprep.mubr.msk.bf16.mxu1 %vm444_vm1, %v4262_v43  ;;  %v1044_v33 = vpop.f32.mrf.mxu0 }
 0x127   : > { %v875_v14 = vpop.f32.mrf.mxu1 }
 0x128   : > { %1177 = vst.msk [vmem:[#allocation3 + $0x28] sm:$0xff] %vm1171_vm3, %v1144_v11  ;;  %v1149_v31 = vadd.f32 %v3493_v24, %v884_v13  ;;  %v876_v37 = vadd.f32 %v875_v14, %v4354_v34  ;;  %v3494_v58 = vpop.f32.mrf.mxu0 }
 0x129   : > { %v3460_v28 = vpop.f32.mrf.mxu1 }
 0x12a   : > { %1182 = vst.msk [vmem:[#allocation3 + $0x50] sm:$0xff] %vm1171_vm3, %v1149_v31  ;;  %v1147_v36 = vadd.f32 %v1044_v33, %v876_v37  ;;  %v887_v32 = vadd.f32 %v3460_v28, %v4362_v23  ;;  %v1047_v41 = vpop.f32.mrf.mxu0 }
 0x12b   : > { %v878_v35 = vpop.f32.mrf.mxu1 }
 0x12c   : > { %1180 = vst.msk [vmem:[#allocation3 + $0x40] sm:$0xff] %vm1171_vm3, %v1147_v36  ;;  %v1150_v43 = vadd.f32 %v3494_v58, %v887_v32  ;;  %v879_v8 = vadd.f32 %v878_v35, %v4368_v40  ;;  %v3497_v5 = vpop.f32.mrf.mxu0  ;;  %3700 = vmatmul.mubr.msk.bf16.gmra.mxu0 %vm444_vm1, %v4276_v52 }
 0x12d   : > { %v3463_v18 = vpop.f32.mrf.mxu1  ;;  %3666 = vmatmul.mubr.msk.bf16.gmra.mxu1 %vm444_vm1, %v4264_v44  ;;  %3703 = vmatprep.mubr.msk.bf16.mxu0 %vm444_vm1, %v4286_v57 }
 0x12e   : > { %1183 = vst.msk [vmem:[#allocation3 + $0x58] sm:$0xff] %vm1171_vm3, %v1150_v43  ;;  %v1148_v34 = vadd.f32 %v1047_v41, %v879_v8  ;;  %v900_v23 = vadd.f32 %v3463_v18, %v4372_v46  ;;  %3669 = vmatprep.mubr.msk.bf16.mxu1 %vm444_vm1, %v4274_v51  ;;  %v1060_v61 = vpop.f32.mrf.mxu0 }
 0x12f   : > { %v891_v40 = vpop.f32.mrf.mxu1 }
 0x130   : > { %1181 = vst.msk [vmem:[#allocation3 + $0x48] sm:$0xff] %vm1171_vm3, %v1148_v34  ;;  %v1153_v2 = vadd.f32 %v3497_v5, %v900_v23  ;;  %v892_v44 = vadd.f32 %v891_v40, %v4382_v48  ;;  %v3498_v30 = vpop.f32.mrf.mxu0  ;;  %v1973_v5 = vld [vmem:[#allocation2 + $0x1a2] sm:$0xff] }
 0x131   : > { %v3464_v38 = vpop.f32.mrf.mxu1 }
 0x132   : > { %1186 = vst.msk [vmem:[#allocation3 + $0x70] sm:$0xff] %vm1171_vm3, %v1153_v2  ;;  %v1151_v45 = vadd.f32 %v1060_v61, %v892_v44  ;;  %v903_v46 = vadd.f32 %v3464_v38, %v4386_v53  ;;  %v1063_v63 = vpop.f32.mrf.mxu0 }
 0x133   : > { %v894_v62 = vpop.f32.mrf.mxu1 }
 0x134   : > { %1184 = vst.msk [vmem:[#allocation3 + $0x60] sm:$0xff] %vm1171_vm3, %v1151_v45  ;;  %v1154_v51 = vadd.f32 %v3498_v30, %v903_v46  ;;  %v895_v9 = vadd.f32 %v894_v62, %v4390_v55  ;;  %v3501_v1 = vpop.f32.mrf.mxu0  ;;  %3704 = vmatmul.mubr.msk.bf16.gmra.mxu0 %vm444_vm1, %v4290_v59 }
 0x135   : > { %v3467_v6 = vpop.f32.mrf.mxu1  ;;  %3670 = vmatmul.mubr.msk.bf16.gmra.mxu1 %vm444_vm1, %v4276_v52  ;;  %3707 = vmatprep.mubr.msk.bf16.mxu0 %vm444_vm1, %v4314_v4 }
 0x136   : > { %1187 = vst.msk [vmem:[#allocation3 + $0x78] sm:$0xff] %vm1171_vm3, %v1154_v51  ;;  %v1152_v48 = vadd.f32 %v1063_v63, %v895_v9  ;;  %v916_v53 = vadd.f32 %v3467_v6, %v4292_v10  ;;  %3673 = vmatprep.mubr.msk.bf16.mxu1 %vm444_vm1, %v4286_v57  ;;  %v1076_v15 = vpop.f32.mrf.mxu0 }
 0x137   : > { %v907_v55 = vpop.f32.mrf.mxu1 }
 0x138   : > { %1185 = vst.msk [vmem:[#allocation3 + $0x68] sm:$0xff] %vm1171_vm3, %v1152_v48  ;;  %v1157_v25 = vadd.f32 %v3501_v1, %v916_v53  ;;  %v908_v52 = vadd.f32 %v907_v55, %v4300_v60  ;;  %v3502_v21 = vpop.f32.mrf.mxu0 }
 0x139   : > { %v3468_v17 = vpop.f32.mrf.mxu1 }
 0x13a   : > { %1190 = vst.msk [vmem:[#allocation3 + $0x90] sm:$0xff] %vm1171_vm3, %v1157_v25  ;;  %v1155_v24 = vadd.f32 %v1076_v15, %v908_v52  ;;  %v919_v10 = vadd.f32 %v3468_v17, %v4308_v0  ;;  %v1079_v13 = vpop.f32.mrf.mxu0 }
 0x13b   : > { %v910_v11 = vpop.f32.mrf.mxu1 }
 0x13c   : > { %1188 = vst.msk [vmem:[#allocation3 + $0x80] sm:$0xff] %vm1171_vm3, %v1155_v24  ;;  %v1158_v57 = vadd.f32 %v3502_v21, %v919_v10  ;;  %v911_v14 = vadd.f32 %v910_v11, %v4312_v3  ;;  %v3505_v31 = vpop.f32.mrf.mxu0  ;;  %3708 = vmatmul.mubr.msk.bf16.gmra.mxu0 %vm444_vm1, %v4318_v7 }
 0x13d   : > { %v3471_v33 = vpop.f32.mrf.mxu1  ;;  %3674 = vmatmul.mubr.msk.bf16.gmra.mxu1 %vm444_vm1, %v4290_v59  ;;  %3711 = vmatprep.mubr.msk.bf16.mxu0 %vm444_vm1, %v4342_v27 }
 0x13e   : > { %1191 = vst.msk [vmem:[#allocation3 + $0x98] sm:$0xff] %vm1171_vm3, %v1158_v57  ;;  %v1156_v60 = vadd.f32 %v1079_v13, %v911_v14  ;;  %v932_v0 = vadd.f32 %v3471_v33, %v4320_v16  ;;  %3677 = vmatprep.mubr.msk.bf16.mxu1 %vm444_vm1, %v4314_v4  ;;  %v1092_v37 = vpop.f32.mrf.mxu0 }
 0x13f   : > { %v923_v3 = vpop.f32.mrf.mxu1 }
 0x140   : > { %1189 = vst.msk [vmem:[#allocation3 + $0x88] sm:$0xff] %vm1171_vm3, %v1156_v60  ;;  %v1161_v28 = vadd.f32 %v3505_v31, %v932_v0  ;;  %v924_v59 = vadd.f32 %v923_v3, %v4328_v12  ;;  %v3506_v36 = vpop.f32.mrf.mxu0 }
 0x141   : > { %v3472_v58 = vpop.f32.mrf.mxu1 }
 0x142   : > { %1194 = vst.msk [vmem:[#allocation3 + $0xb0] sm:$0xff] %vm1171_vm3, %v1161_v28  ;;  %v1159_v32 = vadd.f32 %v1092_v37, %v924_v59  ;;  %v935_v16 = vadd.f32 %v3472_v58, %v4336_v20  ;;  %v1095_v41 = vpop.f32.mrf.mxu0 }
 0x143   : > { %v926_v35 = vpop.f32.mrf.mxu1 }
 0x144   : > { %1192 = vst.msk [vmem:[#allocation3 + $0xa0] sm:$0xff] %vm1171_vm3, %v1159_v32  ;;  %v1162_v4 = vadd.f32 %v3506_v36, %v935_v16  ;;  %v927_v43 = vadd.f32 %v926_v35, %v4340_v26  ;;  %v3509_v18 = vpop.f32.mrf.mxu0  ;;  %3712 = vmatmul.mubr.msk.bf16.gmra.mxu0 %vm444_vm1, %v4344_v29  ;;  %v1972_v26 = vld [vmem:[#allocation2 + $0x19a] sm:$0xff] }
 0x145   : > { %v3475_v8 = vpop.f32.mrf.mxu1  ;;  %3678 = vmatmul.mubr.msk.bf16.gmra.mxu1 %vm444_vm1, %v4318_v7  ;;  %3715 = vmatprep.mubr.msk.bf16.mxu0 %vm444_vm1, %v4366_v39  ;;  %v1991_v44 = vpack.c.bf16 %v1973_v5, %v1972_v26 }
 0x146   : > { %1195 = vst.msk [vmem:[#allocation3 + $0xb8] sm:$0xff] %vm1171_vm3, %v1162_v4  ;;  %v1160_v12 = vadd.f32 %v1095_v41, %v927_v43  ;;  %v948_v20 = vadd.f32 %v3475_v8, %v4348_v22  ;;  %3681 = vmatprep.mubr.msk.bf16.mxu1 %vm444_vm1, %v4342_v27  ;;  %v1108_v23 = vpop.f32.mrf.mxu0 }
 0x147   : > { %v939_v34 = vpop.f32.mrf.mxu1 }
 0x148   : > { %1193 = vst.msk [vmem:[#allocation3 + $0xa8] sm:$0xff] %vm1171_vm3, %v1160_v12  ;;  %v1165_v7 = vadd.f32 %v3509_v18, %v948_v20  ;;  %v940_v40 = vadd.f32 %v939_v34, %v4360_v50  ;;  %v3510_v2 = vpop.f32.mrf.mxu0 }
 0x149   : > { %v3476_v61 = vpop.f32.mrf.mxu1 }
 0x14a   : > { %1198 = vst.msk [vmem:[#allocation3 + $0xd0] sm:$0xff] %vm1171_vm3, %v1165_v7  ;;  %v1163_v22 = vadd.f32 %v1108_v23, %v940_v40  ;;  %v951_v27 = vadd.f32 %v3476_v61, %v4364_v19  ;;  %v1111_v30 = vpop.f32.mrf.mxu0 }
 0x14b   : > { %v942_v38 = vpop.f32.mrf.mxu1 }
 0x14c   : > { %1196 = vst.msk [vmem:[#allocation3 + $0xc0] sm:$0xff] %vm1171_vm3, %v1163_v22  ;;  %v1166_v39 = vadd.f32 %v3510_v2, %v951_v27  ;;  %v943_v45 = vadd.f32 %v942_v38, %v4370_v42  ;;  %v3513_v62 = vpop.f32.mrf.mxu0  ;;  %3716 = vmatmul.mubr.msk.bf16.gmra.mxu0 %vm444_vm1, %v1991_v44 }
 0x14d   : > { %v3479_v46 = vpop.f32.mrf.mxu1  ;;  %3682 = vmatmul.mubr.msk.bf16.gmra.mxu1 %vm444_vm1, %v4344_v29 }
 0x14e   : > { %1199 = vst.msk [vmem:[#allocation3 + $0xd8] sm:$0xff] %vm1171_vm3, %v1166_v39  ;;  %v1164_v50 = vadd.f32 %v1111_v30, %v943_v45  ;;  %v964_v63 = vadd.f32 %v3479_v46, %v4374_v47  ;;  %v1124_v51 = vpop.f32.mrf.mxu0 }
 0x14f   : > { %v955_v19 = vpop.f32.mrf.mxu1 }
 0x150   : > { %1197 = vst.msk [vmem:[#allocation3 + $0xc8] sm:$0xff] %vm1171_vm3, %v1164_v50  ;;  %v1169_v9 = vadd.f32 %v3513_v62, %v964_v63  ;;  %v956_v6 = vadd.f32 %v955_v19, %v4384_v49  ;;  %v3514_v1 = vpop.f32.mrf.mxu0 }
 0x151   : > { %v3480_v42 = vpop.f32.mrf.mxu1 }
 0x152   : > { %1202 = vst.msk [vmem:[#allocation3 + $0xf0] sm:$0xff] %vm1171_vm3, %v1169_v9  ;;  %v1167_v48 = vadd.f32 %v1124_v51, %v956_v6  ;;  %v967_v29 = vadd.f32 %v3480_v42, %v4388_v54  ;;  %v1127_v55 = vpop.f32.mrf.mxu0 }
 0x153   : > { %v958_v53 = vpop.f32.mrf.mxu1 }
 0x154   : > { %1200 = vst.msk [vmem:[#allocation3 + $0xe0] sm:$0xff] %vm1171_vm3, %v1167_v48  ;;  %v1170_v15 = vadd.f32 %v3514_v1, %v967_v29  ;;  %v959_v47 = vadd.f32 %v958_v53, %v4392_v56  ;;  %v4517_v52 = vpop.f32.mrf.mxu0 }
 0x155   : > { %v4515_v25 = vpop.f32.mrf.mxu1 }
 0x156   : > { %1203 = vst.msk [vmem:[#allocation3 + $0xf8] sm:$0xff] %vm1171_vm3, %v1170_v15  ;;  %v1168_v49 = vadd.f32 %v1127_v55, %v959_v47  ;;  %v4522_v21 = vpop.f32.mrf.mxu0 }
 0x157   : > { %v4520_v17 = vpop.f32.mrf.mxu1 }
 0x158   : > { %1201 = vst.msk [vmem:[#allocation3 + $0xe8] sm:$0xff] %vm1171_vm3, %v1168_v49  ;;  %v4527_v24 = vpop.f32.mrf.mxu0 }
 0x159   : > { %v4525_v54 = vpop.f32.mrf.mxu1 }
 0x15a   : > { %v4531_v56 = vpop.f32.mrf.mxu0 }
 0x15b   : > { %v4529_v10 = vpop.f32.mrf.mxu1 }
 0x15c   : > { %v4535_v13 = vpop.f32.mrf.mxu0 }
 0x15d   : > { %v4533_v11 = vpop.f32.mrf.mxu1 }
 0x15e   : > { %v4539_v14 = vpop.f32.mrf.mxu0 }
 0x15f   : > { %v4537_v57 = vpop.f32.mrf.mxu1 }
 0x160   : > { %v4543_v31 = vpop.f32.mrf.mxu0 }
 0x161   : > { %v4541_v33 = vpop.f32.mrf.mxu1 }
 0x162   : > { %v4547_v0 = vpop.f32.mrf.mxu0 }
 0x163   : > { %v4545_v60 = vpop.f32.mrf.mxu1 }
 0x164   : > { %v4551_v37 = vpop.f32.mrf.mxu0 }
 0x165   : > { %v4549_v3 = vpop.f32.mrf.mxu1 }
 0x166   : > { %v4555_v59 = vpop.f32.mrf.mxu0 }
 0x167   : > { %v4553_v28 = vpop.f32.mrf.mxu1 }
 0x168   : > { %v4559_v36 = vpop.f32.mrf.mxu0 }
 0x169   : > { %v4557_v58 = vpop.f32.mrf.mxu1 }
 0x16a   : > { %v4563_v16 = vpop.f32.mrf.mxu0 }
 0x16b   : > { %v4561_v32 = vpop.f32.mrf.mxu1 }
 0x16c   : > { %v4567_v41 = vpop.f32.mrf.mxu0 }
 0x16d   : > { %v4565_v35 = vpop.f32.mrf.mxu1 }
 0x16e   : > { %v4571_v43 = vpop.f32.mrf.mxu0 }
 0x16f   : > { %v4569_v4 = vpop.f32.mrf.mxu1 }
 0x170   : > { %v4575_v18 = vpop.f32.mrf.mxu0 }
 0x171   : > { %v4573_v8 = vpop.f32.mrf.mxu1 }
 0x172   : > { %v4579_v20 = vpop.f32.mrf.mxu0 }
 0x173   : > { %v4577_v12 = vpop.f32.mrf.mxu1 }
 0x174   : > { %v4583_v5 = vpop.f32.mrf.mxu0 }
 0x175   : > { %v4581_v26 = vpop.f32.mrf.mxu1 }
 0x176   : > { %v4587_v23 = vpop.f32.mrf.mxu0 }
 0x177   : > { %v4585_v34 = vpop.f32.mrf.mxu1 }
 0x178   : > { %v4591_v40 = vpop.f32.mrf.mxu0 }
 0x179   : > { %v4589_v7 = vpop.f32.mrf.mxu1 }
 0x17a   : > { %v4595_v2 = vpop.f32.mrf.mxu0 }
 0x17b   : > { %v4593_v61 = vpop.f32.mrf.mxu1 }
 0x17c   : > { %v4599_v22 = vpop.f32.mrf.mxu0 }
 0x17d   : > { %v4597_v44 = vpop.f32.mrf.mxu1 }
 0x17e   : > { %v4603_v38 = vpop.f32.mrf.mxu0 }
 0x17f   : > { %v4601_v27 = vpop.f32.mrf.mxu1 }
 0x180   : > { %v4607_v39 = vpop.f32.mrf.mxu0 }
 0x181   : > { %v4605_v30 = vpop.f32.mrf.mxu1 }
 0x182   : > { %v4611_v46 = vpop.f32.mrf.mxu0 }
 0x183   : > { %v4609_v45 = vpop.f32.mrf.mxu1 }
 0x184   : > { %v4615_v50 = vpop.f32.mrf.mxu0 }
 0x185   : > { %v4613_v62 = vpop.f32.mrf.mxu1 }
 0x186   : > { %v4619_v19 = vpop.f32.mrf.mxu0 }
 0x187   : > { %v4617_v63 = vpop.f32.mrf.mxu1  ;;  %5034 = vst [vmem:[#allocation5_spill] sm:$0xff] %v4619_v19 }
 0x188   : > { %5033 = vst [vmem:[#allocation4_spill] sm:$0xff] %v4617_v63  ;;  %v4623_v9 = vpop.f32.mrf.mxu0 }
 0x189   : > { %v4621_v51 = vpop.f32.mrf.mxu1  ;;  %5036 = vst [vmem:[#allocation7_spill] sm:$0xff] %v4623_v9 }
 0x18a   : > { %5035 = vst [vmem:[#allocation6_spill] sm:$0xff] %v4621_v51  ;;  %v4627_v42 = vpop.f32.mrf.mxu0 }
 0x18b   : > { %v4625_v6 = vpop.f32.mrf.mxu1  ;;  %5038 = vst [vmem:[#allocation9_spill] sm:$0xff] %v4627_v42 }
 0x18c   : > { %5037 = vst [vmem:[#allocation8_spill] sm:$0xff] %v4625_v6  ;;  %v4631_v48 = vpop.f32.mrf.mxu0  ;;  %v1523_v6 = vadd.f32 %v4517_v52, %v4515_v25  ;;  %v1518_v25 = vadd.f32 %v4531_v56, %v4529_v10  ;;  %v1531_v10 = vadd.f32 %v4539_v14, %v4537_v57  ;;  %v1534_v57 = vadd.f32 %v4547_v0, %v4545_v60 }
 0x18d   : > { %v4629_v1 = vpop.f32.mrf.mxu1  ;;  %5040 = vst [vmem:[#allocation11_spill] sm:$0xff] %v4631_v48  ;;  %v1515_v48 = vadd.f32 %v4522_v21, %v4520_v17  ;;  %v1845_v21 = vld [vmem:[#allocation3 + $0x18] sm:$0xff]  ;;  %v1547_v60 = vadd.f32 %v4555_v59, %v4553_v28  ;;  %v1550_v28 = vadd.f32 %v4563_v16, %v4561_v32  ;;  %v1563_v32 = vadd.f32 %v4571_v43, %v4569_v4 }
 0x18e   : > { %5039 = vst [vmem:[#allocation10_spill] sm:$0xff] %v4629_v1  ;;  %v4635_v53 = vpop.f32.mrf.mxu0  ;;  %v1844_v1 = vld [vmem:[#allocation3 + $0x10] sm:$0xff]  ;;  %v1566_v4 = vadd.f32 %v4579_v20, %v4577_v12  ;;  %v1579_v12 = vadd.f32 %v4587_v23, %v4585_v34  ;;  %v1582_v34 = vadd.f32 %v4595_v2, %v4593_v61  ;;  %v1595_v61 = vadd.f32 %v4603_v38, %v4601_v27 }
 0x18f   : > { %v4633_v29 = vpop.f32.mrf.mxu1  ;;  %5042 = vst [vmem:[#allocation13_spill] sm:$0xff] %v4635_v53  ;;  %v1598_v27 = vadd.f32 %v4611_v46, %v4609_v45  ;;  %v5047_v45 = vld [vmem:[#allocation4_spill] sm:$0xff]  ;;  %v5048_v46 = vld [vmem:[#allocation5_spill] sm:$0xff] }
 0x190   : > { %5041 = vst [vmem:[#allocation12_spill] sm:$0xff] %v4633_v29  ;;  %v4639_v15 = vpop.f32.mrf.mxu0 }
 0x191   : > { %v4637_v55 = vpop.f32.mrf.mxu1  ;;  %5044 = vst [vmem:[#allocation15_spill] sm:$0xff] %v4639_v15  ;;  %v1526_v15 = vadd.f32 %v4527_v24, %v4525_v54  ;;  %v1539_v54 = vadd.f32 %v4535_v13, %v4533_v11  ;;  %v1542_v11 = vadd.f32 %v4543_v31, %v4541_v33  ;;  %v1555_v33 = vadd.f32 %v4551_v37, %v4549_v3 }
 0x192   : > { %5043 = vst [vmem:[#allocation14_spill] sm:$0xff] %v4637_v55  ;;  %v4643_v49 = vpop.f32.mrf.mxu0  ;;  %v1558_v3 = vadd.f32 %v4559_v36, %v4557_v58  ;;  %v1571_v58 = vadd.f32 %v4567_v41, %v4565_v35  ;;  %v1574_v35 = vadd.f32 %v4575_v18, %v4573_v8  ;;  %v1587_v8 = vadd.f32 %v4583_v5, %v4581_v26 }
 0x193   : > { %v4641_v47 = vpop.f32.mrf.mxu1  ;;  %5046 = vst [vmem:[#allocation17_spill] sm:$0xff] %v4643_v49  ;;  %v1842_v49 = vld [vmem:[#allocation3] sm:$0xff]  ;;  %v1590_v26 = vadd.f32 %v4591_v40, %v4589_v7  ;;  %v1603_v7 = vadd.f32 %v4599_v22, %v4597_v44  ;;  %v1606_v44 = vadd.f32 %v4607_v39, %v4605_v30  ;;  %v1619_v30 = vadd.f32 %v4615_v50, %v4613_v62  ;;  %v5049_v62 = vld [vmem:[#allocation6_spill] sm:$0xff]  ;;  %v5050_v50 = vld [vmem:[#allocation7_spill] sm:$0xff] }
 0x194   : > { %5045 = vst [vmem:[#allocation16_spill] sm:$0xff] %v4641_v47  ;;  %v4647_v9 = vpop.f32.mrf.mxu0 }
 0x195   : > { %v3587_v42 = vpop.f32.mrf.mxu1 }
 0x196   : > { %v1812_v29 = vadd.f32 %v3587_v42, %v1523_v6  ;;  %v4651_v51 = vpop.f32.mrf.mxu0 }
 0x197   : > { %v1683_v53 = vpop.f32.mrf.mxu1 }
 0x198   : > { %v1876_v47 = vadd.f32 %v1844_v1, %v1812_v29  ;;  %v1810_v55 = vadd.f32 %v1683_v53, %v1515_v48  ;;  %v4655_v63 = vpop.f32.mrf.mxu0  ;;  %v1843_v48 = vld [vmem:[#allocation3 + $0x8] sm:$0xff] }
 0x199   : > { %v3588_v19 = vpop.f32.mrf.mxu1 }
 0x19a   : > { %1908 = vst.msk [vmem:[#allocation3 + $0x10] sm:$0xff] %vm1171_vm3, %v1876_v47  ;;  %v1874_v52 = vadd.f32 %v1842_v49, %v1810_v55  ;;  %v1813_v17 = vadd.f32 %v3588_v19, %v1526_v15  ;;  %v4660_v42 = vpop.f32.mrf.mxu0  ;;  %v1848_v55 = vld [vmem:[#allocation3 + $0x30] sm:$0xff] }
 0x19b   : > { %v1686_v6 = vpop.f32.mrf.mxu1 }
 0x19c   : > { %1906 = vst.msk [vmem:[#allocation3] sm:$0xff] %vm1171_vm3, %v1874_v52  ;;  %v1877_v24 = vadd.f32 %v1845_v21, %v1813_v17  ;;  %v1811_v1 = vadd.f32 %v1686_v6, %v1518_v25  ;;  %v4665_v53 = vpop.f32.mrf.mxu0  ;;  %v1846_v25 = vld [vmem:[#allocation3 + $0x20] sm:$0xff]  ;;  %v1849_v6 = vld [vmem:[#allocation3 + $0x38] sm:$0xff] }
 0x19d   : > { %v3591_v29 = vpop.f32.mrf.mxu1 }
 0x19e   : > { %1909 = vst.msk [vmem:[#allocation3 + $0x18] sm:$0xff] %vm1171_vm3, %v1877_v24  ;;  %v1875_v56 = vadd.f32 %v1843_v48, %v1811_v1  ;;  %v1816_v19 = vadd.f32 %v3591_v29, %v1539_v54  ;;  %v4670_v47 = vpop.f32.mrf.mxu0  ;;  %v1847_v48 = vld [vmem:[#allocation3 + $0x28] sm:$0xff] }
 0x19f   : > { %v1699_v15 = vpop.f32.mrf.mxu1 }
 0x1a0   : > { %1907 = vst.msk [vmem:[#allocation3 + $0x8] sm:$0xff] %vm1171_vm3, %v1875_v56  ;;  %v1880_v13 = vadd.f32 %v1848_v55, %v1816_v19  ;;  %v1814_v49 = vadd.f32 %v1699_v15, %v1531_v10  ;;  %v4675_v17 = vpop.f32.mrf.mxu0  ;;  %v1852_v19 = vld [vmem:[#allocation3 + $0x50] sm:$0xff] }
 0x1a1   : > { %v3592_v52 = vpop.f32.mrf.mxu1 }
 0x1a2   : > { %1912 = vst.msk [vmem:[#allocation3 + $0x30] sm:$0xff] %vm1171_vm3, %v1880_v13  ;;  %v1878_v14 = vadd.f32 %v1846_v25, %v1814_v49  ;;  %v1817_v21 = vadd.f32 %v3592_v52, %v1542_v11  ;;  %v4680_v24 = vpop.f32.mrf.mxu0  ;;  %v1850_v13 = vld [vmem:[#allocation3 + $0x40] sm:$0xff] }
 0x1a3   : > { %v1702_v54 = vpop.f32.mrf.mxu1 }
 0x1a4   : > { %1910 = vst.msk [vmem:[#allocation3 + $0x20] sm:$0xff] %vm1171_vm3, %v1878_v14  ;;  %v1881_v31 = vadd.f32 %v1849_v6, %v1817_v21  ;;  %v1815_v1 = vadd.f32 %v1702_v54, %v1534_v57  ;;  %v4685_v10 = vpop.f32.mrf.mxu0  ;;  %v1853_v57 = vld [vmem:[#allocation3 + $0x58] sm:$0xff]  ;;  %v1851_v54 = vld [vmem:[#allocation3 + $0x48] sm:$0xff] }
 0x1a5   : > { %v3595_v29 = vpop.f32.mrf.mxu1 }
 0x1a6   : > { %1913 = vst.msk [vmem:[#allocation3 + $0x38] sm:$0xff] %vm1171_vm3, %v1881_v31  ;;  %v1879_v0 = vadd.f32 %v1847_v48, %v1815_v1  ;;  %v1820_v56 = vadd.f32 %v3595_v29, %v1555_v33  ;;  %v4690_v15 = vpop.f32.mrf.mxu0  ;;  %v1856_v48 = vld [vmem:[#allocation3 + $0x70] sm:$0xff] }
 0x1a7   : > { %v1715_v55 = vpop.f32.mrf.mxu1 }
 0x1a8   : > { %1911 = vst.msk [vmem:[#allocation3 + $0x28] sm:$0xff] %vm1171_vm3, %v1879_v0  ;;  %v1884_v37 = vadd.f32 %v1852_v19, %v1820_v56  ;;  %v1818_v11 = vadd.f32 %v1715_v55, %v1547_v60  ;;  %v4695_v25 = vpop.f32.mrf.mxu0  ;;  %v1854_v56 = vld [vmem:[#allocation3 + $0x60] sm:$0xff] }
 0x1a9   : > { %v3596_v49 = vpop.f32.mrf.mxu1 }
 0x1aa   : > { %1916 = vst.msk [vmem:[#allocation3 + $0x50] sm:$0xff] %vm1171_vm3, %v1884_v37  ;;  %v1882_v59 = vadd.f32 %v1850_v13, %v1818_v11  ;;  %v1821_v52 = vadd.f32 %v3596_v49, %v1558_v3  ;;  %v4700_v21 = vpop.f32.mrf.mxu0  ;;  %v1857_v37 = vld [vmem:[#allocation3 + $0x78] sm:$0xff] }
 0x1ab   : > { %v1718_v14 = vpop.f32.mrf.mxu1 }
 0x1ac   : > { %1914 = vst.msk [vmem:[#allocation3 + $0x40] sm:$0xff] %vm1171_vm3, %v1882_v59  ;;  %v1885_v36 = vadd.f32 %v1853_v57, %v1821_v52  ;;  %v1819_v6 = vadd.f32 %v1718_v14, %v1550_v28  ;;  %v4705_v31 = vpop.f32.mrf.mxu0  ;;  %v1855_v28 = vld [vmem:[#allocation3 + $0x68] sm:$0xff]  ;;  %v1860_v14 = vld [vmem:[#allocation3 + $0x90] sm:$0xff] }
 0x1ad   : > { %v3599_v33 = vpop.f32.mrf.mxu1 }
 0x1ae   : > { %1917 = vst.msk [vmem:[#allocation3 + $0x58] sm:$0xff] %vm1171_vm3, %v1885_v36  ;;  %v1883_v16 = vadd.f32 %v1851_v54, %v1819_v6  ;;  %v1824_v1 = vadd.f32 %v3599_v33, %v1571_v58  ;;  %v4710_v60 = vpop.f32.mrf.mxu0  ;;  %v1858_v54 = vld [vmem:[#allocation3 + $0x80] sm:$0xff] }
 0x1af   : > { %v1731_v29 = vpop.f32.mrf.mxu1 }
 0x1b0   : > { %1915 = vst.msk [vmem:[#allocation3 + $0x48] sm:$0xff] %vm1171_vm3, %v1883_v16  ;;  %v1888_v41 = vadd.f32 %v1856_v48, %v1824_v1  ;;  %v1822_v0 = vadd.f32 %v1731_v29, %v1563_v32  ;;  %v4715_v55 = vpop.f32.mrf.mxu0  ;;  %v1861_v1 = vld [vmem:[#allocation3 + $0x98] sm:$0xff] }
 0x1b1   : > { %v3600_v19 = vpop.f32.mrf.mxu1 }
 0x1b2   : > { %1920 = vst.msk [vmem:[#allocation3 + $0x70] sm:$0xff] %vm1171_vm3, %v1888_v41  ;;  %v1886_v43 = vadd.f32 %v1854_v56, %v1822_v0  ;;  %v1825_v3 = vadd.f32 %v3600_v19, %v1574_v35  ;;  %v4720_v13 = vpop.f32.mrf.mxu0  ;;  %v1859_v41 = vld [vmem:[#allocation3 + $0x88] sm:$0xff] }
 0x1b3   : > { %v1734_v11 = vpop.f32.mrf.mxu1 }
 0x1b4   : > { %1918 = vst.msk [vmem:[#allocation3 + $0x60] sm:$0xff] %vm1171_vm3, %v1886_v43  ;;  %v1889_v18 = vadd.f32 %v1857_v37, %v1825_v3  ;;  %v1823_v49 = vadd.f32 %v1734_v11, %v1566_v4  ;;  %v4725_v52 = vpop.f32.mrf.mxu0  ;;  %v1864_v4 = vld [vmem:[#allocation3 + $0xb0] sm:$0xff]  ;;  %v1862_v11 = vld [vmem:[#allocation3 + $0xa0] sm:$0xff] }
 0x1b5   : > { %v3603_v59 = vpop.f32.mrf.mxu1 }
 0x1b6   : > { %1921 = vst.msk [vmem:[#allocation3 + $0x78] sm:$0xff] %vm1171_vm3, %v1889_v18  ;;  %v1887_v20 = vadd.f32 %v1855_v28, %v1823_v49  ;;  %v1828_v57 = vadd.f32 %v3603_v59, %v1587_v8  ;;  %v4730_v36 = vpop.f32.mrf.mxu0  ;;  %v1865_v28 = vld [vmem:[#allocation3 + $0xb8] sm:$0xff] }
 0x1b7   : > { %v1747_v58 = vpop.f32.mrf.mxu1 }
 0x1b8   : > { %1919 = vst.msk [vmem:[#allocation3 + $0x68] sm:$0xff] %vm1171_vm3, %v1887_v20  ;;  %v1892_v5 = vadd.f32 %v1860_v14, %v1828_v57  ;;  %v1826_v6 = vadd.f32 %v1747_v58, %v1579_v12  ;;  %v4735_v32 = vpop.f32.mrf.mxu0  ;;  %v1863_v57 = vld [vmem:[#allocation3 + $0xa8] sm:$0xff] }
 0x1b9   : > { %v3604_v33 = vpop.f32.mrf.mxu1 }
 0x1ba   : > { %1924 = vst.msk [vmem:[#allocation3 + $0x90] sm:$0xff] %vm1171_vm3, %v1892_v5  ;;  %v1890_v23 = vadd.f32 %v1858_v54, %v1826_v6  ;;  %v1829_v16 = vadd.f32 %v3604_v33, %v1590_v26  ;;  %v4740_v29 = vpop.f32.mrf.mxu0  ;;  %v1611_v26 = vadd.f32 %v5048_v46, %v5047_v45  ;;  %v1868_v54 = vld [vmem:[#allocation3 + $0xd0] sm:$0xff] }
 0x1bb   : > { %v1750_v48 = vpop.f32.mrf.mxu1  ;;  %v5057_v46 = vld [vmem:[#allocation14_spill] sm:$0xff] }
 0x1bc   : > { %1922 = vst.msk [vmem:[#allocation3 + $0x80] sm:$0xff] %vm1171_vm3, %v1890_v23  ;;  %v1893_v40 = vadd.f32 %v1861_v1, %v1829_v16  ;;  %v1827_v35 = vadd.f32 %v1750_v48, %v1582_v34  ;;  %v4745_v56 = vpop.f32.mrf.mxu0  ;;  %v1622_v23 = vadd.f32 %v5050_v50, %v5049_v62  ;;  %v1866_v48 = vld [vmem:[#allocation3 + $0xc0] sm:$0xff] }
 0x1bd   : > { %v3607_v0 = vpop.f32.mrf.mxu1 }
 0x1be   : > { %1925 = vst.msk [vmem:[#allocation3 + $0x98] sm:$0xff] %vm1171_vm3, %v1893_v40  ;;  %v1891_v2 = vadd.f32 %v1859_v41, %v1827_v35  ;;  %v1832_v19 = vadd.f32 %v3607_v0, %v1603_v7  ;;  %v4750_v3 = vpop.f32.mrf.mxu0  ;;  %v5051_v35 = vld [vmem:[#allocation8_spill] sm:$0xff]  ;;  %v5052_v41 = vld [vmem:[#allocation9_spill] sm:$0xff] }
 0x1bf   : > { %v1763_v43 = vpop.f32.mrf.mxu1  ;;  %v1614_v0 = vadd.f32 %v5052_v41, %v5051_v35  ;;  %v1873_v35 = vld [vmem:[#allocation3 + $0xf8] sm:$0xff] }
 0x1c0   : > { %1923 = vst.msk [vmem:[#allocation3 + $0x88] sm:$0xff] %vm1171_vm3, %v1891_v2  ;;  %v1896_v22 = vadd.f32 %v1864_v4, %v1832_v19  ;;  %v1830_v37 = vadd.f32 %v1763_v43, %v1595_v61  ;;  %v4755_v18 = vpop.f32.mrf.mxu0  ;;  %v1869_v19 = vld [vmem:[#allocation3 + $0xd8] sm:$0xff] }
 0x1c1   : > { %v3608_v8 = vpop.f32.mrf.mxu1 }
 0x1c2   : > { %1928 = vst.msk [vmem:[#allocation3 + $0xb0] sm:$0xff] %vm1171_vm3, %v1896_v22  ;;  %v1894_v38 = vadd.f32 %v1862_v11, %v1830_v37  ;;  %v1833_v49 = vadd.f32 %v3608_v8, %v1606_v44  ;;  %v4760_v12 = vpop.f32.mrf.mxu0  ;;  %v5053_v44 = vld [vmem:[#allocation10_spill] sm:$0xff]  ;;  %v5054_v22 = vld [vmem:[#allocation11_spill] sm:$0xff] }
 0x1c3   : > { %v1766_v59 = vpop.f32.mrf.mxu1  ;;  %v1635_v37 = vadd.f32 %v5054_v22, %v5053_v44 }
 0x1c4   : > { %1926 = vst.msk [vmem:[#allocation3 + $0xa0] sm:$0xff] %vm1171_vm3, %v1894_v38  ;;  %v1897_v39 = vadd.f32 %v1865_v28, %v1833_v49  ;;  %v1831_v20 = vadd.f32 %v1766_v59, %v1598_v27  ;;  %v4765_v58 = vpop.f32.mrf.mxu0  ;;  %v1867_v27 = vld [vmem:[#allocation3 + $0xc8] sm:$0xff]  ;;  %v5055_v28 = vld [vmem:[#allocation12_spill] sm:$0xff] }
 0x1c5   : > { %v3611_v14 = vpop.f32.mrf.mxu1  ;;  %v5056_v59 = vld [vmem:[#allocation13_spill] sm:$0xff] }
 0x1c6   : > { %1929 = vst.msk [vmem:[#allocation3 + $0xb8] sm:$0xff] %vm1171_vm3, %v1897_v39  ;;  %v1895_v5 = vadd.f32 %v1863_v57, %v1831_v20  ;;  %v1836_v6 = vadd.f32 %v3611_v14, %v1619_v30  ;;  %v4770_v34 = vpop.f32.mrf.mxu0  ;;  %v1627_v30 = vadd.f32 %v5056_v59, %v5055_v28  ;;  %v1872_v57 = vld [vmem:[#allocation3 + $0xf0] sm:$0xff] }
 0x1c7   : > { %v1779_v33 = vpop.f32.mrf.mxu1  ;;  %v2578_v28 = vld [vmem:[#allocation3 + $0x10] sm:$0xff] }
 0x1c8   : > { %1927 = vst.msk [vmem:[#allocation3 + $0xa8] sm:$0xff] %vm1171_vm3, %v1895_v5  ;;  %v1900_v16 = vadd.f32 %v1868_v54, %v1836_v6  ;;  %v1834_v1 = vadd.f32 %v1779_v33, %v1611_v26  ;;  %v4775_v40 = vpop.f32.mrf.mxu0  ;;  %v5058_v26 = vld [vmem:[#allocation15_spill] sm:$0xff]  ;;  %v1870_v33 = vld [vmem:[#allocation3 + $0xe0] sm:$0xff] }
 0x1c9   : > { %v3612_v7 = vpop.f32.mrf.mxu1  ;;  %v1638_v5 = vadd.f32 %v5058_v26, %v5057_v46 }
 0x1ca   : > { %1932 = vst.msk [vmem:[#allocation3 + $0xd0] sm:$0xff] %vm1171_vm3, %v1900_v16  ;;  %v1898_v61 = vadd.f32 %v1866_v48, %v1834_v1  ;;  %v1837_v2 = vadd.f32 %v3612_v7, %v1622_v23  ;;  %v4780_v43 = vpop.f32.mrf.mxu0  ;;  %v5059_v23 = vld [vmem:[#allocation16_spill] sm:$0xff]  ;;  %v5060_v16 = vld [vmem:[#allocation17_spill] sm:$0xff] }
 0x1cb   : > { %v1782_v4 = vpop.f32.mrf.mxu1  ;;  %v1630_v1 = vadd.f32 %v5060_v16, %v5059_v23 }
 0x1cc   : > { %1930 = vst.msk [vmem:[#allocation3 + $0xc0] sm:$0xff] %vm1171_vm3, %v1898_v61  ;;  %v1901_v11 = vadd.f32 %v1869_v19, %v1837_v2  ;;  %v1835_v8 = vadd.f32 %v1782_v4, %v1614_v0  ;;  %v4785_v49 = vpop.f32.mrf.mxu0  ;;  %v1871_v19 = vld [vmem:[#allocation3 + $0xe8] sm:$0xff] }
 0x1cd   : > { %v3615_v38 = vpop.f32.mrf.mxu1 }
 0x1ce   : > { %1933 = vst.msk [vmem:[#allocation3 + $0xd8] sm:$0xff] %vm1171_vm3, %v1901_v11  ;;  %v1899_v39 = vadd.f32 %v1867_v27, %v1835_v8  ;;  %v1840_v20 = vadd.f32 %v3615_v38, %v1635_v37  ;;  %v4790_v45 = vpop.f32.mrf.mxu0 }
 0x1cf   : > { %v1795_v14 = vpop.f32.mrf.mxu1 }
 0x1d0   : > { %1931 = vst.msk [vmem:[#allocation3 + $0xc8] sm:$0xff] %vm1171_vm3, %v1899_v39  ;;  %v1904_v6 = vadd.f32 %v1872_v57, %v1840_v20  ;;  %v1838_v54 = vadd.f32 %v1795_v14, %v1627_v30  ;;  %v4795_v50 = vpop.f32.mrf.mxu0  ;;  %v2576_v14 = vld [vmem:[#allocation3] sm:$0xff] }
 0x1d1   : > { %v3616_v62 = vpop.f32.mrf.mxu1 }
 0x1d2   : > { %1936 = vst.msk [vmem:[#allocation3 + $0xf0] sm:$0xff] %vm1171_vm3, %v1904_v6  ;;  %v1902_v48 = vadd.f32 %v1870_v33, %v1838_v54  ;;  %v1841_v7 = vadd.f32 %v3616_v62, %v1638_v5  ;;  %v4800_v0 = vpop.f32.mrf.mxu0  ;;  %v2579_v54 = vld [vmem:[#allocation3 + $0x18] sm:$0xff] }
 0x1d3   : > { %v1798_v41 = vpop.f32.mrf.mxu1 }
 0x1d4   : > { %1934 = vst.msk [vmem:[#allocation3 + $0xe0] sm:$0xff] %vm1171_vm3, %v1902_v48  ;;  %v1905_v61 = vadd.f32 %v1873_v35, %v1841_v7  ;;  %v1839_v2 = vadd.f32 %v1798_v41, %v1630_v1  ;;  %v3689_v44 = vpop.f32.mrf.mxu0 }
 0x1d5   : > { %v3655_v4 = vpop.f32.mrf.mxu1 }
 0x1d6   : > { %1937 = vst.msk [vmem:[#allocation3 + $0xf8] sm:$0xff] %vm1171_vm3, %v1905_v61  ;;  %v1903_v22 = vadd.f32 %v1871_v19, %v1839_v2  ;;  %v2257_v37 = vadd.f32 %v3655_v4, %v4647_v9  ;;  %v2417_v8 = vpop.f32.mrf.mxu0 }
 0x1d7   : > { %v2248_v11 = vpop.f32.mrf.mxu1 }
 0x1d8   : > { %1935 = vst.msk [vmem:[#allocation3 + $0xe8] sm:$0xff] %vm1171_vm3, %v1903_v22  ;;  %v2546_v27 = vadd.f32 %v3689_v44, %v2257_v37  ;;  %v2249_v38 = vadd.f32 %v2248_v11, %v4651_v51  ;;  %v3690_v30 = vpop.f32.mrf.mxu0  ;;  %v2580_v22 = vld [vmem:[#allocation3 + $0x20] sm:$0xff] }
 0x1d9   : > { %v3656_v59 = vpop.f32.mrf.mxu1 }
 0x1da   : > { %v2610_v39 = vadd.f32 %v2578_v28, %v2546_v27  ;;  %v2544_v20 = vadd.f32 %v2417_v8, %v2249_v38  ;;  %v2260_v57 = vadd.f32 %v3656_v59, %v4655_v63  ;;  %v2420_v26 = vpop.f32.mrf.mxu0  ;;  %v2577_v63 = vld [vmem:[#allocation3 + $0x8] sm:$0xff]  ;;  %v2583_v38 = vld [vmem:[#allocation3 + $0x38] sm:$0xff] }
 0x1db   : > { %v2251_v46 = vpop.f32.mrf.mxu1 }
 0x1dc   : > { %2642 = vst.msk [vmem:[#allocation3 + $0x10] sm:$0xff] %vm1171_vm3, %v2610_v39  ;;  %v2608_v9 = vadd.f32 %v2576_v14, %v2544_v20  ;;  %v2547_v5 = vadd.f32 %v3690_v30, %v2260_v57  ;;  %v2252_v6 = vadd.f32 %v2251_v46, %v4660_v42  ;;  %v3693_v51 = vpop.f32.mrf.mxu0  ;;  %v2582_v42 = vld [vmem:[#allocation3 + $0x30] sm:$0xff] }
 0x1dd   : > { %v3659_v33 = vpop.f32.mrf.mxu1 }
 0x1de   : > { %2640 = vst.msk [vmem:[#allocation3] sm:$0xff] %vm1171_vm3, %v2608_v9  ;;  %v2611_v62 = vadd.f32 %v2579_v54, %v2547_v5  ;;  %v2545_v23 = vadd.f32 %v2420_v26, %v2252_v6  ;;  %v2273_v16 = vadd.f32 %v3659_v33, %v4665_v53  ;;  %v2433_v48 = vpop.f32.mrf.mxu0 }
 0x1df   : > { %v2264_v1 = vpop.f32.mrf.mxu1 }
 0x1e0   : > { %2643 = vst.msk [vmem:[#allocation3 + $0x18] sm:$0xff] %vm1171_vm3, %v2611_v62  ;;  %v2609_v7 = vadd.f32 %v2577_v63, %v2545_v23  ;;  %v2550_v35 = vadd.f32 %v3693_v51, %v2273_v16  ;;  %v2265_v41 = vadd.f32 %v2264_v1, %v4670_v47  ;;  %v3694_v2 = vpop.f32.mrf.mxu0  ;;  %v2586_v63 = vld [vmem:[#allocation3 + $0x50] sm:$0xff] }
 0x1e1   : > { %v3660_v61 = vpop.f32.mrf.mxu1 }
 0x1e2   : > { %2641 = vst.msk [vmem:[#allocation3 + $0x8] sm:$0xff] %vm1171_vm3, %v2609_v7  ;;  %v2614_v53 = vadd.f32 %v2582_v42, %v2550_v35  ;;  %v2548_v19 = vadd.f32 %v2433_v48, %v2265_v41  ;;  %v2276_v4 = vadd.f32 %v3660_v61, %v4675_v17  ;;  %v2436_v47 = vpop.f32.mrf.mxu0  ;;  %v2584_v41 = vld [vmem:[#allocation3 + $0x40] sm:$0xff] }
 0x1e3   : > { %v2674_v44 = vld [vmem:[#allocation3 + $0x10] sm:$0xff]  ;;  %v2267_v37 = vpop.f32.mrf.mxu1 }
 0x1e4   : > { %2706 = vst.msk [vmem:[%s4818_s30 + $0x10] sm:$0xff] %vm1171_vm3, %v2674_v44  ;;  %2646 = vst.msk [vmem:[#allocation3 + $0x30] sm:$0xff] %vm1171_vm3, %v2614_v53  ;;  %v2612_v11 = vadd.f32 %v2580_v22, %v2548_v19  ;;  %v2551_v8 = vadd.f32 %v3694_v2, %v2276_v4  ;;  %v2268_v28 = vadd.f32 %v2267_v37, %v4680_v24  ;;  %v3697_v30 = vpop.f32.mrf.mxu0  ;;  %v2581_v24 = vld [vmem:[#allocation3 + $0x28] sm:$0xff]  ;;  %v2739_v48 = vsel %vm1171_vm3, %v2674_v44, 0.0 }
 0x1e5   : > { %v2672_v27 = vld [vmem:[#allocation3] sm:$0xff]  ;;  %v3663_v59 = vpop.f32.mrf.mxu1  ;;  %v2809_v5 = vmul.f32 %v2674_v44, %v2674_v44 }
 0x1e6   : > { %2704 = vst.msk [vmem:[%s4818_s30] sm:$0xff] %vm1171_vm3, %v2672_v27  ;;  %2644 = vst.msk [vmem:[#allocation3 + $0x20] sm:$0xff] %vm1171_vm3, %v2612_v11  ;;  %v2615_v17 = vadd.f32 %v2583_v38, %v2551_v8  ;;  %v2549_v20 = vadd.f32 %v2436_v47, %v2268_v28  ;;  %v2289_v57 = vadd.f32 %v3663_v59, %v4685_v10  ;;  %v2449_v46 = vpop.f32.mrf.mxu0  ;;  %v2736_v23 = vsel %vm1171_vm3, %v2672_v27, 0.0 }
 0x1e7   : > { %v2675_v39 = vld [vmem:[#allocation3 + $0x18] sm:$0xff]  ;;  %v2280_v14 = vpop.f32.mrf.mxu1  ;;  %v2807_v26 = vmul.f32 %v2672_v27, %v2672_v27  ;;  %v2842_v38 = vsel %vm1171_vm3, %v2809_v5, 0.0 }
 0x1e8   : > { %2707 = vst.msk [vmem:[%s4818_s30 + $0x18] sm:$0xff] %vm1171_vm3, %v2675_v39  ;;  %2647 = vst.msk [vmem:[#allocation3 + $0x38] sm:$0xff] %vm1171_vm3, %v2615_v17  ;;  %v2281_v9 = vadd.f32 %v2280_v14, %v4690_v15  ;;  %v2613_v54 = vadd.f32 %v2581_v24, %v2549_v20  ;;  %v2554_v33 = vadd.f32 %v3697_v30, %v2289_v57  ;;  %v3698_v62 = vpop.f32.mrf.mxu0  ;;  %v2741_v28 = vsel %vm1171_vm3, %v2675_v39, 0.0  ;;  %v2587_v30 = vld [vmem:[#allocation3 + $0x58] sm:$0xff] }
 0x1e9   : > { %v2673_v6 = vld [vmem:[#allocation3 + $0x8] sm:$0xff]  ;;  %v3664_v51 = vpop.f32.mrf.mxu1  ;;  %v2839_v53 = vsel %vm1171_vm3, %v2807_v26, 0.0  ;;  %v2810_v19 = vmul.f32 %v2675_v39, %v2675_v39 }
 0x1ea   : > { %2705 = vst.msk [vmem:[%s4818_s30 + $0x8] sm:$0xff] %vm1171_vm3, %v2673_v6  ;;  %v2737_v10 = vsel %vm1171_vm3, %v2673_v6, 0.0  ;;  %v2808_v16 = vmul.f32 %v2673_v6, %v2673_v6  ;;  %v2552_v1 = vadd.f32 %v2449_v46, %v2281_v9  ;;  %2645 = vst.msk [vmem:[#allocation3 + $0x28] sm:$0xff] %vm1171_vm3, %v2613_v54  ;;  %v2618_v35 = vadd.f32 %v2586_v63, %v2554_v33  ;;  %v2452_v2 = vpop.f32.mrf.mxu0  ;;  %v2585_v39 = vld [vmem:[#allocation3 + $0x48] sm:$0xff] }
 0x1eb   : > { %v2738_v7 = vadd.f32 %v2737_v10, %v2736_v23  ;;  %v4839_v15 = vld [vmem:[#allocation3 + $0x30] sm:$0xff]  ;;  %v2292_v42 = vadd.f32 %v3664_v51, %v4695_v25  ;;  %v2283_v61 = vpop.f32.mrf.mxu1  ;;  %v2844_v9 = vsel %vm1171_vm3, %v2810_v19, 0.0 }
 0x1ec   : > { %v2840_v4 = vsel %vm1171_vm3, %v2808_v16, 0.0  ;;  %2710 = vst.msk [vmem:[%s4818_s30 + $0x30] sm:$0xff] %vm1171_vm3, %v4839_v15  ;;  %v2616_v44 = vadd.f32 %v2584_v41, %v2552_v1  ;;  %2650 = vst.msk [vmem:[#allocation3 + $0x50] sm:$0xff] %vm1171_vm3, %v2618_v35  ;;  %v2284_v25 = vadd.f32 %v2283_v61, %v4700_v21  ;;  %v3701_v27 = vpop.f32.mrf.mxu0  ;;  %v2590_v51 = vld [vmem:[#allocation3 + $0x70] sm:$0xff]  ;;  %v2813_v16 = vmul.f32 %v4839_v15, %v4839_v15 }
 0x1ed   : > { %v2740_v22 = vadd.f32 %v2739_v48, %v2738_v7  ;;  %v2841_v37 = vadd.f32 %v2840_v4, %v2839_v53  ;;  %v2676_v47 = vld [vmem:[#allocation3 + $0x20] sm:$0xff]  ;;  %v2555_v11 = vadd.f32 %v3698_v62, %v2292_v42  ;;  %v3667_v8 = vpop.f32.mrf.mxu1 }
 0x1ee   : > { %2708 = vst.msk [vmem:[%s4818_s30 + $0x20] sm:$0xff] %vm1171_vm3, %v2676_v47  ;;  %v2811_v59 = vmul.f32 %v2676_v47, %v2676_v47  ;;  %2648 = vst.msk [vmem:[#allocation3 + $0x40] sm:$0xff] %vm1171_vm3, %v2616_v44  ;;  %v2305_v17 = vadd.f32 %v3667_v8, %v4705_v31  ;;  %v2553_v21 = vadd.f32 %v2452_v2, %v2284_v25  ;;  %v2465_v24 = vpop.f32.mrf.mxu0  ;;  %v2743_v5 = vsel %vm1171_vm3, %v2676_v47, 0.0  ;;  %v2588_v44 = vld [vmem:[#allocation3 + $0x60] sm:$0xff] }
 0x1ef   : > { %v2843_v20 = vadd.f32 %v2842_v38, %v2841_v37  ;;  %v2742_v57 = vadd.f32 %v2741_v28, %v2740_v22  ;;  %v2679_v14 = vld [vmem:[#allocation3 + $0x38] sm:$0xff]  ;;  %v2619_v46 = vadd.f32 %v2587_v30, %v2555_v11  ;;  %v2296_v26 = vpop.f32.mrf.mxu1  ;;  %v2747_v37 = vsel %vm1171_vm3, %v4839_v15, 0.0 }
 0x1f0   : > { %2711 = vst.msk [vmem:[%s4818_s30 + $0x38] sm:$0xff] %vm1171_vm3, %v2679_v14  ;;  %v2558_v6 = vadd.f32 %v3701_v27, %v2305_v17  ;;  %v2617_v31 = vadd.f32 %v2585_v39, %v2553_v21  ;;  %v2297_v62 = vadd.f32 %v2296_v26, %v4710_v60  ;;  %v3702_v10 = vpop.f32.mrf.mxu0  ;;  %v2846_v63 = vsel %vm1171_vm3, %v2811_v59, 0.0 }
 0x1f1   : > { %v2744_v54 = vadd.f32 %v2743_v5, %v2742_v57  ;;  %v2845_v33 = vadd.f32 %v2844_v9, %v2843_v20  ;;  %2651 = vst.msk [vmem:[#allocation3 + $0x58] sm:$0xff] %vm1171_vm3, %v2619_v46  ;;  %v3668_v23 = vpop.f32.mrf.mxu1  ;;  %v2677_v1 = vld [vmem:[#allocation3 + $0x28] sm:$0xff]  ;;  %v2814_v53 = vmul.f32 %v2679_v14, %v2679_v14  ;;  %v2850_v38 = vsel %vm1171_vm3, %v2813_v16, 0.0  ;;  %v2594_v16 = vld [vmem:[#allocation3 + $0x90] sm:$0xff] }
 0x1f2   : > { %v2622_v48 = vadd.f32 %v2590_v51, %v2558_v6  ;;  %v2308_v7 = vadd.f32 %v3668_v23, %v4715_v55  ;;  %2709 = vst.msk [vmem:[%s4818_s30 + $0x28] sm:$0xff] %vm1171_vm3, %v2677_v1  ;;  %v2745_v41 = vsel %vm1171_vm3, %v2677_v1, 0.0  ;;  %v2812_v42 = vmul.f32 %v2677_v1, %v2677_v1  ;;  %2649 = vst.msk [vmem:[#allocation3 + $0x48] sm:$0xff] %vm1171_vm3, %v2617_v31  ;;  %v2468_v2 = vpop.f32.mrf.mxu0  ;;  %v2589_v5 = vld [vmem:[#allocation3 + $0x68] sm:$0xff] }
 0x1f3   : > { %v2847_v35 = vadd.f32 %v2846_v63, %v2845_v33  ;;  %v2556_v60 = vadd.f32 %v2465_v24, %v2297_v62  ;;  %v2299_v61 = vpop.f32.mrf.mxu1  ;;  %v2746_v19 = vadd.f32 %v2745_v41, %v2744_v54  ;;  %v2682_v4 = vld [vmem:[#allocation3 + $0x50] sm:$0xff]  ;;  %v2749_v28 = vsel %vm1171_vm3, %v2679_v14, 0.0 }
 0x1f4   : > { %2654 = vst.msk [vmem:[#allocation3 + $0x70] sm:$0xff] %vm1171_vm3, %v2622_v48  ;;  %v2559_v55 = vadd.f32 %v3702_v10, %v2308_v7  ;;  %v2300_v22 = vadd.f32 %v2299_v61, %v4720_v13  ;;  %v2848_v47 = vsel %vm1171_vm3, %v2812_v42, 0.0  ;;  %2714 = vst.msk [vmem:[%s4818_s30 + $0x50] sm:$0xff] %vm1171_vm3, %v2682_v4  ;;  %v3705_v27 = vpop.f32.mrf.mxu0  ;;  %v2591_v13 = vld [vmem:[#allocation3 + $0x78] sm:$0xff]  ;;  %v2852_v26 = vsel %vm1171_vm3, %v2814_v53, 0.0 }
 0x1f5   : > { %v2680_v11 = vld [vmem:[#allocation3 + $0x40] sm:$0xff]  ;;  %v2620_v25 = vadd.f32 %v2588_v44, %v2556_v60  ;;  %v3671_v8 = vpop.f32.mrf.mxu1  ;;  %v2748_v59 = vadd.f32 %v2747_v37, %v2746_v19  ;;  %v2849_v30 = vadd.f32 %v2848_v47, %v2847_v35  ;;  %v2817_v6 = vmul.f32 %v2682_v4, %v2682_v4 }
 0x1f6   : > { %2712 = vst.msk [vmem:[%s4818_s30 + $0x40] sm:$0xff] %vm1171_vm3, %v2680_v11  ;;  %v2815_v17 = vmul.f32 %v2680_v11, %v2680_v11  ;;  %v2623_v15 = vadd.f32 %v2591_v13, %v2559_v55  ;;  %v2557_v20 = vadd.f32 %v2468_v2, %v2300_v22  ;;  %v2321_v57 = vadd.f32 %v3671_v8, %v4725_v52  ;;  %v2481_v21 = vpop.f32.mrf.mxu0 }
 0x1f7   : > { %2652 = vst.msk [vmem:[#allocation3 + $0x60] sm:$0xff] %vm1171_vm3, %v2620_v25  ;;  %v2312_v46 = vpop.f32.mrf.mxu1  ;;  %v2851_v24 = vadd.f32 %v2850_v38, %v2849_v30  ;;  %v2750_v9 = vadd.f32 %v2749_v28, %v2748_v59  ;;  %v2751_v54 = vsel %vm1171_vm3, %v2680_v11, 0.0  ;;  %v2755_v61 = vsel %vm1171_vm3, %v2682_v4, 0.0  ;;  %v2595_v38 = vld [vmem:[#allocation3 + $0x98] sm:$0xff] }
 0x1f8   : > { %v2683_v14 = vld [vmem:[#allocation3 + $0x58] sm:$0xff]  ;;  %v2313_v39 = vadd.f32 %v2312_v46, %v4730_v36  ;;  %2655 = vst.msk [vmem:[#allocation3 + $0x78] sm:$0xff] %vm1171_vm3, %v2623_v15  ;;  %v2621_v33 = vadd.f32 %v2589_v5, %v2557_v20  ;;  %v2562_v52 = vadd.f32 %v3705_v27, %v2321_v57  ;;  %v3706_v51 = vpop.f32.mrf.mxu0  ;;  %v2854_v1 = vsel %vm1171_vm3, %v2815_v17, 0.0 }
 0x1f9   : > { %2715 = vst.msk [vmem:[%s4818_s30 + $0x58] sm:$0xff] %vm1171_vm3, %v2683_v14  ;;  %v3672_v31 = vpop.f32.mrf.mxu1  ;;  %v2752_v62 = vadd.f32 %v2751_v54, %v2750_v9  ;;  %v2853_v23 = vadd.f32 %v2852_v26, %v2851_v24  ;;  %v2681_v10 = vld [vmem:[#allocation3 + $0x48] sm:$0xff]  ;;  %v2818_v53 = vmul.f32 %v2683_v14, %v2683_v14  ;;  %v2858_v4 = vsel %vm1171_vm3, %v2817_v6, 0.0 }
 0x1fa   : > { %v2560_v63 = vadd.f32 %v2481_v21, %v2313_v39  ;;  %v2324_v36 = vadd.f32 %v3672_v31, %v4735_v32  ;;  %2713 = vst.msk [vmem:[%s4818_s30 + $0x48] sm:$0xff] %vm1171_vm3, %v2681_v10  ;;  %v2753_v48 = vsel %vm1171_vm3, %v2681_v10, 0.0  ;;  %v2816_v7 = vmul.f32 %v2681_v10, %v2681_v10  ;;  %2653 = vst.msk [vmem:[#allocation3 + $0x68] sm:$0xff] %vm1171_vm3, %v2621_v33  ;;  %v2484_v60 = vpop.f32.mrf.mxu0  ;;  %v2592_v32 = vld [vmem:[#allocation3 + $0x80] sm:$0xff]  ;;  %v2593_v21 = vld [vmem:[#allocation3 + $0x88] sm:$0xff] }
 0x1fb   : > { %v4894_v35 = vld [vmem:[#allocation3 + $0x70] sm:$0xff]  ;;  %v2626_v41 = vadd.f32 %v2594_v16, %v2562_v52  ;;  %v2315_v42 = vpop.f32.mrf.mxu1  ;;  %v2855_v2 = vadd.f32 %v2854_v1, %v2853_v23  ;;  %v2754_v19 = vadd.f32 %v2753_v48, %v2752_v62  ;;  %v2757_v59 = vsel %vm1171_vm3, %v2683_v14, 0.0  ;;  %v2596_v16 = vld [vmem:[#allocation3 + $0xa0] sm:$0xff] }
 0x1fc   : > { %2718 = vst.msk [vmem:[%s4818_s30 + $0x70] sm:$0xff] %vm1171_vm3, %v4894_v35  ;;  %v2856_v44 = vsel %vm1171_vm3, %v2816_v7, 0.0  ;;  %v2624_v55 = vadd.f32 %v2592_v32, %v2560_v63  ;;  %v2563_v22 = vadd.f32 %v3706_v51, %v2324_v36  ;;  %v2316_v37 = vadd.f32 %v2315_v42, %v4740_v29  ;;  %v3709_v11 = vpop.f32.mrf.mxu0  ;;  %v2598_v39 = vld [vmem:[#allocation3 + $0xb0] sm:$0xff] }
 0x1fd   : > { %2658 = vst.msk [vmem:[#allocation3 + $0x90] sm:$0xff] %vm1171_vm3, %v2626_v41  ;;  %v3675_v47 = vpop.f32.mrf.mxu1  ;;  %v2756_v25 = vadd.f32 %v2755_v61, %v2754_v19  ;;  %v2857_v8 = vadd.f32 %v2856_v44, %v2855_v2  ;;  %v2821_v9 = vmul.f32 %v4894_v35, %v4894_v35  ;;  %v2763_v61 = vsel %vm1171_vm3, %v4894_v35, 0.0 }
 0x1fe   : > { %v2684_v27 = vld [vmem:[#allocation3 + $0x60] sm:$0xff]  ;;  %v2337_v28 = vadd.f32 %v3675_v47, %v4745_v56  ;;  %2656 = vst.msk [vmem:[#allocation3 + $0x80] sm:$0xff] %vm1171_vm3, %v2624_v55  ;;  %v2627_v13 = vadd.f32 %v2595_v38, %v2563_v22  ;;  %v2561_v29 = vadd.f32 %v2484_v60, %v2316_v37  ;;  %v2497_v15 = vpop.f32.mrf.mxu0  ;;  %v2860_v56 = vsel %vm1171_vm3, %v2818_v53, 0.0  ;;  %v2599_v37 = vld [vmem:[#allocation3 + $0xb8] sm:$0xff] }
 0x1ff   : > { %2716 = vst.msk [vmem:[%s4818_s30 + $0x60] sm:$0xff] %vm1171_vm3, %v2684_v27  ;;  %v2819_v30 = vmul.f32 %v2684_v27, %v2684_v27  ;;  %v2328_v17 = vpop.f32.mrf.mxu1  ;;  %v2859_v20 = vadd.f32 %v2858_v4, %v2857_v8  ;;  %v2758_v57 = vadd.f32 %v2757_v59, %v2756_v25  ;;  %v2687_v46 = vld [vmem:[#allocation3 + $0x78] sm:$0xff]  ;;  %v2759_v14 = vsel %vm1171_vm3, %v2684_v27, 0.0  ;;  %v2597_v8 = vld [vmem:[#allocation3 + $0xa8] sm:$0xff] }
 0x200   : > { %v2566_v26 = vadd.f32 %v3709_v11, %v2337_v28  ;;  %v2329_v24 = vadd.f32 %v2328_v17, %v4750_v3  ;;  %2719 = vst.msk [vmem:[%s4818_s30 + $0x78] sm:$0xff] %vm1171_vm3, %v2687_v46  ;;  %2659 = vst.msk [vmem:[#allocation3 + $0x98] sm:$0xff] %vm1171_vm3, %v2627_v13  ;;  %v2625_v5 = vadd.f32 %v2593_v21, %v2561_v29  ;;  %v3710_v54 = vpop.f32.mrf.mxu0  ;;  %v2866_v35 = vsel %vm1171_vm3, %v2821_v9, 0.0 }
 0x201   : > { %v3676_v6 = vpop.f32.mrf.mxu1  ;;  %v2760_v33 = vadd.f32 %v2759_v14, %v2758_v57  ;;  %v2861_v52 = vadd.f32 %v2860_v56, %v2859_v20  ;;  %v2685_v31 = vld [vmem:[#allocation3 + $0x68] sm:$0xff]  ;;  %v2862_v62 = vsel %vm1171_vm3, %v2819_v30, 0.0  ;;  %v2822_v2 = vmul.f32 %v2687_v46, %v2687_v46  ;;  %v2602_v20 = vld [vmem:[#allocation3 + $0xd0] sm:$0xff] }
 0x202   : > { %v2630_v3 = vadd.f32 %v2598_v39, %v2566_v26  ;;  %v2564_v51 = vadd.f32 %v2497_v15, %v2329_v24  ;;  %2717 = vst.msk [vmem:[%s4818_s30 + $0x68] sm:$0xff] %vm1171_vm3, %v2685_v31  ;;  %v2761_v23 = vsel %vm1171_vm3, %v2685_v31, 0.0  ;;  %v2820_v10 = vmul.f32 %v2685_v31, %v2685_v31  ;;  %2657 = vst.msk [vmem:[#allocation3 + $0x88] sm:$0xff] %vm1171_vm3, %v2625_v5  ;;  %v2500_v1 = vpop.f32.mrf.mxu0 }
 0x203   : > { %v2340_v63 = vadd.f32 %v3676_v6, %v4755_v18  ;;  %v2331_v36 = vpop.f32.mrf.mxu1  ;;  %v2863_v48 = vadd.f32 %v2862_v62, %v2861_v52  ;;  %v2762_v7 = vadd.f32 %v2761_v23, %v2760_v33  ;;  %v2765_v11 = vsel %vm1171_vm3, %v2687_v46, 0.0 }
 0x204   : > { %v2690_v41 = vld [vmem:[#allocation3 + $0x90] sm:$0xff]  ;;  %2662 = vst.msk [vmem:[#allocation3 + $0xb0] sm:$0xff] %vm1171_vm3, %v2630_v3  ;;  %v2628_v42 = vadd.f32 %v2596_v16, %v2564_v51  ;;  %v2332_v60 = vadd.f32 %v2331_v36, %v4760_v12  ;;  %v2864_v53 = vsel %vm1171_vm3, %v2820_v10, 0.0  ;;  %v3713_v32 = vpop.f32.mrf.mxu0  ;;  %v2868_v17 = vsel %vm1171_vm3, %v2822_v2, 0.0 }
 0x205   : > { %2722 = vst.msk [vmem:[%s4818_s30 + $0x90] sm:$0xff] %vm1171_vm3, %v2690_v41  ;;  %v2567_v18 = vadd.f32 %v3710_v54, %v2340_v63  ;;  %v3679_v19 = vpop.f32.mrf.mxu1  ;;  %v2764_v44 = vadd.f32 %v2763_v61, %v2762_v7  ;;  %v2865_v55 = vadd.f32 %v2864_v53, %v2863_v48  ;;  %v2688_v22 = vld [vmem:[#allocation3 + $0x80] sm:$0xff]  ;;  %v2771_v31 = vsel %vm1171_vm3, %v2690_v41, 0.0  ;;  %v2603_v61 = vld [vmem:[#allocation3 + $0xd8] sm:$0xff] }
 0x206   : > { %2660 = vst.msk [vmem:[#allocation3 + $0xa0] sm:$0xff] %vm1171_vm3, %v2628_v42  ;;  %v2565_v47 = vadd.f32 %v2500_v1, %v2332_v60  ;;  %v2353_v12 = vadd.f32 %v3679_v19, %v4765_v58  ;;  %2720 = vst.msk [vmem:[%s4818_s30 + $0x80] sm:$0xff] %vm1171_vm3, %v2688_v22  ;;  %v2823_v4 = vmul.f32 %v2688_v22, %v2688_v22  ;;  %v2513_v38 = vpop.f32.mrf.mxu0  ;;  %v2767_v15 = vsel %vm1171_vm3, %v2688_v22, 0.0 }
 0x207   : > { %v2631_v25 = vadd.f32 %v2599_v37, %v2567_v18  ;;  %v2344_v27 = vpop.f32.mrf.mxu1  ;;  %v2867_v28 = vadd.f32 %v2866_v35, %v2865_v55  ;;  %v2766_v59 = vadd.f32 %v2765_v11, %v2764_v44  ;;  %v2691_v30 = vld [vmem:[#allocation3 + $0x98] sm:$0xff]  ;;  %v2825_v58 = vmul.f32 %v2690_v41, %v2690_v41  ;;  %v2601_v37 = vld [vmem:[#allocation3 + $0xc8] sm:$0xff] }
 0x208   : > { %v2629_v13 = vadd.f32 %v2597_v8, %v2565_v47  ;;  %v2570_v29 = vadd.f32 %v3713_v32, %v2353_v12  ;;  %2723 = vst.msk [vmem:[%s4818_s30 + $0x98] sm:$0xff] %vm1171_vm3, %v2691_v30  ;;  %v2345_v57 = vadd.f32 %v2344_v27, %v4770_v34  ;;  %v3714_v21 = vpop.f32.mrf.mxu0  ;;  %v2870_v5 = vsel %vm1171_vm3, %v2823_v4, 0.0 }
 0x209   : > { %2663 = vst.msk [vmem:[#allocation3 + $0xb8] sm:$0xff] %vm1171_vm3, %v2631_v25  ;;  %v3680_v46 = vpop.f32.mrf.mxu1  ;;  %v2768_v26 = vadd.f32 %v2767_v15, %v2766_v59  ;;  %v2869_v24 = vadd.f32 %v2868_v17, %v2867_v28  ;;  %v2689_v56 = vld [vmem:[#allocation3 + $0x88] sm:$0xff]  ;;  %v2826_v51 = vmul.f32 %v2691_v30, %v2691_v30  ;;  %v2874_v7 = vsel %vm1171_vm3, %v2825_v58, 0.0 }
 0x20a   : > { %2661 = vst.msk [vmem:[#allocation3 + $0xa8] sm:$0xff] %vm1171_vm3, %v2629_v13  ;;  %v2634_v9 = vadd.f32 %v2602_v20, %v2570_v29  ;;  %v2356_v14 = vadd.f32 %v3680_v46, %v4775_v40  ;;  %2721 = vst.msk [vmem:[%s4818_s30 + $0x88] sm:$0xff] %vm1171_vm3, %v2689_v56  ;;  %v2769_v39 = vsel %vm1171_vm3, %v2689_v56, 0.0  ;;  %v2824_v6 = vmul.f32 %v2689_v56, %v2689_v56  ;;  %v2516_v52 = vpop.f32.mrf.mxu0  ;;  %v2600_v40 = vld [vmem:[#allocation3 + $0xc0] sm:$0xff] }
 0x20b   : > { %v2694_v54 = vld [vmem:[#allocation3 + $0xb0] sm:$0xff]  ;;  %v2568_v34 = vadd.f32 %v2513_v38, %v2345_v57  ;;  %v2347_v33 = vpop.f32.mrf.mxu1  ;;  %v2871_v3 = vadd.f32 %v2870_v5, %v2869_v24  ;;  %v2770_v62 = vadd.f32 %v2769_v39, %v2768_v26  ;;  %v2773_v41 = vsel %vm1171_vm3, %v2691_v30, 0.0  ;;  %v2604_v26 = vld [vmem:[#allocation3 + $0xe0] sm:$0xff] }
 0x20c   : > { %2726 = vst.msk [vmem:[%s4818_s30 + $0xb0] sm:$0xff] %vm1171_vm3, %v2694_v54  ;;  %2666 = vst.msk [vmem:[#allocation3 + $0xd0] sm:$0xff] %vm1171_vm3, %v2634_v9  ;;  %v2872_v23 = vsel %vm1171_vm3, %v2824_v6, 0.0  ;;  %v2571_v63 = vadd.f32 %v3714_v21, %v2356_v14  ;;  %v2348_v36 = vadd.f32 %v2347_v33, %v4780_v43  ;;  %v3717_v48 = vpop.f32.mrf.mxu0  ;;  %v2876_v12 = vsel %vm1171_vm3, %v2826_v51, 0.0  ;;  %v2606_v21 = vld [vmem:[#allocation3 + $0xf0] sm:$0xff]  ;;  %v2607_v6 = vld [vmem:[#allocation3 + $0xf8] sm:$0xff] }
 0x20d   : > { %v2692_v10 = vld [vmem:[#allocation3 + $0xa0] sm:$0xff]  ;;  %v2632_v16 = vadd.f32 %v2600_v40, %v2568_v34  ;;  %v3683_v1 = vpop.f32.mrf.mxu1  ;;  %v2772_v42 = vadd.f32 %v2771_v31, %v2770_v62  ;;  %v2873_v60 = vadd.f32 %v2872_v23, %v2871_v3  ;;  %v2829_v35 = vmul.f32 %v2694_v54, %v2694_v54 }
 0x20e   : > { %2724 = vst.msk [vmem:[%s4818_s30 + $0xa0] sm:$0xff] %vm1171_vm3, %v2692_v10  ;;  %v2827_v2 = vmul.f32 %v2692_v10, %v2692_v10  ;;  %v2635_v53 = vadd.f32 %v2603_v61, %v2571_v63  ;;  %v2569_v18 = vadd.f32 %v2516_v52, %v2348_v36  ;;  %v2369_v19 = vadd.f32 %v3683_v1, %v4785_v49  ;;  %v2529_v32 = vpop.f32.mrf.mxu0 }
 0x20f   : > { %2664 = vst.msk [vmem:[#allocation3 + $0xc0] sm:$0xff] %vm1171_vm3, %v2632_v16  ;;  %v2360_v43 = vpop.f32.mrf.mxu1  ;;  %v2875_v44 = vadd.f32 %v2874_v7, %v2873_v60  ;;  %v2774_v55 = vadd.f32 %v2773_v41, %v2772_v42  ;;  %v2775_v11 = vsel %vm1171_vm3, %v2692_v10, 0.0  ;;  %v2779_v15 = vsel %vm1171_vm3, %v2694_v54, 0.0  ;;  %v2605_v16 = vld [vmem:[#allocation3 + $0xe8] sm:$0xff] }
 0x210   : > { %v2695_v22 = vld [vmem:[#allocation3 + $0xb8] sm:$0xff]  ;;  %v2361_v47 = vadd.f32 %v2360_v43, %v4790_v45  ;;  %2667 = vst.msk [vmem:[#allocation3 + $0xd8] sm:$0xff] %vm1171_vm3, %v2635_v53  ;;  %v2633_v49 = vadd.f32 %v2601_v37, %v2569_v18  ;;  %v2878_v28 = vsel %vm1171_vm3, %v2827_v2, 0.0  ;;  %v2574_v30 = vadd.f32 %v3717_v48, %v2369_v19  ;;  %v3718_v17 = vpop.f32.mrf.mxu0 }
 0x211   : > { %2727 = vst.msk [vmem:[%s4818_s30 + $0xb8] sm:$0xff] %vm1171_vm3, %v2695_v22  ;;  %v2693_v4 = vld [vmem:[#allocation3 + $0xa8] sm:$0xff]  ;;  %v3684_v25 = vpop.f32.mrf.mxu1  ;;  %v2776_v8 = vadd.f32 %v2775_v11, %v2774_v55  ;;  %v2877_v27 = vadd.f32 %v2876_v12, %v2875_v44  ;;  %v2830_v24 = vmul.f32 %v2695_v22, %v2695_v22  ;;  %v2882_v34 = vsel %vm1171_vm3, %v2829_v35, 0.0 }
 0x212   : > { %2725 = vst.msk [vmem:[%s4818_s30 + $0xa8] sm:$0xff] %vm1171_vm3, %v2693_v4  ;;  %v2777_v38 = vsel %vm1171_vm3, %v2693_v4, 0.0  ;;  %v2828_v45 = vmul.f32 %v2693_v4, %v2693_v4  ;;  %2665 = vst.msk [vmem:[#allocation3 + $0xc8] sm:$0xff] %vm1171_vm3, %v2633_v49  ;;  %v2572_v13 = vadd.f32 %v2529_v32, %v2361_v47  ;;  %v2372_v29 = vadd.f32 %v3684_v25, %v4795_v50  ;;  %v2532_v3 = vpop.f32.mrf.mxu0 }
 0x213   : > { %v2698_v59 = vld [vmem:[#allocation3 + $0xd0] sm:$0xff]  ;;  %v2363_v58 = vpop.f32.mrf.mxu1  ;;  %v2879_v20 = vadd.f32 %v2878_v28, %v2877_v27  ;;  %v2778_v57 = vadd.f32 %v2777_v38, %v2776_v8  ;;  %v2638_v56 = vadd.f32 %v2606_v21, %v2574_v30  ;;  %v2781_v33 = vsel %vm1171_vm3, %v2695_v22, 0.0 }
 0x214   : > { %v2880_v46 = vsel %vm1171_vm3, %v2828_v45, 0.0  ;;  %2730 = vst.msk [vmem:[%s4818_s30 + $0xd0] sm:$0xff] %vm1171_vm3, %v2698_v59  ;;  %v2636_v9 = vadd.f32 %v2604_v26, %v2572_v13  ;;  %v2575_v14 = vadd.f32 %v3718_v17, %v2372_v29  ;;  %v2364_v54 = vadd.f32 %v2363_v58, %v4800_v0 }
 0x215   : > { %v2780_v5 = vadd.f32 %v2779_v15, %v2778_v57  ;;  %v2881_v39 = vadd.f32 %v2880_v46, %v2879_v20  ;;  %2670 = vst.msk [vmem:[#allocation3 + $0xf0] sm:$0xff] %vm1171_vm3, %v2638_v56  ;;  %v2884_v0 = vsel %vm1171_vm3, %v2830_v24, 0.0  ;;  %v2833_v7 = vmul.f32 %v2698_v59, %v2698_v59 }
 0x216   : > { %v2696_v50 = vld [vmem:[#allocation3 + $0xc0] sm:$0xff]  ;;  %2668 = vst.msk [vmem:[#allocation3 + $0xe0] sm:$0xff] %vm1171_vm3, %v2636_v9  ;;  %v2639_v31 = vadd.f32 %v2607_v6, %v2575_v14  ;;  %v2573_v23 = vadd.f32 %v2532_v3, %v2364_v54  ;;  %v2787_v53 = vsel %vm1171_vm3, %v2698_v59, 0.0 }
 0x217   : > { %2728 = vst.msk [vmem:[%s4818_s30 + $0xc0] sm:$0xff] %vm1171_vm3, %v2696_v50  ;;  %v2831_v52 = vmul.f32 %v2696_v50, %v2696_v50  ;;  %v2883_v51 = vadd.f32 %v2882_v34, %v2881_v39  ;;  %v2782_v62 = vadd.f32 %v2781_v33, %v2780_v5  ;;  %v2699_v40 = vld [vmem:[#allocation3 + $0xd8] sm:$0xff]  ;;  %v2783_v10 = vsel %vm1171_vm3, %v2696_v50, 0.0 }
 0x218   : > { %2731 = vst.msk [vmem:[%s4818_s30 + $0xd8] sm:$0xff] %vm1171_vm3, %v2699_v40  ;;  %2671 = vst.msk [vmem:[#allocation3 + $0xf8] sm:$0xff] %vm1171_vm3, %v2639_v31  ;;  %v2637_v48 = vadd.f32 %v2605_v16, %v2573_v23  ;;  %v2834_v18 = vmul.f32 %v2699_v40, %v2699_v40  ;;  %v2890_v22 = vsel %vm1171_vm3, %v2833_v7, 0.0  ;;  %v2789_v37 = vsel %vm1171_vm3, %v2699_v40, 0.0 }
 0x219   : > { %v2784_v63 = vadd.f32 %v2783_v10, %v2782_v62  ;;  %v2885_v36 = vadd.f32 %v2884_v0, %v2883_v51  ;;  %v2697_v1 = vld [vmem:[#allocation3 + $0xc8] sm:$0xff]  ;;  %v2886_v41 = vsel %vm1171_vm3, %v2831_v52, 0.0 }
 0x21a   : > { %2729 = vst.msk [vmem:[%s4818_s30 + $0xc8] sm:$0xff] %vm1171_vm3, %v2697_v1  ;;  %v2785_v42 = vsel %vm1171_vm3, %v2697_v1, 0.0  ;;  %v2832_v60 = vmul.f32 %v2697_v1, %v2697_v1  ;;  %2669 = vst.msk [vmem:[#allocation3 + $0xe8] sm:$0xff] %vm1171_vm3, %v2637_v48  ;;  %v2892_v4 = vsel %vm1171_vm3, %v2834_v18, 0.0 }
 0x21b   : > { %v2887_v61 = vadd.f32 %v2886_v41, %v2885_v36  ;;  %v2786_v2 = vadd.f32 %v2785_v42, %v2784_v63 }
 0x21c   : > { %v2888_v19 = vsel %vm1171_vm3, %v2832_v60, 0.0  ;;  %v2702_v44 = vld [vmem:[#allocation3 + $0xf0] sm:$0xff] }
 0x21d   : > { %v2788_v43 = vadd.f32 %v2787_v53, %v2786_v2  ;;  %v2889_v32 = vadd.f32 %v2888_v19, %v2887_v61  ;;  %v2700_v55 = vld [vmem:[#allocation3 + $0xe0] sm:$0xff]  ;;  %2734 = vst.msk [vmem:[%s4818_s30 + $0xf0] sm:$0xff] %vm1171_vm3, %v2702_v44  ;;  %v2837_v45 = vmul.f32 %v2702_v44, %v2702_v44  ;;  %v2795_v29 = vsel %vm1171_vm3, %v2702_v44, 0.0 }
 0x21e   : > { %2732 = vst.msk [vmem:[%s4818_s30 + $0xe0] sm:$0xff] %vm1171_vm3, %v2700_v55  ;;  %v2835_v47 = vmul.f32 %v2700_v55, %v2700_v55  ;;  %v2791_v49 = vsel %vm1171_vm3, %v2700_v55, 0.0 }
 0x21f   : > { %v2891_v12 = vadd.f32 %v2890_v22, %v2889_v32  ;;  %v2790_v35 = vadd.f32 %v2789_v37, %v2788_v43  ;;  %v2703_v11 = vld [vmem:[#allocation3 + $0xf8] sm:$0xff]  ;;  %v2898_v57 = vsel %vm1171_vm3, %v2837_v45, 0.0 }
 0x220   : > { %2735 = vst.msk [vmem:[%s4818_s30 + $0xf8] sm:$0xff] %vm1171_vm3, %v2703_v11  ;;  %v2894_v27 = vsel %vm1171_vm3, %v2835_v47, 0.0  ;;  %v2838_v17 = vmul.f32 %v2703_v11, %v2703_v11  ;;  %v2797_v46 = vsel %vm1171_vm3, %v2703_v11, 0.0 }
 0x221   : > { %v2792_v25 = vadd.f32 %v2791_v49, %v2790_v35  ;;  %v2893_v8 = vadd.f32 %v2892_v4, %v2891_v12  ;;  %v2701_v38 = vld [vmem:[#allocation3 + $0xe8] sm:$0xff] }
 0x222   : > { %2733 = vst.msk [vmem:[%s4818_s30 + $0xe8] sm:$0xff] %vm1171_vm3, %v2701_v38  ;;  %v2793_v59 = vsel %vm1171_vm3, %v2701_v38, 0.0  ;;  %v2836_v30 = vmul.f32 %v2701_v38, %v2701_v38  ;;  %v2900_v24 = vsel %vm1171_vm3, %v2838_v17, 0.0 }
 0x223   : > { %v2895_v28 = vadd.f32 %v2894_v27, %v2893_v8  ;;  %v2794_v13 = vadd.f32 %v2793_v59, %v2792_v25 }
 0x224   : > { %v2896_v58 = vsel %vm1171_vm3, %v2836_v30, 0.0 }
 0x225   : > { %v2796_v15 = vadd.f32 %v2795_v29, %v2794_v13  ;;  %v2897_v20 = vadd.f32 %v2896_v58, %v2895_v28 }
 0x227   : > { %v2798_v21 = vadd.f32 %v2797_v46, %v2796_v15  ;;  %v2899_v26 = vadd.f32 %v2898_v57, %v2897_v20 }
 0x229   : > { %v2799_v56 = vrot.slane %v2798_v21, 4  ;;  %v2901_v9 = vadd.f32 %v2900_v24, %v2899_v26 }
 0x22b   : > { %v2800_v14 = vadd.f32 %v2799_v56, %v2798_v21  ;;  %v2902_v5 = vrot.slane %v2901_v9, 4 }
 0x22d   : > { %v2801_v39 = vrot.slane %v2800_v14, 2  ;;  %v2903_v50 = vadd.f32 %v2902_v5, %v2901_v9 }
 0x22f   : > { %v2802_v6 = vadd.f32 %v2801_v39, %v2800_v14  ;;  %v2904_v54 = vrot.slane %v2903_v50, 2 }
 0x231   : > { %v2803_v34 = vrot.slane %v2802_v6, 1  ;;  %v2905_v33 = vadd.f32 %v2904_v54, %v2903_v50 }
 0x233   : > { %v2804_v52 = vadd.f32 %v2803_v34, %v2802_v6  ;;  %v2906_v31 = vrot.slane %v2905_v33, 1 }
 0x235   : > { %2806 = vst.msk [vmem:[%s265_s9] sm:$0x1] %vm2805_vm4, %v2804_v52  ;;  %v2907_v3 = vadd.f32 %v2906_v31, %v2905_v33 }
 0x237   : > { %2908 = vst.msk [vmem:[%s268_s12] sm:$0x1] %vm2805_vm4, %v2907_v3 }
 0x238 PF: > { %s17_s21 = sadd.s32 1, %s3746_s21  }
 0x239   : > { %p14_p4 = scmp.ge.s32.totalorder %s17_s21, 4  }
 0x23b   :  { %16 = sbr.rel (!%p14_p4) target bundleno = 1 (0x1), region = 99 }

// kernel: up_forward.3
= control target key start
LH: loop header
LB: loop body
LE: loop exit
PB: predicated region body
PF: predicated region fallthrough
CT: control target
= control target key end

     0   :  { %s3865_s21 = smov 0   ;;  %s5036_s0 = inlined_call_operand.vmem [shape: bf16[2,16,16,8], index: 0, kind: input, shape index: {}]   ;;  %s5037_s1 = inlined_call_operand.vmem [shape: bf16[9,8,4], index: 1, kind: input, shape index: {}]   ;;  %s5038_s2 = inlined_call_operand.vmem [shape: f32[1,8], index: 2, kind: input, shape index: {}]   ;;  %s5039_s3 = inlined_call_operand.vmem [shape: f32[1,8], index: 3, kind: input, shape index: {}]   ;;  %s5040_s4 = inlined_call_operand.vmem [shape: bf16[2,16,16,4], index: 4, kind: output, shape index: {0}]   ;;  %s5041_s5 = inlined_call_operand.vmem [shape: f32[2,1,4], index: 5, kind: output, shape index: {1}]   ;;  %s5042_s6 = inlined_call_operand.vmem [shape: f32[2,1,4], index: 6, kind: output, shape index: {2}]  }
   0x1 LB: > { %s3033_s2 = sadd.s32 4294967295, %s3827_s21   ;;  %p3037_p0 = scmp.ge.s32.totalorder %s3827_s21, 1  ;;  %s3827_s21 = sphi %s3865_s21, %s17_s21  }
   0x2   : > { %p217_p1 = scmp.lt.s32.totalorder %s3827_s21, 3 }
   0x4   : > { %p218_p2 = pnand %p3037_p0, %p217_p1 }
   0x6   : > { %221 = sbr.rel (%p218_p2) target bundleno = 574 (0x23e), region = 36 }
   0xb   : > { %v3042_v0 = vld [vmem:[%s5037_s1 + $0xc] sm:$0xf]  ;;  %vm528_vm0 = vcmask 1043456   ;;  %p3878_p3 = scmp.lt.s32.totalorder %s3033_s2, 1  ;;  %vm334_vm1 = vcmask 64512   ;;  %vm337_vm2 = vcmask 58368  }
   0xc   : > { %3803 = vmatprep.subr.msk.bf16.mxu1 %vm528_vm0, %v3042_v0  ;;  %3802 = vmatprep.subr.msk.bf16.mxu0 %vm528_vm0, %v3042_v0  ;;  %v530_v1 = vsel %vm528_vm0, %v3042_v0, 0  ;;  %v3829_v2 = vmov 0.0   ;;  %v3924_v3 = vld [vmem:[%s5037_s1] sm:$0xf]  ;;  %v3929_v4 = vld [vmem:[%s5037_s1 + $0x18] sm:$0xf] }
   0xd   : > { %339 = vst.msk [vmem:[#allocation2 + $0x18] sm:$0xff] %vm334_vm1, %v3829_v2  ;;  %340 = vst.msk [vmem:[#allocation2 + $0x20] sm:$0xff] %vm334_vm1, %v3829_v2  ;;  %3801 = vmatpush3.bf16.msra.mxu1 %v530_v1  ;;  %3495 = vmatpush3.bf16.msra.mxu0 %v530_v1  ;;  %s5073_s2 = smov (!%p3878_p3, %s3033_s2), 1  ;;  %v866_v0 = vsel %vm528_vm0, %v3929_v4, 0  ;;  %vm1061_vm3 = vcmask 31744   ;;  %vm2722_vm4 = vcmask 27648  }
   0xe   : > { %335 = vst.msk [vmem:[#allocation2] sm:$0xff] %vm334_vm1, %v3829_v2  ;;  %336 = vst.msk [vmem:[#allocation2 + $0x8] sm:$0xff] %vm334_vm1, %v3829_v2  ;;  %3804 = vmatprep.subr.msk.bf16.mxu1 %vm528_vm0, %v3924_v3  ;;  %3805 = vmatprep.subr.msk.bf16.mxu0 %vm528_vm0, %v3929_v4  ;;  %s3228_s28 = sshll.u32 %s5073_s2, 7  ;;  %s265_s25 = scalar_lea.vmem %s5041_s5, %s5073_s2  ;;  %vm2824_vm5 = vcmask 24576  }
   0xf   : > { %342 = vst.msk [vmem:[#allocation2 + $0x30] sm:$0xff] %vm334_vm1, %v3829_v2  ;;  %343 = vst.msk [vmem:[#allocation2 + $0x38] sm:$0xff] %vm334_vm1, %v3829_v2  ;;  %s3965_s7 = scalar_lea.vmem %s5036_s0, %s3228_s28  ;;  %s4829_s22 = scalar_lea.vmem %s5040_s4, %s3228_s28 }
  0x10   : > { %345 = vst.msk [vmem:[#allocation2 + $0x48] sm:$0xff] %vm334_vm1, %v3829_v2  ;;  %346 = vst.msk [vmem:[#allocation2 + $0x50] sm:$0xff] %vm334_vm1, %v3829_v2  ;;  %v3263_v5 = vld [vmem:[%s3965_s7] sm:$0xff]   ;;  %v3326_v7 = vld [vmem:[%s3965_s7 + $0x8] sm:$0xff]   ;;  %s268_s28 = scalar_lea.vmem %s5042_s6, %s5073_s2 }
  0x11   : > { %348 = vst.msk [vmem:[#allocation2 + $0x60] sm:$0xff] %vm334_vm1, %v3829_v2  ;;  %349 = vst.msk [vmem:[#allocation2 + $0x68] sm:$0xff] %vm334_vm1, %v3829_v2  ;;  %v3333_v6 = vld [vmem:[%s3965_s7 + $0x40] sm:$0xff]   ;;  %v3264_v8 = vunpack.c.l.bf16 %v3263_v5  ;;  %v3265_v9 = vunpack.c.h.bf16 %v3263_v5  ;;  %v3334_v12 = vld [vmem:[%s3965_s7 + $0x48] sm:$0xff]   ;;  %v3268_v15 = vunpack.c.l.bf16 %v3326_v7  ;;  %v3269_v16 = vunpack.c.h.bf16 %v3326_v7 }
  0x12   : > { %351 = vst.msk [vmem:[#allocation2 + $0x78] sm:$0xff] %vm334_vm1, %v3829_v2  ;;  %352 = vst.msk [vmem:[#allocation2 + $0x80] sm:$0xff] %vm334_vm1, %v3829_v2  ;;  %v3296_v10 = vunpack.c.l.bf16 %v3333_v6  ;;  %v3297_v11 = vunpack.c.h.bf16 %v3333_v6  ;;  %v3327_v13 = vld [vmem:[%s3965_s7 + $0x10] sm:$0xff]   ;;  %v3300_v17 = vunpack.c.l.bf16 %v3334_v12  ;;  %v3301_v18 = vunpack.c.h.bf16 %v3334_v12  ;;  %v3328_v19 = vld [vmem:[%s3965_s7 + $0x18] sm:$0xff]  }
  0x13   : > { %354 = vst.msk [vmem:[#allocation2 + $0x90] sm:$0xff] %vm334_vm1, %v3829_v2  ;;  %355 = vst.msk [vmem:[#allocation2 + $0x98] sm:$0xff] %vm334_vm1, %v3829_v2  ;;  %v3335_v14 = vld [vmem:[%s3965_s7 + $0x50] sm:$0xff]   ;;  %v3336_v20 = vld [vmem:[%s3965_s7 + $0x58] sm:$0xff]   ;;  %v3272_v22 = vunpack.c.l.bf16 %v3327_v13  ;;  %v3273_v23 = vunpack.c.h.bf16 %v3327_v13  ;;  %v3276_v29 = vunpack.c.l.bf16 %v3328_v19  ;;  %v3277_v30 = vunpack.c.h.bf16 %v3328_v19 }
  0x14   : > { %357 = vst.msk [vmem:[#allocation2 + $0xa8] sm:$0xff] %vm334_vm1, %v3829_v2  ;;  %358 = vst.msk [vmem:[#allocation2 + $0xb0] sm:$0xff] %vm334_vm1, %v3829_v2  ;;  %v3329_v21 = vld [vmem:[%s3965_s7 + $0x20] sm:$0xff]   ;;  %v3304_v24 = vunpack.c.l.bf16 %v3335_v14  ;;  %v3305_v25 = vunpack.c.h.bf16 %v3335_v14  ;;  %v3330_v27 = vld [vmem:[%s3965_s7 + $0x28] sm:$0xff]   ;;  %v3308_v31 = vunpack.c.l.bf16 %v3336_v20  ;;  %v3309_v32 = vunpack.c.h.bf16 %v3336_v20 }
  0x15   : > { %360 = vst.msk [vmem:[#allocation2 + $0xc0] sm:$0xff] %vm334_vm1, %v3829_v2  ;;  %361 = vst.msk [vmem:[#allocation2 + $0xc8] sm:$0xff] %vm334_vm1, %v3829_v2  ;;  %v3337_v26 = vld [vmem:[%s3965_s7 + $0x60] sm:$0xff]   ;;  %v3338_v28 = vld [vmem:[%s3965_s7 + $0x68] sm:$0xff]   ;;  %v3280_v35 = vunpack.c.l.bf16 %v3329_v21  ;;  %v3281_v36 = vunpack.c.h.bf16 %v3329_v21  ;;  %v3284_v41 = vunpack.c.l.bf16 %v3330_v27  ;;  %v3285_v42 = vunpack.c.h.bf16 %v3330_v27 }
  0x16   : > { %363 = vst.msk [vmem:[#allocation2 + $0xd8] sm:$0xff] %vm334_vm1, %v3829_v2  ;;  %364 = vst.msk [vmem:[#allocation2 + $0xe0] sm:$0xff] %vm334_vm1, %v3829_v2  ;;  %v3331_v33 = vld [vmem:[%s3965_s7 + $0x30] sm:$0xff]   ;;  %v3312_v37 = vunpack.c.l.bf16 %v3337_v26  ;;  %v3313_v38 = vunpack.c.h.bf16 %v3337_v26  ;;  %v3332_v39 = vld [vmem:[%s3965_s7 + $0x38] sm:$0xff]   ;;  %v3316_v43 = vunpack.c.l.bf16 %v3338_v28  ;;  %v3317_v44 = vunpack.c.h.bf16 %v3338_v28 }
  0x17   : > { %366 = vst.msk [vmem:[#allocation2 + $0xf0] sm:$0xff] %vm334_vm1, %v3829_v2  ;;  %367 = vst.msk [vmem:[#allocation2 + $0xf8] sm:$0xff] %vm334_vm1, %v3829_v2  ;;  %v3339_v34 = vld [vmem:[%s3965_s7 + $0x70] sm:$0xff]   ;;  %v3340_v40 = vld [vmem:[%s3965_s7 + $0x78] sm:$0xff]   ;;  %v3288_v45 = vunpack.c.l.bf16 %v3331_v33  ;;  %v3289_v46 = vunpack.c.h.bf16 %v3331_v33  ;;  %v3292_v49 = vunpack.c.l.bf16 %v3332_v39  ;;  %v3293_v50 = vunpack.c.h.bf16 %v3332_v39 }
  0x18   : > { %369 = vst.msk [vmem:[#allocation2 + $0x108] sm:$0xff] %vm334_vm1, %v3829_v2  ;;  %370 = vst.msk [vmem:[#allocation2 + $0x110] sm:$0xff] %vm334_vm1, %v3829_v2  ;;  %v3320_v47 = vunpack.c.l.bf16 %v3339_v34  ;;  %v3321_v48 = vunpack.c.h.bf16 %v3339_v34  ;;  %v3324_v51 = vunpack.c.l.bf16 %v3340_v40  ;;  %v3325_v52 = vunpack.c.h.bf16 %v3340_v40  ;;  %v423_v39 = vld [vmem:[#allocation2] sm:$0xff]  ;;  %v424_v40 = vld [vmem:[#allocation2 + $0x8] sm:$0xff] }
  0x19   : > { %372 = vst.msk [vmem:[#allocation2 + $0x120] sm:$0xff] %vm334_vm1, %v3829_v2  ;;  %373 = vst.msk [vmem:[#allocation2 + $0x128] sm:$0xff] %vm334_vm1, %v3829_v2  ;;  %v697_v5 = vsel %vm528_vm0, %v3924_v3, 0  ;;  %v3092_v3 = vld [vmem:[%s5037_s1 + $0x4] sm:$0xf] }
  0x1a   : > { %375 = vst.msk [vmem:[#allocation2 + $0x138] sm:$0xff] %vm334_vm1, %v3829_v2  ;;  %376 = vst.msk [vmem:[#allocation2 + $0x140] sm:$0xff] %vm334_vm1, %v3829_v2 }
  0x1b   : > { %378 = vst.msk [vmem:[#allocation2 + $0x150] sm:$0xff] %vm334_vm1, %v3829_v2  ;;  %379 = vst.msk [vmem:[#allocation2 + $0x158] sm:$0xff] %vm334_vm1, %v3829_v2 }
  0x1c   : > { %381 = vst.msk [vmem:[#allocation2 + $0x168] sm:$0xff] %vm334_vm1, %v3829_v2  ;;  %382 = vst.msk [vmem:[#allocation2 + $0x170] sm:$0xff] %vm334_vm1, %v3829_v2 }
  0x1d   : > { %384 = vst.msk [vmem:[#allocation2 + $0x180] sm:$0xff] %vm334_vm1, %v3829_v2  ;;  %385 = vst.msk [vmem:[#allocation2 + $0x188] sm:$0xff] %vm334_vm1, %v3829_v2 }
  0x1e   : > { %387 = vst.msk [vmem:[#allocation2 + $0x198] sm:$0xff] %vm334_vm1, %v3829_v2  ;;  %388 = vst.msk [vmem:[#allocation2 + $0x1a0] sm:$0xff] %vm334_vm1, %v3829_v2 }
  0x1f   : > { %341 = vst.msk [vmem:[#allocation2 + $0x28] sm:$0x3] %vm337_vm2, %v3829_v2  ;;  %338 = vst.msk [vmem:[#allocation2 + $0x10] sm:$0x3] %vm337_vm2, %v3829_v2 }
  0x20   : > { %344 = vst.msk [vmem:[#allocation2 + $0x40] sm:$0x3] %vm337_vm2, %v3829_v2  ;;  %347 = vst.msk [vmem:[#allocation2 + $0x58] sm:$0x3] %vm337_vm2, %v3829_v2 }
  0x21   : > { %350 = vst.msk [vmem:[#allocation2 + $0x70] sm:$0x3] %vm337_vm2, %v3829_v2  ;;  %353 = vst.msk [vmem:[#allocation2 + $0x88] sm:$0x3] %vm337_vm2, %v3829_v2 }
  0x22   : > { %356 = vst.msk [vmem:[#allocation2 + $0xa0] sm:$0x3] %vm337_vm2, %v3829_v2  ;;  %359 = vst.msk [vmem:[#allocation2 + $0xb8] sm:$0x3] %vm337_vm2, %v3829_v2 }
  0x23   : > { %362 = vst.msk [vmem:[#allocation2 + $0xd0] sm:$0x3] %vm337_vm2, %v3829_v2  ;;  %365 = vst.msk [vmem:[#allocation2 + $0xe8] sm:$0x3] %vm337_vm2, %v3829_v2 }
  0x24   : > { %368 = vst.msk [vmem:[#allocation2 + $0x100] sm:$0x3] %vm337_vm2, %v3829_v2  ;;  %371 = vst.msk [vmem:[#allocation2 + $0x118] sm:$0x3] %vm337_vm2, %v3829_v2 }
  0x25   : > { %374 = vst.msk [vmem:[#allocation2 + $0x130] sm:$0x3] %vm337_vm2, %v3829_v2  ;;  %377 = vst.msk [vmem:[#allocation2 + $0x148] sm:$0x3] %vm337_vm2, %v3829_v2 }
  0x26   : > { %380 = vst.msk [vmem:[#allocation2 + $0x160] sm:$0x3] %vm337_vm2, %v3829_v2  ;;  %383 = vst.msk [vmem:[#allocation2 + $0x178] sm:$0x3] %vm337_vm2, %v3829_v2 }
  0x27   : > { %386 = vst.msk [vmem:[#allocation2 + $0x190] sm:$0x3] %vm337_vm2, %v3829_v2  ;;  %389 = vst.msk [vmem:[#allocation2 + $0x1a8] sm:$0x3] %vm337_vm2, %v3829_v2 }
  0x28   : > { %391 = vst.msk [vmem:[#allocation2 + $0x19] sm:$0xff] %vm334_vm1, %v3264_v8  ;;  %392 = vst.msk [vmem:[#allocation2 + $0x21] sm:$0xff] %vm334_vm1, %v3265_v9 }
  0x29   : > { %407 = vst.msk [vmem:[#allocation2 + $0xd9] sm:$0xff] %vm334_vm1, %v3296_v10  ;;  %408 = vst.msk [vmem:[#allocation2 + $0xe1] sm:$0xff] %vm334_vm1, %v3297_v11  ;;  %v3093_v10 = vld [vmem:[%s5037_s1 + $0x10] sm:$0xf] }
  0x2a   : > { %393 = vst.msk [vmem:[#allocation2 + $0x31] sm:$0xff] %vm334_vm1, %v3268_v15  ;;  %394 = vst.msk [vmem:[#allocation2 + $0x39] sm:$0xff] %vm334_vm1, %v3269_v16 }
  0x2b   : > { %409 = vst.msk [vmem:[#allocation2 + $0xf1] sm:$0xff] %vm334_vm1, %v3300_v17  ;;  %410 = vst.msk [vmem:[#allocation2 + $0xf9] sm:$0xff] %vm334_vm1, %v3301_v18 }
  0x2c   : > { %395 = vst.msk [vmem:[#allocation2 + $0x49] sm:$0xff] %vm334_vm1, %v3272_v22  ;;  %396 = vst.msk [vmem:[#allocation2 + $0x51] sm:$0xff] %vm334_vm1, %v3273_v23 }
  0x2d   : > { %411 = vst.msk [vmem:[#allocation2 + $0x109] sm:$0xff] %vm334_vm1, %v3304_v24  ;;  %412 = vst.msk [vmem:[#allocation2 + $0x111] sm:$0xff] %vm334_vm1, %v3305_v25 }
  0x2e   : > { %397 = vst.msk [vmem:[#allocation2 + $0x61] sm:$0xff] %vm334_vm1, %v3276_v29  ;;  %398 = vst.msk [vmem:[#allocation2 + $0x69] sm:$0xff] %vm334_vm1, %v3277_v30 }
  0x2f   : > { %413 = vst.msk [vmem:[#allocation2 + $0x121] sm:$0xff] %vm334_vm1, %v3308_v31  ;;  %414 = vst.msk [vmem:[#allocation2 + $0x129] sm:$0xff] %vm334_vm1, %v3309_v32  ;;  %v425_v53 = vld [vmem:[#allocation2 + $0x18] sm:$0xff]  ;;  %v426_v54 = vld [vmem:[#allocation2 + $0x20] sm:$0xff] }
  0x30   : > { %399 = vst.msk [vmem:[#allocation2 + $0x79] sm:$0xff] %vm334_vm1, %v3280_v35  ;;  %400 = vst.msk [vmem:[#allocation2 + $0x81] sm:$0xff] %vm334_vm1, %v3281_v36  ;;  %v441_v55 = vld [vmem:[#allocation2 + $0xd8] sm:$0xff]  ;;  %v4015_v56 = vpack.c.bf16 %v426_v54, %v425_v53  ;;  %v442_v57 = vld [vmem:[#allocation2 + $0xe0] sm:$0xff] }
  0x31   : > { %415 = vst.msk [vmem:[#allocation2 + $0x139] sm:$0xff] %vm334_vm1, %v3312_v37  ;;  %416 = vst.msk [vmem:[#allocation2 + $0x141] sm:$0xff] %vm334_vm1, %v3313_v38  ;;  %v427_v58 = vld [vmem:[#allocation2 + $0x30] sm:$0xff]  ;;  %v428_v59 = vld [vmem:[#allocation2 + $0x38] sm:$0xff]  ;;  %v4017_v60 = vpack.c.bf16 %v442_v57, %v441_v55 }
  0x32   : > { %401 = vst.msk [vmem:[#allocation2 + $0x91] sm:$0xff] %vm334_vm1, %v3284_v41  ;;  %402 = vst.msk [vmem:[#allocation2 + $0x99] sm:$0xff] %vm334_vm1, %v3285_v42  ;;  %v4019_v61 = vpack.c.bf16 %v428_v59, %v427_v58  ;;  %v443_v62 = vld [vmem:[#allocation2 + $0xf0] sm:$0xff]  ;;  %v444_v63 = vld [vmem:[#allocation2 + $0xf8] sm:$0xff]  ;;  %3496 = vmatprep.mubr.msk.bf16.mxu0 %vm334_vm1, %v4015_v56 }
  0x33   : > { %417 = vst.msk [vmem:[#allocation2 + $0x151] sm:$0xff] %vm334_vm1, %v3316_v43  ;;  %418 = vst.msk [vmem:[#allocation2 + $0x159] sm:$0xff] %vm334_vm1, %v3317_v44  ;;  %v429_v1 = vld [vmem:[#allocation2 + $0x48] sm:$0xff]  ;;  %v4025_v2 = vpack.c.bf16 %v444_v63, %v443_v62  ;;  %v430_v6 = vld [vmem:[#allocation2 + $0x50] sm:$0xff]  ;;  %3512 = vmatprep.mubr.msk.bf16.mxu1 %vm334_vm1, %v4017_v60  ;;  %v459_v43 = vpack.c.bf16 %v424_v40, %v423_v39  ;;  %v1368_v44 = vsel %vm528_vm0, %v3092_v3, 0 }
  0x34   : > { %403 = vst.msk [vmem:[#allocation2 + $0xa9] sm:$0xff] %vm334_vm1, %v3288_v45  ;;  %404 = vst.msk [vmem:[#allocation2 + $0xb1] sm:$0xff] %vm334_vm1, %v3289_v46  ;;  %v445_v7 = vld [vmem:[#allocation2 + $0x108] sm:$0xff]  ;;  %v446_v8 = vld [vmem:[#allocation2 + $0x110] sm:$0xff]  ;;  %3497 = vmatmul.mubr.msk.bf16.vlgmr.msra.gmra.mxu0 %vm334_vm1, %v4019_v61  ;;  %v4033_v9 = vpack.c.bf16 %v430_v6, %v429_v1  ;;  %v1201_v45 = vsel %vm528_vm0, %v3093_v10, 0 }
  0x35   : > { %419 = vst.msk [vmem:[#allocation2 + $0x169] sm:$0xff] %vm334_vm1, %v3320_v47  ;;  %420 = vst.msk [vmem:[#allocation2 + $0x171] sm:$0xff] %vm334_vm1, %v3321_v48  ;;  %v4035_v4 = vpack.c.bf16 %v446_v8, %v445_v7  ;;  %3513 = vmatmul.mubr.msk.bf16.vlgmr.msra.gmra.mxu1 %vm334_vm1, %v4025_v2  ;;  %3563 = vmatpush3.bf16.msra.mxu0 %v866_v0  ;;  %v431_v11 = vld [vmem:[#allocation2 + $0x60] sm:$0xff]  ;;  %v432_v12 = vld [vmem:[#allocation2 + $0x68] sm:$0xff] }
  0x36   : > { %405 = vst.msk [vmem:[#allocation2 + $0xc1] sm:$0xff] %vm334_vm1, %v3292_v49  ;;  %406 = vst.msk [vmem:[#allocation2 + $0xc9] sm:$0xff] %vm334_vm1, %v3293_v50  ;;  %v447_v13 = vld [vmem:[#allocation2 + $0x120] sm:$0xff]  ;;  %3529 = vmatpush3.bf16.msra.mxu1 %v697_v5  ;;  %3500 = vmatprep.mubr.msk.bf16.mxu0 %vm334_vm1, %v4033_v9  ;;  %v448_v14 = vld [vmem:[#allocation2 + $0x128] sm:$0xff]  ;;  %v463_v19 = vpack.c.bf16 %v432_v12, %v431_v11 }
  0x37   : > { %421 = vst.msk [vmem:[#allocation2 + $0x181] sm:$0xff] %vm334_vm1, %v3324_v51  ;;  %422 = vst.msk [vmem:[#allocation2 + $0x189] sm:$0xff] %vm334_vm1, %v3325_v52  ;;  %v433_v15 = vld [vmem:[#allocation2 + $0x78] sm:$0xff]  ;;  %v434_v16 = vld [vmem:[#allocation2 + $0x80] sm:$0xff]  ;;  %3516 = vmatprep.mubr.msk.bf16.mxu1 %vm334_vm1, %v4035_v4  ;;  %3806 = vmatprep.subr.msk.bf16.mxu1 %vm528_vm0, %v3093_v10  ;;  %v4051_v20 = vpack.c.bf16 %v448_v14, %v447_v13 }
  0x38   : > { %v449_v17 = vld [vmem:[#allocation2 + $0x138] sm:$0xff]  ;;  %v450_v18 = vld [vmem:[#allocation2 + $0x140] sm:$0xff]  ;;  %3807 = vmatprep.subr.msk.bf16.mxu0 %vm528_vm0, %v3092_v3  ;;  %v464_v21 = vpack.c.bf16 %v434_v16, %v433_v15  ;;  %v3144_v47 = vld [vmem:[%s5037_s1 + $0x14] sm:$0xf] }
  0x39   : > { %v4053_v22 = vpack.c.bf16 %v450_v18, %v449_v17  ;;  %v435_v23 = vld [vmem:[#allocation2 + $0x90] sm:$0xff]  ;;  %v436_v24 = vld [vmem:[#allocation2 + $0x98] sm:$0xff]  ;;  %v458_v49 = vld [vmem:[#allocation2 + $0x1a0] sm:$0xff]  ;;  %v1935_v62 = vsel %vm528_vm0, %v3144_v47, 0 }
  0x3a   : > { %v451_v25 = vld [vmem:[#allocation2 + $0x150] sm:$0xff]  ;;  %v452_v26 = vld [vmem:[#allocation2 + $0x158] sm:$0xff]  ;;  %v465_v31 = vpack.c.bf16 %v436_v24, %v435_v23  ;;  %v1094_v50 = vld [vmem:[#allocation2 + $0x1] sm:$0xff] }
  0x3b   : > { %v437_v27 = vld [vmem:[#allocation2 + $0xa8] sm:$0xff]  ;;  %v438_v28 = vld [vmem:[#allocation2 + $0xb0] sm:$0xff]  ;;  %v473_v32 = vpack.c.bf16 %v452_v26, %v451_v25  ;;  %v3126_v46 = vld [vmem:[%s5037_s1 + $0x1c] sm:$0xf] }
  0x3c   : > { %3501 = vmatmul.mubr.msk.bf16.gmra.mxu0 %vm334_vm1, %v463_v19  ;;  %v453_v29 = vld [vmem:[#allocation2 + $0x168] sm:$0xff]  ;;  %v454_v30 = vld [vmem:[#allocation2 + $0x170] sm:$0xff]  ;;  %v466_v33 = vpack.c.bf16 %v438_v28, %v437_v27  ;;  %v457_v48 = vld [vmem:[#allocation2 + $0x198] sm:$0xff]  ;;  %v1537_v0 = vsel %vm528_vm0, %v3126_v46, 0 }
  0x3d   : > { %3517 = vmatmul.mubr.msk.bf16.gmra.mxu1 %vm334_vm1, %v4051_v20  ;;  %3504 = vmatprep.mubr.msk.bf16.mxu0 %vm334_vm1, %v464_v21  ;;  %v4061_v34 = vpack.c.bf16 %v454_v30, %v453_v29  ;;  %v439_v35 = vld [vmem:[#allocation2 + $0xc0] sm:$0xff]  ;;  %v440_v36 = vld [vmem:[#allocation2 + $0xc8] sm:$0xff]  ;;  %v476_v54 = vpack.c.bf16 %v458_v49, %v457_v48  ;;  %v1098_v57 = vld [vmem:[#allocation2 + $0x31] sm:$0xff] }
  0x3e   : > { %3520 = vmatprep.mubr.msk.bf16.mxu1 %vm334_vm1, %v4053_v22  ;;  %v455_v37 = vld [vmem:[#allocation2 + $0x180] sm:$0xff]  ;;  %v456_v38 = vld [vmem:[#allocation2 + $0x188] sm:$0xff]  ;;  %v467_v41 = vpack.c.bf16 %v440_v36, %v439_v35  ;;  %v1106_v10 = vld [vmem:[#allocation2 + $0x91] sm:$0xff] }
  0x3f   : > { %v475_v42 = vpack.c.bf16 %v456_v38, %v455_v37  ;;  %v1095_v51 = vld [vmem:[#allocation2 + $0x9] sm:$0xff]  ;;  %v1096_v52 = vld [vmem:[#allocation2 + $0x19] sm:$0xff]  ;;  %v1097_v53 = vld [vmem:[#allocation2 + $0x21] sm:$0xff] }
  0x40   : > { %v1130_v55 = vpack.c.bf16 %v1095_v51, %v1094_v50  ;;  %v1099_v58 = vld [vmem:[#allocation2 + $0x39] sm:$0xff]  ;;  %v1100_v59 = vld [vmem:[#allocation2 + $0x49] sm:$0xff]  ;;  %v1102_v5 = vld [vmem:[#allocation2 + $0x61] sm:$0xff] }
  0x41   : > { %v4141_v1 = vld [vmem:[%s5037_s1 + $0x8] sm:$0xf]  ;;  %v1104_v7 = vld [vmem:[#allocation2 + $0x79] sm:$0xff]  ;;  %v1109_v12 = vld [vmem:[#allocation2 + $0xb1] sm:$0xff] }
  0x42   : > { %v1103_v6 = vld [vmem:[#allocation2 + $0x69] sm:$0xff]  ;;  %v1105_v8 = vld [vmem:[#allocation2 + $0x81] sm:$0xff]  ;;  %v1107_v3 = vld [vmem:[#allocation2 + $0x99] sm:$0xff]  ;;  %v2102_v51 = vsel %vm528_vm0, %v4141_v1, 0 }
  0x43   : > { %v1108_v11 = vld [vmem:[#allocation2 + $0xa9] sm:$0xff]  ;;  %v4170_v13 = vpack.c.bf16 %v1107_v3, %v1106_v10  ;;  %v1110_v15 = vld [vmem:[#allocation2 + $0xc1] sm:$0xff]  ;;  %v1112_v17 = vld [vmem:[#allocation2 + $0xd9] sm:$0xff] }
  0x44   : > { %3505 = vmatmul.mubr.msk.bf16.gmra.mxu0 %vm334_vm1, %v465_v31  ;;  %v4172_v14 = vpack.c.bf16 %v1109_v12, %v1108_v11  ;;  %v1111_v16 = vld [vmem:[#allocation2 + $0xc9] sm:$0xff]  ;;  %v1113_v18 = vld [vmem:[#allocation2 + $0xe1] sm:$0xff]  ;;  %v1117_v24 = vld [vmem:[#allocation2 + $0x111] sm:$0xff] }
  0x45   : > { %3521 = vmatmul.mubr.msk.bf16.gmra.mxu1 %vm334_vm1, %v473_v32  ;;  %3508 = vmatprep.mubr.msk.bf16.mxu0 %vm334_vm1, %v466_v33  ;;  %v1116_v23 = vld [vmem:[#allocation2 + $0x109] sm:$0xff]  ;;  %v1118_v27 = vld [vmem:[#allocation2 + $0x121] sm:$0xff]  ;;  %v1120_v29 = vld [vmem:[#allocation2 + $0x139] sm:$0xff] }
  0x46   : > { %3524 = vmatprep.mubr.msk.bf16.mxu1 %vm334_vm1, %v4061_v34  ;;  %v4196_v26 = vpack.c.bf16 %v1117_v24, %v1116_v23  ;;  %v1119_v28 = vld [vmem:[#allocation2 + $0x129] sm:$0xff]  ;;  %v1121_v30 = vld [vmem:[#allocation2 + $0x141] sm:$0xff]  ;;  %v1125_v36 = vld [vmem:[#allocation2 + $0x171] sm:$0xff] }
  0x47   : > { %v1124_v35 = vld [vmem:[#allocation2 + $0x169] sm:$0xff]  ;;  %v1126_v39 = vld [vmem:[#allocation2 + $0x181] sm:$0xff]  ;;  %v1835_v49 = vld [vmem:[#allocation2 + $0x52] sm:$0xff] }
  0x48   : > { %v4220_v38 = vpack.c.bf16 %v1125_v36, %v1124_v35  ;;  %v1127_v40 = vld [vmem:[#allocation2 + $0x189] sm:$0xff]  ;;  %v1851_v3 = vld [vmem:[#allocation2 + $0x112] sm:$0xff] }
  0x49   : > { %v1834_v48 = vld [vmem:[#allocation2 + $0x4a] sm:$0xff] }
  0x4a   : > { %v1850_v10 = vld [vmem:[#allocation2 + $0x10a] sm:$0xff] }
  0x4b   : > { %v4296_v12 = vpack.c.bf16 %v1851_v3, %v1850_v10 }
  0x4c   : > { %3509 = vmatmul.mubr.msk.bf16.gmra.mxu0 %vm334_vm1, %v467_v41 }
  0x4d   : > { %3525 = vmatmul.mubr.msk.bf16.gmra.mxu1 %vm334_vm1, %v475_v42  ;;  %3564 = vmatprep.mubr.msk.bf16.mxu0 %vm334_vm1, %v4019_v61 }
  0x4e   : > { %3530 = vmatprep.mubr.msk.bf16.mxu1 %vm334_vm1, %v459_v43  ;;  %v4230_v43 = vpack.c.bf16 %v1127_v40, %v1126_v39 }
  0x54   : > { %3565 = vmatmul.mubr.msk.bf16.vlgmr.msra.gmra.mxu0 %vm334_vm1, %v4033_v9 }
  0x55   : > { %3531 = vmatmul.mubr.msk.bf16.vlgmr.msra.gmra.mxu1 %vm334_vm1, %v4015_v56  ;;  %3631 = vmatpush3.bf16.msra.mxu0 %v1368_v44  ;;  %v1131_v56 = vpack.c.bf16 %v1097_v53, %v1096_v52  ;;  %v4248_v52 = vpack.c.bf16 %v1835_v49, %v1834_v48  ;;  %v1836_v53 = vld [vmem:[#allocation2 + $0x62] sm:$0xff]  ;;  %v1861_v48 = vld [vmem:[#allocation2 + $0x18a] sm:$0xff] }
  0x56   : > { %3597 = vmatpush3.bf16.msra.mxu1 %v1201_v45  ;;  %3534 = vmatprep.mubr.msk.bf16.mxu1 %vm334_vm1, %v4019_v61  ;;  %v4131_v61 = vpack.c.bf16 %v1099_v58, %v1098_v57  ;;  %v1832_v45 = vld [vmem:[#allocation2 + $0x32] sm:$0xff] }
  0x57   : > { %3568 = vmatprep.mubr.msk.bf16.mxu0 %vm334_vm1, %v463_v19  ;;  %3808 = vmatprep.subr.msk.bf16.mxu1 %vm528_vm0, %v3126_v46  ;;  %v1833_v46 = vld [vmem:[#allocation2 + $0x3a] sm:$0xff] }
  0x58   : > { %3809 = vmatprep.subr.msk.bf16.mxu0 %vm528_vm0, %v3144_v47  ;;  %v4242_v47 = vpack.c.bf16 %v1833_v46, %v1832_v45  ;;  %v1860_v46 = vld [vmem:[#allocation2 + $0x182] sm:$0xff] }
  0x5c   : > { %3569 = vmatmul.mubr.msk.bf16.gmra.mxu0 %vm334_vm1, %v464_v21 }
  0x5d   : > { %3535 = vmatmul.mubr.msk.bf16.gmra.mxu1 %vm334_vm1, %v4033_v9  ;;  %3572 = vmatprep.mubr.msk.bf16.mxu0 %vm334_vm1, %v465_v31  ;;  %v4158_v9 = vpack.c.bf16 %v1103_v6, %v1102_v5  ;;  %v1846_v5 = vld [vmem:[#allocation2 + $0xda] sm:$0xff]  ;;  %v1847_v6 = vld [vmem:[#allocation2 + $0xe2] sm:$0xff] }
  0x5e   : > { %3538 = vmatprep.mubr.msk.bf16.mxu1 %vm334_vm1, %v463_v19  ;;  %v4182_v19 = vpack.c.bf16 %v1111_v16, %v1110_v15  ;;  %v1852_v15 = vld [vmem:[#allocation2 + $0x122] sm:$0xff]  ;;  %v1853_v16 = vld [vmem:[#allocation2 + $0x12a] sm:$0xff] }
  0x64   : > { %3573 = vmatmul.mubr.msk.bf16.gmra.mxu0 %vm334_vm1, %v466_v33 }
  0x65   : > { %3539 = vmatmul.mubr.msk.bf16.gmra.mxu1 %vm334_vm1, %v464_v21  ;;  %3576 = vmatprep.mubr.msk.bf16.mxu0 %vm334_vm1, %v467_v41  ;;  %v1114_v21 = vld [vmem:[#allocation2 + $0xf1] sm:$0xff] }
  0x66   : > { %3542 = vmatprep.mubr.msk.bf16.mxu1 %vm334_vm1, %v465_v31  ;;  %v4206_v31 = vpack.c.bf16 %v1119_v28, %v1118_v27 }
  0x6c   : > { %3577 = vmatmul.mubr.msk.bf16.gmra.mxu0 %vm334_vm1, %v4017_v60 }
  0x6d   : > { %3543 = vmatmul.mubr.msk.bf16.gmra.mxu1 %vm334_vm1, %v466_v33  ;;  %3580 = vmatprep.mubr.msk.bf16.mxu0 %vm334_vm1, %v4025_v2  ;;  %v1122_v33 = vld [vmem:[#allocation2 + $0x151] sm:$0xff] }
  0x6e   : > { %3546 = vmatprep.mubr.msk.bf16.mxu1 %vm334_vm1, %v467_v41  ;;  %v1830_v41 = vld [vmem:[#allocation2 + $0x1a] sm:$0xff] }
  0x74   : > { %3581 = vmatmul.mubr.msk.bf16.gmra.mxu0 %vm334_vm1, %v4035_v4 }
  0x75   : > { %3547 = vmatmul.mubr.msk.bf16.gmra.mxu1 %vm334_vm1, %v4017_v60  ;;  %3584 = vmatprep.mubr.msk.bf16.mxu0 %vm334_vm1, %v4051_v20  ;;  %v1101_v60 = vld [vmem:[#allocation2 + $0x51] sm:$0xff] }
  0x76   : > { %3550 = vmatprep.mubr.msk.bf16.mxu1 %vm334_vm1, %v4025_v2  ;;  %v4134_v63 = vpack.c.bf16 %v1101_v60, %v1100_v59  ;;  %v4148_v2 = vld [vmem:[%s5037_s1 + $0x20] sm:$0xf]  ;;  %v1840_v59 = vld [vmem:[#allocation2 + $0x92] sm:$0xff] }
  0x77   : > { %v2271_v50 = vsel %vm528_vm0, %v4148_v2, 0  ;;  %v1841_v60 = vld [vmem:[#allocation2 + $0x9a] sm:$0xff] }
  0x7c   : > { %3585 = vmatmul.mubr.msk.bf16.gmra.mxu0 %vm334_vm1, %v4053_v22 }
  0x7d   : > { %3551 = vmatmul.mubr.msk.bf16.gmra.mxu1 %vm334_vm1, %v4035_v4  ;;  %3588 = vmatprep.mubr.msk.bf16.mxu0 %vm334_vm1, %v473_v32  ;;  %v4160_v4 = vpack.c.bf16 %v1105_v8, %v1104_v7  ;;  %v4284_v8 = vpack.c.bf16 %v1847_v6, %v1846_v5 }
  0x7e   : > { %3554 = vmatprep.mubr.msk.bf16.mxu1 %vm334_vm1, %v4051_v20  ;;  %v4184_v20 = vpack.c.bf16 %v1113_v18, %v1112_v17  ;;  %v1854_v18 = vld [vmem:[#allocation2 + $0x13a] sm:$0xff] }
  0x84   : > { %3589 = vmatmul.mubr.msk.bf16.gmra.mxu0 %vm334_vm1, %v4061_v34 }
  0x85   : > { %3555 = vmatmul.mubr.msk.bf16.gmra.mxu1 %vm334_vm1, %v4053_v22  ;;  %3592 = vmatprep.mubr.msk.bf16.mxu0 %vm334_vm1, %v475_v42  ;;  %v1115_v22 = vld [vmem:[#allocation2 + $0xf9] sm:$0xff]  ;;  %v1831_v42 = vld [vmem:[#allocation2 + $0x22] sm:$0xff] }
  0x86   : > { %3558 = vmatprep.mubr.msk.bf16.mxu1 %vm334_vm1, %v473_v32  ;;  %v4194_v25 = vpack.c.bf16 %v1115_v22, %v1114_v21  ;;  %v4208_v32 = vpack.c.bf16 %v1121_v30, %v1120_v29  ;;  %v4232_v44 = vpack.c.bf16 %v1831_v42, %v1830_v41  ;;  %v4316_v22 = vpack.c.bf16 %v1853_v16, %v1852_v15  ;;  %v1856_v29 = vld [vmem:[#allocation2 + $0x152] sm:$0xff]  ;;  %v1857_v30 = vld [vmem:[#allocation2 + $0x15a] sm:$0xff] }
  0x87   : > { %v4344_v39 = vpack.c.bf16 %v1857_v30, %v1856_v29 }
  0x8c   : > { %3593 = vmatmul.mubr.msk.bf16.gmra.mxu0 %vm334_vm1, %v476_v54  ;;  %v1837_v54 = vld [vmem:[#allocation2 + $0x6a] sm:$0xff] }
  0x8d   : > { %3559 = vmatmul.mubr.msk.bf16.gmra.mxu1 %vm334_vm1, %v4061_v34  ;;  %3632 = vmatprep.mubr.msk.bf16.mxu0 %vm334_vm1, %v1130_v55  ;;  %v1123_v34 = vld [vmem:[#allocation2 + $0x159] sm:$0xff]  ;;  %v4258_v57 = vpack.c.bf16 %v1837_v54, %v1836_v53  ;;  %v1828_v54 = vld [vmem:[#allocation2 + $0x2] sm:$0xff] }
  0x8e   : > { %3598 = vmatprep.mubr.msk.bf16.mxu1 %vm334_vm1, %v1131_v56  ;;  %v4218_v37 = vpack.c.bf16 %v1123_v34, %v1122_v33  ;;  %v1838_v55 = vld [vmem:[#allocation2 + $0x7a] sm:$0xff]  ;;  %v1858_v33 = vld [vmem:[#allocation2 + $0x16a] sm:$0xff]  ;;  %v1859_v34 = vld [vmem:[#allocation2 + $0x172] sm:$0xff] }
  0x94   : > { %3633 = vmatmul.mubr.msk.bf16.vlgmr.msra.gmra.mxu0 %vm334_vm1, %v1131_v56  ;;  %v1839_v56 = vld [vmem:[#allocation2 + $0x82] sm:$0xff] }
  0x95   : > { %3599 = vmatmul.mubr.msk.bf16.vlgmr.msra.gmra.mxu1 %vm334_vm1, %v4131_v61  ;;  %3699 = vmatpush3.bf16.msra.mxu0 %v1935_v62  ;;  %v4260_v58 = vpack.c.bf16 %v1839_v56, %v1838_v55  ;;  %v1843_v62 = vld [vmem:[#allocation2 + $0xb2] sm:$0xff]  ;;  %v1829_v55 = vld [vmem:[#allocation2 + $0xa] sm:$0xff] }
  0x96   : > { %3665 = vmatpush3.bf16.msra.mxu1 %v1537_v0  ;;  %3602 = vmatprep.mubr.msk.bf16.mxu1 %vm334_vm1, %v4134_v63 }
  0x97   : > { %3636 = vmatprep.mubr.msk.bf16.mxu0 %vm334_vm1, %v4131_v61  ;;  %3810 = vmatprep.subr.msk.bf16.mxu1 %vm528_vm0, %v4141_v1  ;;  %v1844_v1 = vld [vmem:[#allocation2 + $0xc2] sm:$0xff] }
  0x98   : > { %3811 = vmatprep.subr.msk.bf16.mxu0 %vm528_vm0, %v4148_v2  ;;  %v1845_v2 = vld [vmem:[#allocation2 + $0xca] sm:$0xff] }
  0x99   : > { %v4282_v7 = vpack.c.bf16 %v1845_v2, %v1844_v1 }
  0x9c   : > { %3637 = vmatmul.mubr.msk.bf16.gmra.mxu0 %vm334_vm1, %v4134_v63 }
  0x9d   : > { %3603 = vmatmul.mubr.msk.bf16.gmra.mxu1 %vm334_vm1, %v4158_v9  ;;  %3640 = vmatprep.mubr.msk.bf16.mxu0 %vm334_vm1, %v4158_v9 }
  0x9e   : > { %3606 = vmatprep.mubr.msk.bf16.mxu1 %vm334_vm1, %v4160_v4 }
  0xa4   : > { %3641 = vmatmul.mubr.msk.bf16.gmra.mxu0 %vm334_vm1, %v4160_v4 }
  0xa5   : > { %3607 = vmatmul.mubr.msk.bf16.gmra.mxu1 %vm334_vm1, %v4170_v13  ;;  %3644 = vmatprep.mubr.msk.bf16.mxu0 %vm334_vm1, %v4170_v13 }
  0xa6   : > { %3610 = vmatprep.mubr.msk.bf16.mxu1 %vm334_vm1, %v4172_v14 }
  0xac   : > { %3645 = vmatmul.mubr.msk.bf16.gmra.mxu0 %vm334_vm1, %v4172_v14 }
  0xad   : > { %3611 = vmatmul.mubr.msk.bf16.gmra.mxu1 %vm334_vm1, %v4182_v19  ;;  %3648 = vmatprep.mubr.msk.bf16.mxu0 %vm334_vm1, %v4182_v19 }
  0xae   : > { %3614 = vmatprep.mubr.msk.bf16.mxu1 %vm334_vm1, %v4184_v20 }
  0xb4   : > { %3649 = vmatmul.mubr.msk.bf16.gmra.mxu0 %vm334_vm1, %v4184_v20 }
  0xb5   : > { %3615 = vmatmul.mubr.msk.bf16.gmra.mxu1 %vm334_vm1, %v4194_v25  ;;  %3652 = vmatprep.mubr.msk.bf16.mxu0 %vm334_vm1, %v4194_v25 }
  0xb6   : > { %3618 = vmatprep.mubr.msk.bf16.mxu1 %vm334_vm1, %v4196_v26 }
  0xbc   : > { %3653 = vmatmul.mubr.msk.bf16.gmra.mxu0 %vm334_vm1, %v4196_v26 }
  0xbd   : > { %3619 = vmatmul.mubr.msk.bf16.gmra.mxu1 %vm334_vm1, %v4206_v31  ;;  %3656 = vmatprep.mubr.msk.bf16.mxu0 %vm334_vm1, %v4206_v31 }
  0xbe   : > { %3622 = vmatprep.mubr.msk.bf16.mxu1 %vm334_vm1, %v4208_v32 }
  0xc4   : > { %3657 = vmatmul.mubr.msk.bf16.gmra.mxu0 %vm334_vm1, %v4208_v32 }
  0xc5   : > { %3623 = vmatmul.mubr.msk.bf16.gmra.mxu1 %vm334_vm1, %v4218_v37  ;;  %3660 = vmatprep.mubr.msk.bf16.mxu0 %vm334_vm1, %v4218_v37 }
  0xc6   : > { %3626 = vmatprep.mubr.msk.bf16.mxu1 %vm334_vm1, %v4220_v38 }
  0xcc   : > { %3661 = vmatmul.mubr.msk.bf16.gmra.mxu0 %vm334_vm1, %v4220_v38 }
  0xcd   : > { %3627 = vmatmul.mubr.msk.bf16.gmra.mxu1 %vm334_vm1, %v4230_v43  ;;  %3700 = vmatprep.mubr.msk.bf16.mxu0 %vm334_vm1, %v4232_v44 }
  0xce   : > { %3666 = vmatprep.mubr.msk.bf16.mxu1 %vm334_vm1, %v4131_v61  ;;  %v1842_v61 = vld [vmem:[#allocation2 + $0xaa] sm:$0xff] }
  0xcf   : > { %v4272_v0 = vpack.c.bf16 %v1843_v62, %v1842_v61  ;;  %v1864_v62 = vpack.c.bf16 %v1829_v55, %v1828_v54 }
  0xd4   : > { %3701 = vmatmul.mubr.msk.bf16.vlgmr.msra.gmra.mxu0 %vm334_vm1, %v4242_v47 }
  0xd5   : > { %3667 = vmatmul.mubr.msk.bf16.vlgmr.msra.gmra.mxu1 %vm334_vm1, %v4134_v63  ;;  %3767 = vmatpush3.bf16.msra.mxu0 %v2271_v50  ;;  %v4270_v63 = vpack.c.bf16 %v1841_v60, %v1840_v59  ;;  %v1128_v50 = vld [vmem:[#allocation2 + $0x199] sm:$0xff]  ;;  %v4372_v59 = vpack.c.bf16 %v1861_v48, %v1860_v46 }
  0xd6   : > { %3733 = vmatpush3.bf16.msra.mxu1 %v2102_v51  ;;  %3670 = vmatprep.mubr.msk.bf16.mxu1 %vm334_vm1, %v4158_v9  ;;  %v1848_v9 = vld [vmem:[#allocation2 + $0xf2] sm:$0xff]  ;;  %v1129_v51 = vld [vmem:[#allocation2 + $0x1a1] sm:$0xff] }
  0xd7   : > { %3704 = vmatprep.mubr.msk.bf16.mxu0 %vm334_vm1, %v4248_v52  ;;  %v1147_v60 = vpack.c.bf16 %v1129_v51, %v1128_v50 }
  0xdc   : > { %3705 = vmatmul.mubr.msk.bf16.gmra.mxu0 %vm334_vm1, %v4258_v57 }
  0xdd   : > { %3671 = vmatmul.mubr.msk.bf16.gmra.mxu1 %vm334_vm1, %v4160_v4  ;;  %3708 = vmatprep.mubr.msk.bf16.mxu0 %vm334_vm1, %v4260_v58  ;;  %v1849_v4 = vld [vmem:[#allocation2 + $0xfa] sm:$0xff] }
  0xde   : > { %3674 = vmatprep.mubr.msk.bf16.mxu1 %vm334_vm1, %v4170_v13  ;;  %v4294_v11 = vpack.c.bf16 %v1849_v4, %v1848_v9 }
  0xe4   : > { %3709 = vmatmul.mubr.msk.bf16.gmra.mxu0 %vm334_vm1, %v4270_v63 }
  0xe5   : > { %3675 = vmatmul.mubr.msk.bf16.gmra.mxu1 %vm334_vm1, %v4172_v14  ;;  %3712 = vmatprep.mubr.msk.bf16.mxu0 %vm334_vm1, %v4272_v0 }
  0xe6   : > { %3678 = vmatprep.mubr.msk.bf16.mxu1 %vm334_vm1, %v4182_v19  ;;  %v1855_v19 = vld [vmem:[#allocation2 + $0x142] sm:$0xff] }
  0xe7   : > { %v4320_v24 = vpack.c.bf16 %v1855_v19, %v1854_v18 }
  0xec   : > { %3713 = vmatmul.mubr.msk.bf16.gmra.mxu0 %vm334_vm1, %v4282_v7 }
  0xed   : > { %3679 = vmatmul.mubr.msk.bf16.gmra.mxu1 %vm334_vm1, %v4184_v20  ;;  %3716 = vmatprep.mubr.msk.bf16.mxu0 %vm334_vm1, %v4284_v8 }
  0xee   : > { %3682 = vmatprep.mubr.msk.bf16.mxu1 %vm334_vm1, %v4194_v25 }
  0xf4   : > { %v4298_v13 = vpop.f32.mrf.mxu0  ;;  %3717 = vmatmul.mubr.msk.bf16.gmra.mxu0 %vm334_vm1, %v4294_v11 }
  0xf5   : > { %v4302_v14 = vpop.f32.mrf.mxu1  ;;  %3683 = vmatmul.mubr.msk.bf16.gmra.mxu1 %vm334_vm1, %v4196_v26  ;;  %3720 = vmatprep.mubr.msk.bf16.mxu0 %vm334_vm1, %v4296_v12 }
  0xf6   : > { %v4308_v17 = vpop.f32.mrf.mxu0  ;;  %3686 = vmatprep.mubr.msk.bf16.mxu1 %vm334_vm1, %v4206_v31 }
  0xf7   : > { %v4312_v20 = vpop.f32.mrf.mxu1 }
  0xf8   : > { %v4314_v21 = vpop.f32.mrf.mxu0 }
  0xf9   : > { %v4318_v23 = vpop.f32.mrf.mxu1 }
  0xfa   : > { %v4322_v25 = vpop.f32.mrf.mxu0 }
  0xfb   : > { %v4324_v26 = vpop.f32.mrf.mxu1 }
  0xfc   : > { %v4326_v27 = vpop.f32.mrf.mxu0  ;;  %3721 = vmatmul.mubr.msk.bf16.gmra.mxu0 %vm334_vm1, %v4316_v22 }
  0xfd   : > { %v4330_v28 = vpop.f32.mrf.mxu1  ;;  %3687 = vmatmul.mubr.msk.bf16.gmra.mxu1 %vm334_vm1, %v4208_v32  ;;  %3724 = vmatprep.mubr.msk.bf16.mxu0 %vm334_vm1, %v4320_v24  ;;  %v4348_v32 = vpack.c.bf16 %v1859_v34, %v1858_v33 }
  0xfe   : > { %v4336_v31 = vpop.f32.mrf.mxu0  ;;  %3690 = vmatprep.mubr.msk.bf16.mxu1 %vm334_vm1, %v4218_v37 }
  0xff   : > { %v4340_v35 = vpop.f32.mrf.mxu1 }
 0x100   : > { %v4342_v36 = vpop.f32.mrf.mxu0 }
 0x101   : > { %v4346_v40 = vpop.f32.mrf.mxu1 }
 0x102   : > { %v4350_v41 = vpop.f32.mrf.mxu0 }
 0x103   : > { %v4352_v42 = vpop.f32.mrf.mxu1 }
 0x104   : > { %v4354_v45 = vpop.f32.mrf.mxu0  ;;  %3725 = vmatmul.mubr.msk.bf16.gmra.mxu0 %vm334_vm1, %v4344_v39 }
 0x105   : > { %v4358_v37 = vpop.f32.mrf.mxu1  ;;  %3691 = vmatmul.mubr.msk.bf16.gmra.mxu1 %vm334_vm1, %v4220_v38  ;;  %3728 = vmatprep.mubr.msk.bf16.mxu0 %vm334_vm1, %v4348_v32 }
 0x106   : > { %v4364_v49 = vpop.f32.mrf.mxu0  ;;  %3694 = vmatprep.mubr.msk.bf16.mxu1 %vm334_vm1, %v4230_v43 }
 0x107   : > { %v4368_v53 = vpop.f32.mrf.mxu1 }
 0x108   : > { %v4370_v56 = vpop.f32.mrf.mxu0 }
 0x109   : > { %v4374_v38 = vpop.f32.mrf.mxu1 }
 0x10a   : > { %v4376_v61 = vpop.f32.mrf.mxu0 }
 0x10b   : > { %v4378_v1 = vpop.f32.mrf.mxu1 }
 0x10c   : > { %v4380_v2 = vpop.f32.mrf.mxu0  ;;  %3729 = vmatmul.mubr.msk.bf16.gmra.mxu0 %vm334_vm1, %v4372_v59 }
 0x10d   : > { %v4384_v43 = vpop.f32.mrf.mxu1  ;;  %3695 = vmatmul.mubr.msk.bf16.gmra.mxu1 %vm334_vm1, %v1147_v60  ;;  %3768 = vmatprep.mubr.msk.bf16.mxu0 %vm334_vm1, %v4242_v47 }
 0x10e   : > { %v4389_v5 = vpop.f32.mrf.mxu0  ;;  %3734 = vmatprep.mubr.msk.bf16.mxu1 %vm334_vm1, %v1864_v62 }
 0x10f   : > { %v4392_v6 = vpop.f32.mrf.mxu1 }
 0x110   : > { %v4394_v9 = vpop.f32.mrf.mxu0 }
 0x111   : > { %v4396_v4 = vpop.f32.mrf.mxu1 }
 0x112   : > { %v4398_v10 = vpop.f32.mrf.mxu0 }
 0x113   : > { %v4400_v3 = vpop.f32.mrf.mxu1 }
 0x114   : > { %v3566_v15 = vpop.f32.mrf.mxu0  ;;  %3769 = vmatmul.mubr.msk.bf16.vlgmr.msra.gmra.mxu0 %vm334_vm1, %v4248_v52 }
 0x115   : > { %v3532_v16 = vpop.f32.mrf.mxu1  ;;  %3735 = vmatmul.mubr.msk.bf16.vlgmr.msra.gmra.mxu1 %vm334_vm1, %v4232_v44  ;;  %3772 = vmatprep.mubr.msk.bf16.mxu0 %vm334_vm1, %v4258_v57 }
 0x116   : > { %v742_v18 = vadd.f32 %v3532_v16, %v4298_v13  ;;  %v902_v19 = vpop.f32.mrf.mxu0  ;;  %3738 = vmatprep.mubr.msk.bf16.mxu1 %vm334_vm1, %v4242_v47 }
 0x117   : > { %v733_v29 = vpop.f32.mrf.mxu1 }
 0x118   : > { %v1031_v30 = vadd.f32 %v3566_v15, %v742_v18  ;;  %v734_v33 = vadd.f32 %v733_v29, %v4308_v17  ;;  %v3567_v34 = vpop.f32.mrf.mxu0 }
 0x119   : > { %v3533_v46 = vpop.f32.mrf.mxu1 }
 0x11a   : > { %1064 = vst.msk [vmem:[#allocation3 + $0x10] sm:$0xff] %vm1061_vm3, %v1031_v30  ;;  %v1029_v48 = vadd.f32 %v902_v19, %v734_v33  ;;  %v745_v44 = vadd.f32 %v3533_v46, %v4314_v21  ;;  %v905_v50 = vpop.f32.mrf.mxu0 }
 0x11b   : > { %v736_v51 = vpop.f32.mrf.mxu1 }
 0x11c   : > { %1062 = vst.msk [vmem:[#allocation3] sm:$0xff] %vm1061_vm3, %v1029_v48  ;;  %v1032_v13 = vadd.f32 %v3567_v34, %v745_v44  ;;  %v737_v54 = vadd.f32 %v736_v51, %v4322_v25  ;;  %v3570_v47 = vpop.f32.mrf.mxu0  ;;  %3773 = vmatmul.mubr.msk.bf16.gmra.mxu0 %vm334_vm1, %v4260_v58 }
 0x11d   : > { %v3536_v55 = vpop.f32.mrf.mxu1  ;;  %3739 = vmatmul.mubr.msk.bf16.gmra.mxu1 %vm334_vm1, %v4248_v52  ;;  %3776 = vmatprep.mubr.msk.bf16.mxu0 %vm334_vm1, %v4270_v63 }
 0x11e   : > { %1065 = vst.msk [vmem:[#allocation3 + $0x18] sm:$0xff] %vm1061_vm3, %v1032_v13  ;;  %v1030_v17 = vadd.f32 %v905_v50, %v737_v54  ;;  %v758_v21 = vadd.f32 %v3536_v55, %v4326_v27  ;;  %v918_v60 = vpop.f32.mrf.mxu0  ;;  %3742 = vmatprep.mubr.msk.bf16.mxu1 %vm334_vm1, %v4258_v57 }
 0x11f   : > { %v749_v25 = vpop.f32.mrf.mxu1 }
 0x120   : > { %1063 = vst.msk [vmem:[#allocation3 + $0x8] sm:$0xff] %vm1061_vm3, %v1030_v17  ;;  %v1035_v62 = vadd.f32 %v3570_v47, %v758_v21  ;;  %v750_v15 = vadd.f32 %v749_v25, %v4336_v31  ;;  %v3571_v16 = vpop.f32.mrf.mxu0 }
 0x121   : > { %v3537_v52 = vpop.f32.mrf.mxu1 }
 0x122   : > { %1068 = vst.msk [vmem:[#allocation3 + $0x30] sm:$0xff] %vm1061_vm3, %v1035_v62  ;;  %v1033_v18 = vadd.f32 %v918_v60, %v750_v15  ;;  %v761_v19 = vadd.f32 %v3537_v52, %v4342_v36  ;;  %v921_v29 = vpop.f32.mrf.mxu0 }
 0x123   : > { %v752_v30 = vpop.f32.mrf.mxu1 }
 0x124   : > { %1066 = vst.msk [vmem:[#allocation3 + $0x20] sm:$0xff] %vm1061_vm3, %v1033_v18  ;;  %v1036_v27 = vadd.f32 %v3571_v16, %v761_v19  ;;  %v753_v57 = vadd.f32 %v752_v30, %v4350_v41  ;;  %v3574_v33 = vpop.f32.mrf.mxu0  ;;  %3777 = vmatmul.mubr.msk.bf16.gmra.mxu0 %vm334_vm1, %v4272_v0 }
 0x125   : > { %v3540_v34 = vpop.f32.mrf.mxu1  ;;  %3743 = vmatmul.mubr.msk.bf16.gmra.mxu1 %vm334_vm1, %v4260_v58  ;;  %3780 = vmatprep.mubr.msk.bf16.mxu0 %vm334_vm1, %v4282_v7 }
 0x126   : > { %1069 = vst.msk [vmem:[#allocation3 + $0x38] sm:$0xff] %vm1061_vm3, %v1036_v27  ;;  %v1034_v31 = vadd.f32 %v921_v29, %v753_v57  ;;  %v774_v36 = vadd.f32 %v3540_v34, %v4354_v45  ;;  %v934_v46 = vpop.f32.mrf.mxu0  ;;  %3746 = vmatprep.mubr.msk.bf16.mxu1 %vm334_vm1, %v4270_v63 }
 0x127   : > { %v765_v41 = vpop.f32.mrf.mxu1 }
 0x128   : > { %1067 = vst.msk [vmem:[#allocation3 + $0x28] sm:$0xff] %vm1061_vm3, %v1034_v31  ;;  %v1039_v48 = vadd.f32 %v3574_v33, %v774_v36  ;;  %v766_v44 = vadd.f32 %v765_v41, %v4364_v49  ;;  %v3575_v50 = vpop.f32.mrf.mxu0 }
 0x129   : > { %v3541_v58 = vpop.f32.mrf.mxu1 }
 0x12a   : > { %1072 = vst.msk [vmem:[#allocation3 + $0x50] sm:$0xff] %vm1061_vm3, %v1039_v48  ;;  %v1037_v51 = vadd.f32 %v934_v46, %v766_v44  ;;  %v777_v13 = vadd.f32 %v3541_v58, %v4370_v56  ;;  %v937_v54 = vpop.f32.mrf.mxu0 }
 0x12b   : > { %v768_v47 = vpop.f32.mrf.mxu1 }
 0x12c   : > { %1070 = vst.msk [vmem:[#allocation3 + $0x40] sm:$0xff] %vm1061_vm3, %v1037_v51  ;;  %v1040_v45 = vadd.f32 %v3575_v50, %v777_v13  ;;  %v769_v63 = vadd.f32 %v768_v47, %v4376_v61  ;;  %v3578_v55 = vpop.f32.mrf.mxu0  ;;  %3781 = vmatmul.mubr.msk.bf16.gmra.mxu0 %vm334_vm1, %v4284_v8 }
 0x12d   : > { %v3544_v17 = vpop.f32.mrf.mxu1  ;;  %3747 = vmatmul.mubr.msk.bf16.gmra.mxu1 %vm334_vm1, %v4272_v0  ;;  %3784 = vmatprep.mubr.msk.bf16.mxu0 %vm334_vm1, %v4294_v11 }
 0x12e   : > { %1073 = vst.msk [vmem:[#allocation3 + $0x58] sm:$0xff] %vm1061_vm3, %v1040_v45  ;;  %v1038_v49 = vadd.f32 %v937_v54, %v769_v63  ;;  %v790_v56 = vadd.f32 %v3544_v17, %v4380_v2  ;;  %v950_v21 = vpop.f32.mrf.mxu0  ;;  %3750 = vmatprep.mubr.msk.bf16.mxu1 %vm334_vm1, %v4282_v7 }
 0x12f   : > { %v781_v61 = vpop.f32.mrf.mxu1 }
 0x130   : > { %1071 = vst.msk [vmem:[#allocation3 + $0x48] sm:$0xff] %vm1061_vm3, %v1038_v49  ;;  %v1043_v60 = vadd.f32 %v3578_v55, %v790_v56  ;;  %v782_v25 = vadd.f32 %v781_v61, %v4389_v5  ;;  %v3579_v62 = vpop.f32.mrf.mxu0 }
 0x131   : > { %v3545_v0 = vpop.f32.mrf.mxu1 }
 0x132   : > { %1076 = vst.msk [vmem:[#allocation3 + $0x70] sm:$0xff] %vm1061_vm3, %v1043_v60  ;;  %v1041_v15 = vadd.f32 %v950_v21, %v782_v25  ;;  %v793_v16 = vadd.f32 %v3545_v0, %v4394_v9  ;;  %v953_v52 = vpop.f32.mrf.mxu0 }
 0x133   : > { %v784_v18 = vpop.f32.mrf.mxu1 }
 0x134   : > { %1074 = vst.msk [vmem:[#allocation3 + $0x60] sm:$0xff] %vm1061_vm3, %v1041_v15  ;;  %v1044_v2 = vadd.f32 %v3579_v62, %v793_v16  ;;  %v785_v7 = vadd.f32 %v784_v18, %v4398_v10  ;;  %v3582_v19 = vpop.f32.mrf.mxu0  ;;  %3785 = vmatmul.mubr.msk.bf16.gmra.mxu0 %vm334_vm1, %v4296_v12 }
 0x135   : > { %v3548_v29 = vpop.f32.mrf.mxu1  ;;  %3751 = vmatmul.mubr.msk.bf16.gmra.mxu1 %vm334_vm1, %v4284_v8  ;;  %3788 = vmatprep.mubr.msk.bf16.mxu0 %vm334_vm1, %v4316_v22 }
 0x136   : > { %1077 = vst.msk [vmem:[#allocation3 + $0x78] sm:$0xff] %vm1061_vm3, %v1044_v2  ;;  %v1042_v5 = vadd.f32 %v953_v52, %v785_v7  ;;  %v806_v9 = vadd.f32 %v3548_v29, %v4302_v14  ;;  %v966_v30 = vpop.f32.mrf.mxu0  ;;  %3754 = vmatprep.mubr.msk.bf16.mxu1 %vm334_vm1, %v4294_v11 }
 0x137   : > { %v797_v10 = vpop.f32.mrf.mxu1 }
 0x138   : > { %1075 = vst.msk [vmem:[#allocation3 + $0x68] sm:$0xff] %vm1061_vm3, %v1042_v5  ;;  %v1047_v27 = vadd.f32 %v3582_v19, %v806_v9  ;;  %v798_v57 = vadd.f32 %v797_v10, %v4312_v20  ;;  %v3583_v33 = vpop.f32.mrf.mxu0 }
 0x139   : > { %v3549_v8 = vpop.f32.mrf.mxu1 }
 0x13a   : > { %1080 = vst.msk [vmem:[#allocation3 + $0x90] sm:$0xff] %vm1061_vm3, %v1047_v27  ;;  %v1045_v34 = vadd.f32 %v966_v30, %v798_v57  ;;  %v809_v31 = vadd.f32 %v3549_v8, %v4318_v23  ;;  %v969_v36 = vpop.f32.mrf.mxu0 }
 0x13b   : > { %v800_v46 = vpop.f32.mrf.mxu1 }
 0x13c   : > { %1078 = vst.msk [vmem:[#allocation3 + $0x80] sm:$0xff] %vm1061_vm3, %v1045_v34  ;;  %v1048_v14 = vadd.f32 %v3583_v33, %v809_v31  ;;  %v801_v11 = vadd.f32 %v800_v46, %v4324_v26  ;;  %v3586_v41 = vpop.f32.mrf.mxu0  ;;  %3789 = vmatmul.mubr.msk.bf16.gmra.mxu0 %vm334_vm1, %v4320_v24 }
 0x13d   : > { %v3552_v48 = vpop.f32.mrf.mxu1  ;;  %3755 = vmatmul.mubr.msk.bf16.gmra.mxu1 %vm334_vm1, %v4296_v12  ;;  %3792 = vmatprep.mubr.msk.bf16.mxu0 %vm334_vm1, %v4344_v39 }
 0x13e   : > { %1081 = vst.msk [vmem:[#allocation3 + $0x98] sm:$0xff] %vm1061_vm3, %v1048_v14  ;;  %v1046_v20 = vadd.f32 %v969_v36, %v801_v11  ;;  %v822_v23 = vadd.f32 %v3552_v48, %v4330_v28  ;;  %v982_v44 = vpop.f32.mrf.mxu0  ;;  %3758 = vmatprep.mubr.msk.bf16.mxu1 %vm334_vm1, %v4316_v22 }
 0x13f   : > { %v813_v26 = vpop.f32.mrf.mxu1 }
 0x140   : > { %1079 = vst.msk [vmem:[#allocation3 + $0x88] sm:$0xff] %vm1061_vm3, %v1046_v20  ;;  %v1051_v50 = vadd.f32 %v3586_v41, %v822_v23  ;;  %v814_v58 = vadd.f32 %v813_v26, %v4340_v35  ;;  %v3587_v51 = vpop.f32.mrf.mxu0  ;;  %v1862_v35 = vld [vmem:[#allocation2 + $0x19a] sm:$0xff] }
 0x141   : > { %v3553_v12 = vpop.f32.mrf.mxu1 }
 0x142   : > { %1084 = vst.msk [vmem:[#allocation3 + $0xb0] sm:$0xff] %vm1061_vm3, %v1051_v50  ;;  %v1049_v13 = vadd.f32 %v982_v44, %v814_v58  ;;  %v825_v54 = vadd.f32 %v3553_v12, %v4346_v40  ;;  %v985_v47 = vpop.f32.mrf.mxu0  ;;  %v1863_v40 = vld [vmem:[#allocation2 + $0x1a2] sm:$0xff] }
 0x143   : > { %v816_v45 = vpop.f32.mrf.mxu1  ;;  %v1881_v60 = vpack.c.bf16 %v1863_v40, %v1862_v35 }
 0x144   : > { %1082 = vst.msk [vmem:[#allocation3 + $0xa0] sm:$0xff] %vm1061_vm3, %v1049_v13  ;;  %v1052_v28 = vadd.f32 %v3587_v51, %v825_v54  ;;  %v817_v22 = vadd.f32 %v816_v45, %v4352_v42  ;;  %v3590_v63 = vpop.f32.mrf.mxu0  ;;  %3793 = vmatmul.mubr.msk.bf16.gmra.mxu0 %vm334_vm1, %v4348_v32 }
 0x145   : > { %v3556_v55 = vpop.f32.mrf.mxu1  ;;  %3759 = vmatmul.mubr.msk.bf16.gmra.mxu1 %vm334_vm1, %v4320_v24  ;;  %3796 = vmatprep.mubr.msk.bf16.mxu0 %vm334_vm1, %v4372_v59 }
 0x146   : > { %1085 = vst.msk [vmem:[#allocation3 + $0xb8] sm:$0xff] %vm1061_vm3, %v1052_v28  ;;  %v1050_v17 = vadd.f32 %v985_v47, %v817_v22  ;;  %v838_v49 = vadd.f32 %v3556_v55, %v4358_v37  ;;  %v998_v56 = vpop.f32.mrf.mxu0  ;;  %3762 = vmatprep.mubr.msk.bf16.mxu1 %vm334_vm1, %v4344_v39 }
 0x147   : > { %v829_v42 = vpop.f32.mrf.mxu1 }
 0x148   : > { %1083 = vst.msk [vmem:[#allocation3 + $0xa8] sm:$0xff] %vm1061_vm3, %v1050_v17  ;;  %v1055_v21 = vadd.f32 %v3590_v63, %v838_v49  ;;  %v830_v24 = vadd.f32 %v829_v42, %v4368_v53  ;;  %v3591_v61 = vpop.f32.mrf.mxu0 }
 0x149   : > { %v3557_v59 = vpop.f32.mrf.mxu1 }
 0x14a   : > { %1088 = vst.msk [vmem:[#allocation3 + $0xd0] sm:$0xff] %vm1061_vm3, %v1055_v21  ;;  %v1053_v25 = vadd.f32 %v998_v56, %v830_v24  ;;  %v841_v62 = vadd.f32 %v3557_v59, %v4374_v38  ;;  %v1001_v0 = vpop.f32.mrf.mxu0 }
 0x14b   : > { %v832_v37 = vpop.f32.mrf.mxu1 }
 0x14c   : > { %1086 = vst.msk [vmem:[#allocation3 + $0xc0] sm:$0xff] %vm1061_vm3, %v1053_v25  ;;  %v1056_v15 = vadd.f32 %v3591_v61, %v841_v62  ;;  %v833_v39 = vadd.f32 %v832_v37, %v4378_v1  ;;  %v3594_v16 = vpop.f32.mrf.mxu0  ;;  %3797 = vmatmul.mubr.msk.bf16.gmra.mxu0 %vm334_vm1, %v1881_v60 }
 0x14d   : > { %v3560_v52 = vpop.f32.mrf.mxu1  ;;  %3763 = vmatmul.mubr.msk.bf16.gmra.mxu1 %vm334_vm1, %v4348_v32 }
 0x14e   : > { %1089 = vst.msk [vmem:[#allocation3 + $0xd8] sm:$0xff] %vm1061_vm3, %v1056_v15  ;;  %v1054_v53 = vadd.f32 %v1001_v0, %v833_v39  ;;  %v854_v18 = vadd.f32 %v3560_v52, %v4384_v43  ;;  %v1014_v38 = vpop.f32.mrf.mxu0 }
 0x14f   : > { %v845_v2 = vpop.f32.mrf.mxu1 }
 0x150   : > { %1087 = vst.msk [vmem:[#allocation3 + $0xc8] sm:$0xff] %vm1061_vm3, %v1054_v53  ;;  %v1059_v7 = vadd.f32 %v3594_v16, %v854_v18  ;;  %v846_v19 = vadd.f32 %v845_v2, %v4392_v6  ;;  %v3595_v1 = vpop.f32.mrf.mxu0 }
 0x151   : > { %v3561_v29 = vpop.f32.mrf.mxu1 }
 0x152   : > { %1092 = vst.msk [vmem:[#allocation3 + $0xf0] sm:$0xff] %vm1061_vm3, %v1059_v7  ;;  %v1057_v5 = vadd.f32 %v1014_v38, %v846_v19  ;;  %v857_v9 = vadd.f32 %v3561_v29, %v4396_v4  ;;  %v1017_v32 = vpop.f32.mrf.mxu0 }
 0x153   : > { %v848_v30 = vpop.f32.mrf.mxu1 }
 0x154   : > { %1090 = vst.msk [vmem:[#allocation3 + $0xe0] sm:$0xff] %vm1061_vm3, %v1057_v5  ;;  %v1060_v10 = vadd.f32 %v3595_v1, %v857_v9  ;;  %v849_v43 = vadd.f32 %v848_v30, %v4400_v3  ;;  %v4523_v27 = vpop.f32.mrf.mxu0 }
 0x155   : > { %v4525_v57 = vpop.f32.mrf.mxu1 }
 0x156   : > { %1093 = vst.msk [vmem:[#allocation3 + $0xf8] sm:$0xff] %vm1061_vm3, %v1060_v10  ;;  %v1058_v6 = vadd.f32 %v1017_v32, %v849_v43  ;;  %v4528_v33 = vpop.f32.mrf.mxu0 }
 0x157   : > { %v4530_v8 = vpop.f32.mrf.mxu1 }
 0x158   : > { %1091 = vst.msk [vmem:[#allocation3 + $0xe8] sm:$0xff] %vm1061_vm3, %v1058_v6  ;;  %v4533_v4 = vpop.f32.mrf.mxu0 }
 0x159   : > { %v4535_v34 = vpop.f32.mrf.mxu1 }
 0x15a   : > { %v4537_v31 = vpop.f32.mrf.mxu0 }
 0x15b   : > { %v4539_v3 = vpop.f32.mrf.mxu1 }
 0x15c   : > { %v4541_v36 = vpop.f32.mrf.mxu0 }
 0x15d   : > { %v4543_v46 = vpop.f32.mrf.mxu1 }
 0x15e   : > { %v4545_v14 = vpop.f32.mrf.mxu0 }
 0x15f   : > { %v4547_v11 = vpop.f32.mrf.mxu1 }
 0x160   : > { %v4549_v41 = vpop.f32.mrf.mxu0 }
 0x161   : > { %v4551_v48 = vpop.f32.mrf.mxu1 }
 0x162   : > { %v4553_v20 = vpop.f32.mrf.mxu0 }
 0x163   : > { %v4555_v23 = vpop.f32.mrf.mxu1 }
 0x164   : > { %v4557_v44 = vpop.f32.mrf.mxu0 }
 0x165   : > { %v4559_v26 = vpop.f32.mrf.mxu1 }
 0x166   : > { %v4561_v50 = vpop.f32.mrf.mxu0 }
 0x167   : > { %v4563_v58 = vpop.f32.mrf.mxu1 }
 0x168   : > { %v4565_v51 = vpop.f32.mrf.mxu0 }
 0x169   : > { %v4567_v12 = vpop.f32.mrf.mxu1 }
 0x16a   : > { %v4569_v13 = vpop.f32.mrf.mxu0 }
 0x16b   : > { %v4571_v54 = vpop.f32.mrf.mxu1 }
 0x16c   : > { %v4573_v47 = vpop.f32.mrf.mxu0 }
 0x16d   : > { %v4575_v45 = vpop.f32.mrf.mxu1 }
 0x16e   : > { %v4577_v28 = vpop.f32.mrf.mxu0 }
 0x16f   : > { %v4579_v22 = vpop.f32.mrf.mxu1 }
 0x170   : > { %v4581_v63 = vpop.f32.mrf.mxu0 }
 0x171   : > { %v4583_v55 = vpop.f32.mrf.mxu1 }
 0x172   : > { %v4585_v35 = vpop.f32.mrf.mxu0 }
 0x173   : > { %v4587_v40 = vpop.f32.mrf.mxu1 }
 0x174   : > { %v4589_v17 = vpop.f32.mrf.mxu0 }
 0x175   : > { %v4591_v49 = vpop.f32.mrf.mxu1 }
 0x176   : > { %v4593_v56 = vpop.f32.mrf.mxu0 }
 0x177   : > { %v4595_v42 = vpop.f32.mrf.mxu1 }
 0x178   : > { %v4597_v21 = vpop.f32.mrf.mxu0 }
 0x179   : > { %v4599_v24 = vpop.f32.mrf.mxu1 }
 0x17a   : > { %v4601_v61 = vpop.f32.mrf.mxu0 }
 0x17b   : > { %v4603_v60 = vpop.f32.mrf.mxu1 }
 0x17c   : > { %v4605_v59 = vpop.f32.mrf.mxu0 }
 0x17d   : > { %v4607_v25 = vpop.f32.mrf.mxu1 }
 0x17e   : > { %v4609_v62 = vpop.f32.mrf.mxu0 }
 0x17f   : > { %v4611_v0 = vpop.f32.mrf.mxu1 }
 0x180   : > { %v4613_v37 = vpop.f32.mrf.mxu0 }
 0x181   : > { %v4615_v15 = vpop.f32.mrf.mxu1 }
 0x182   : > { %v4617_v39 = vpop.f32.mrf.mxu0 }
 0x183   : > { %v4619_v16 = vpop.f32.mrf.mxu1 }
 0x184   : > { %v4621_v52 = vpop.f32.mrf.mxu0 }
 0x185   : > { %v4623_v53 = vpop.f32.mrf.mxu1 }
 0x186   : > { %v4625_v18 = vpop.f32.mrf.mxu0 }
 0x187   : > { %5044 = vst [vmem:[#allocation4_spill] sm:$0xff] %v4625_v18  ;;  %v4627_v38 = vpop.f32.mrf.mxu1  ;;  %v1732_v18 = vld [vmem:[#allocation3] sm:$0xff] }
 0x188   : > { %v4629_v2 = vpop.f32.mrf.mxu0 }
 0x189   : > { %5045 = vst [vmem:[#allocation5_spill] sm:$0xff] %v4629_v2  ;;  %v4631_v7 = vpop.f32.mrf.mxu1 }
 0x18a   : > { %5046 = vst [vmem:[#allocation6_spill] sm:$0xff] %v4631_v7  ;;  %v4633_v19 = vpop.f32.mrf.mxu0 }
 0x18b   : > { %5047 = vst [vmem:[#allocation7_spill] sm:$0xff] %v4633_v19  ;;  %v4635_v1 = vpop.f32.mrf.mxu1  ;;  %v1413_v19 = vadd.f32 %v4523_v27, %v4525_v57  ;;  %v1408_v57 = vadd.f32 %v4537_v31, %v4539_v3  ;;  %v1421_v31 = vadd.f32 %v4545_v14, %v4547_v11  ;;  %v1424_v14 = vadd.f32 %v4553_v20, %v4555_v23 }
 0x18c   : > { %5048 = vst [vmem:[#allocation8_spill] sm:$0xff] %v4635_v1  ;;  %v4637_v29 = vpop.f32.mrf.mxu0  ;;  %v1437_v20 = vadd.f32 %v4561_v50, %v4563_v58  ;;  %v1440_v50 = vadd.f32 %v4569_v13, %v4571_v54  ;;  %v1453_v13 = vadd.f32 %v4577_v28, %v4579_v22  ;;  %v1456_v28 = vadd.f32 %v4585_v35, %v4587_v40 }
 0x18d   : > { %5049 = vst [vmem:[#allocation9_spill] sm:$0xff] %v4637_v29  ;;  %v4639_v5 = vpop.f32.mrf.mxu1  ;;  %v1469_v35 = vadd.f32 %v4593_v56, %v4595_v42  ;;  %v1472_v56 = vadd.f32 %v4601_v61, %v4603_v60  ;;  %v1485_v61 = vadd.f32 %v4609_v62, %v4611_v0  ;;  %v1488_v62 = vadd.f32 %v4617_v39, %v4619_v16 }
 0x18e   : > { %5050 = vst [vmem:[#allocation10_spill] sm:$0xff] %v4639_v5  ;;  %v4641_v9 = vpop.f32.mrf.mxu0  ;;  %v1405_v5 = vadd.f32 %v4528_v33, %v4530_v8  ;;  %v5058_v39 = vld [vmem:[#allocation4_spill] sm:$0xff] }
 0x18f   : > { %5051 = vst [vmem:[#allocation11_spill] sm:$0xff] %v4641_v9  ;;  %v4643_v32 = vpop.f32.mrf.mxu1  ;;  %v1501_v16 = vadd.f32 %v5058_v39, %v4627_v38 }
 0x190   : > { %5052 = vst [vmem:[#allocation12_spill] sm:$0xff] %v4643_v32  ;;  %v4645_v30 = vpop.f32.mrf.mxu0  ;;  %v1734_v32 = vld [vmem:[#allocation3 + $0x10] sm:$0xff] }
 0x191   : > { %5053 = vst [vmem:[#allocation13_spill] sm:$0xff] %v4645_v30  ;;  %v4647_v10 = vpop.f32.mrf.mxu1 }
 0x192   : > { %5054 = vst [vmem:[#allocation14_spill] sm:$0xff] %v4647_v10  ;;  %v4649_v43 = vpop.f32.mrf.mxu0  ;;  %v1416_v10 = vadd.f32 %v4533_v4, %v4535_v34  ;;  %v1429_v4 = vadd.f32 %v4541_v36, %v4543_v46  ;;  %v1432_v36 = vadd.f32 %v4549_v41, %v4551_v48  ;;  %v1445_v41 = vadd.f32 %v4557_v44, %v4559_v26 }
 0x193   : > { %5055 = vst [vmem:[#allocation15_spill] sm:$0xff] %v4649_v43  ;;  %v4651_v6 = vpop.f32.mrf.mxu1  ;;  %v1448_v44 = vadd.f32 %v4565_v51, %v4567_v12  ;;  %v1461_v51 = vadd.f32 %v4573_v47, %v4575_v45  ;;  %v1464_v47 = vadd.f32 %v4581_v63, %v4583_v55  ;;  %v1477_v63 = vadd.f32 %v4589_v17, %v4591_v49  ;;  %v5061_v38 = vld [vmem:[#allocation8_spill] sm:$0xff] }
 0x194   : > { %5056 = vst [vmem:[#allocation16_spill] sm:$0xff] %v4651_v6  ;;  %v4655_v1 = vpop.f32.mrf.mxu0  ;;  %v1480_v17 = vadd.f32 %v4597_v21, %v4599_v24  ;;  %v1493_v21 = vadd.f32 %v4605_v59, %v4607_v25  ;;  %v1496_v59 = vadd.f32 %v4613_v37, %v4615_v15  ;;  %v1509_v37 = vadd.f32 %v4621_v52, %v4623_v53  ;;  %v5059_v52 = vld [vmem:[#allocation6_spill] sm:$0xff]  ;;  %v5060_v53 = vld [vmem:[#allocation5_spill] sm:$0xff] }
 0x195   : > { %v3668_v29 = vpop.f32.mrf.mxu1 }
 0x196   : > { %v1702_v9 = vadd.f32 %v3668_v29, %v1413_v19  ;;  %v4659_v2 = vpop.f32.mrf.mxu0  ;;  %v1735_v29 = vld [vmem:[#allocation3 + $0x18] sm:$0xff] }
 0x197   : > { %5057 = vst [vmem:[#allocation17_spill] sm:$0xff] %v4659_v2  ;;  %v1573_v30 = vpop.f32.mrf.mxu1 }
 0x198   : > { %v1766_v43 = vadd.f32 %v1734_v32, %v1702_v9  ;;  %v1700_v7 = vadd.f32 %v1573_v30, %v1405_v5  ;;  %v4663_v6 = vpop.f32.mrf.mxu0  ;;  %v1733_v32 = vld [vmem:[#allocation3 + $0x8] sm:$0xff] }
 0x199   : > { %v3669_v27 = vpop.f32.mrf.mxu1  ;;  %v5068_v39 = vld [vmem:[#allocation13_spill] sm:$0xff] }
 0x19a   : > { %1798 = vst.msk [vmem:[#allocation3 + $0x10] sm:$0xff] %vm1061_vm3, %v1766_v43  ;;  %v1764_v33 = vadd.f32 %v1732_v18, %v1700_v7  ;;  %v1703_v8 = vadd.f32 %v3669_v27, %v1416_v10  ;;  %v4668_v19 = vpop.f32.mrf.mxu0  ;;  %v1738_v10 = vld [vmem:[#allocation3 + $0x30] sm:$0xff] }
 0x19b   : > { %v1576_v2 = vpop.f32.mrf.mxu1 }
 0x19c   : > { %1796 = vst.msk [vmem:[#allocation3] sm:$0xff] %vm1061_vm3, %v1764_v33  ;;  %v1767_v34 = vadd.f32 %v1735_v29, %v1703_v8  ;;  %v1701_v5 = vadd.f32 %v1576_v2, %v1408_v57  ;;  %v4673_v9 = vpop.f32.mrf.mxu0  ;;  %v1736_v57 = vld [vmem:[#allocation3 + $0x20] sm:$0xff] }
 0x19d   : > { %v3672_v30 = vpop.f32.mrf.mxu1 }
 0x19e   : > { %1799 = vst.msk [vmem:[#allocation3 + $0x18] sm:$0xff] %vm1061_vm3, %v1767_v34  ;;  %v1765_v3 = vadd.f32 %v1733_v32, %v1701_v5  ;;  %v1706_v18 = vadd.f32 %v3672_v30, %v1429_v4  ;;  %v4678_v7 = vpop.f32.mrf.mxu0  ;;  %v1739_v4 = vld [vmem:[#allocation3 + $0x38] sm:$0xff]  ;;  %v1737_v30 = vld [vmem:[#allocation3 + $0x28] sm:$0xff] }
 0x19f   : > { %v1589_v43 = vpop.f32.mrf.mxu1 }
 0x1a0   : > { %1797 = vst.msk [vmem:[#allocation3 + $0x8] sm:$0xff] %vm1061_vm3, %v1765_v3  ;;  %v1770_v46 = vadd.f32 %v1738_v10, %v1706_v18  ;;  %v1704_v2 = vadd.f32 %v1589_v43, %v1421_v31  ;;  %v4683_v27 = vpop.f32.mrf.mxu0  ;;  %v1742_v10 = vld [vmem:[#allocation3 + $0x50] sm:$0xff] }
 0x1a1   : > { %v3673_v33 = vpop.f32.mrf.mxu1 }
 0x1a2   : > { %1802 = vst.msk [vmem:[#allocation3 + $0x30] sm:$0xff] %vm1061_vm3, %v1770_v46  ;;  %v1768_v11 = vadd.f32 %v1736_v57, %v1704_v2  ;;  %v1707_v8 = vadd.f32 %v3673_v33, %v1432_v36  ;;  %v4688_v29 = vpop.f32.mrf.mxu0  ;;  %v1740_v2 = vld [vmem:[#allocation3 + $0x40] sm:$0xff] }
 0x1a3   : > { %v1592_v34 = vpop.f32.mrf.mxu1 }
 0x1a4   : > { %1800 = vst.msk [vmem:[#allocation3 + $0x20] sm:$0xff] %vm1061_vm3, %v1768_v11  ;;  %v1771_v48 = vadd.f32 %v1739_v4, %v1707_v8  ;;  %v1705_v5 = vadd.f32 %v1592_v34, %v1424_v14  ;;  %v4693_v32 = vpop.f32.mrf.mxu0  ;;  %v1743_v11 = vld [vmem:[#allocation3 + $0x58] sm:$0xff] }
 0x1a5   : > { %v3676_v31 = vpop.f32.mrf.mxu1 }
 0x1a6   : > { %1803 = vst.msk [vmem:[#allocation3 + $0x38] sm:$0xff] %vm1061_vm3, %v1771_v48  ;;  %v1769_v23 = vadd.f32 %v1737_v30, %v1705_v5  ;;  %v1710_v3 = vadd.f32 %v3676_v31, %v1445_v41  ;;  %v4698_v18 = vpop.f32.mrf.mxu0  ;;  %v1741_v41 = vld [vmem:[#allocation3 + $0x48] sm:$0xff]  ;;  %v1746_v31 = vld [vmem:[#allocation3 + $0x70] sm:$0xff] }
 0x1a7   : > { %v1605_v43 = vpop.f32.mrf.mxu1 }
 0x1a8   : > { %1801 = vst.msk [vmem:[#allocation3 + $0x28] sm:$0xff] %vm1061_vm3, %v1769_v23  ;;  %v1774_v26 = vadd.f32 %v1742_v10, %v1710_v3  ;;  %v1708_v36 = vadd.f32 %v1605_v43, %v1437_v20  ;;  %v4703_v46 = vpop.f32.mrf.mxu0  ;;  %v1744_v10 = vld [vmem:[#allocation3 + $0x60] sm:$0xff] }
 0x1a9   : > { %v3677_v57 = vpop.f32.mrf.mxu1 }
 0x1aa   : > { %1806 = vst.msk [vmem:[#allocation3 + $0x50] sm:$0xff] %vm1061_vm3, %v1774_v26  ;;  %v1772_v58 = vadd.f32 %v1740_v2, %v1708_v36  ;;  %v1711_v33 = vadd.f32 %v3677_v57, %v1448_v44  ;;  %v4708_v14 = vpop.f32.mrf.mxu0  ;;  %v1747_v36 = vld [vmem:[#allocation3 + $0x78] sm:$0xff] }
 0x1ab   : > { %v1608_v8 = vpop.f32.mrf.mxu1 }
 0x1ac   : > { %1804 = vst.msk [vmem:[#allocation3 + $0x40] sm:$0xff] %vm1061_vm3, %v1772_v58  ;;  %v1775_v12 = vadd.f32 %v1743_v11, %v1711_v33  ;;  %v1709_v4 = vadd.f32 %v1608_v8, %v1440_v50  ;;  %v4713_v34 = vpop.f32.mrf.mxu0  ;;  %v1745_v58 = vld [vmem:[#allocation3 + $0x68] sm:$0xff] }
 0x1ad   : > { %v3680_v48 = vpop.f32.mrf.mxu1 }
 0x1ae   : > { %1807 = vst.msk [vmem:[#allocation3 + $0x58] sm:$0xff] %vm1061_vm3, %v1775_v12  ;;  %v1773_v54 = vadd.f32 %v1741_v41, %v1709_v4  ;;  %v1714_v5 = vadd.f32 %v3680_v48, %v1461_v51  ;;  %v4718_v30 = vpop.f32.mrf.mxu0  ;;  %v1750_v51 = vld [vmem:[#allocation3 + $0x90] sm:$0xff]  ;;  %v1748_v48 = vld [vmem:[#allocation3 + $0x80] sm:$0xff] }
 0x1af   : > { %v1621_v20 = vpop.f32.mrf.mxu1 }
 0x1b0   : > { %1805 = vst.msk [vmem:[#allocation3 + $0x48] sm:$0xff] %vm1061_vm3, %v1773_v54  ;;  %v1778_v45 = vadd.f32 %v1746_v31, %v1714_v5  ;;  %v1712_v23 = vadd.f32 %v1621_v20, %v1453_v13  ;;  %v4723_v3 = vpop.f32.mrf.mxu0  ;;  %v1751_v31 = vld [vmem:[#allocation3 + $0x98] sm:$0xff] }
 0x1b1   : > { %v3681_v43 = vpop.f32.mrf.mxu1 }
 0x1b2   : > { %1810 = vst.msk [vmem:[#allocation3 + $0x70] sm:$0xff] %vm1061_vm3, %v1778_v45  ;;  %v1776_v22 = vadd.f32 %v1744_v10, %v1712_v23  ;;  %v1715_v44 = vadd.f32 %v3681_v43, %v1464_v47  ;;  %v4728_v26 = vpop.f32.mrf.mxu0  ;;  %v1749_v23 = vld [vmem:[#allocation3 + $0x88] sm:$0xff] }
 0x1b3   : > { %v1624_v2 = vpop.f32.mrf.mxu1 }
 0x1b4   : > { %1808 = vst.msk [vmem:[#allocation3 + $0x60] sm:$0xff] %vm1061_vm3, %v1776_v22  ;;  %v1779_v55 = vadd.f32 %v1747_v36, %v1715_v44  ;;  %v1713_v57 = vadd.f32 %v1624_v2, %v1456_v28  ;;  %v4733_v50 = vpop.f32.mrf.mxu0  ;;  %v1754_v22 = vld [vmem:[#allocation3 + $0xb0] sm:$0xff] }
 0x1b5   : > { %v3684_v33 = vpop.f32.mrf.mxu1 }
 0x1b6   : > { %1811 = vst.msk [vmem:[#allocation3 + $0x78] sm:$0xff] %vm1061_vm3, %v1779_v55  ;;  %v1777_v40 = vadd.f32 %v1745_v58, %v1713_v57  ;;  %v1718_v11 = vadd.f32 %v3684_v33, %v1477_v63  ;;  %v4738_v8 = vpop.f32.mrf.mxu0  ;;  %v1752_v63 = vld [vmem:[#allocation3 + $0xa0] sm:$0xff]  ;;  %v1755_v33 = vld [vmem:[#allocation3 + $0xb8] sm:$0xff] }
 0x1b7   : > { %v1637_v12 = vpop.f32.mrf.mxu1 }
 0x1b8   : > { %1809 = vst.msk [vmem:[#allocation3 + $0x68] sm:$0xff] %vm1061_vm3, %v1777_v40  ;;  %v1782_v49 = vadd.f32 %v1750_v51, %v1718_v11  ;;  %v1716_v4 = vadd.f32 %v1637_v12, %v1469_v35  ;;  %v4743_v41 = vpop.f32.mrf.mxu0  ;;  %v1753_v51 = vld [vmem:[#allocation3 + $0xa8] sm:$0xff] }
 0x1b9   : > { %v3685_v13 = vpop.f32.mrf.mxu1 }
 0x1ba   : > { %1814 = vst.msk [vmem:[#allocation3 + $0x90] sm:$0xff] %vm1061_vm3, %v1782_v49  ;;  %v1780_v42 = vadd.f32 %v1748_v48, %v1716_v4  ;;  %v1719_v54 = vadd.f32 %v3685_v13, %v1480_v17  ;;  %v4748_v5 = vpop.f32.mrf.mxu0  ;;  %v1758_v48 = vld [vmem:[#allocation3 + $0xd0] sm:$0xff] }
 0x1bb   : > { %v1640_v20 = vpop.f32.mrf.mxu1 }
 0x1bc   : > { %1812 = vst.msk [vmem:[#allocation3 + $0x80] sm:$0xff] %vm1061_vm3, %v1780_v42  ;;  %v1783_v24 = vadd.f32 %v1751_v31, %v1719_v54  ;;  %v1717_v47 = vadd.f32 %v1640_v20, %v1472_v56  ;;  %v4753_v45 = vpop.f32.mrf.mxu0  ;;  %v1512_v56 = vadd.f32 %v5060_v53, %v5059_v52  ;;  %v1756_v20 = vld [vmem:[#allocation3 + $0xc0] sm:$0xff] }
 0x1bd   : > { %v3688_v10 = vpop.f32.mrf.mxu1  ;;  %v5069_v53 = vld [vmem:[#allocation16_spill] sm:$0xff] }
 0x1be   : > { %1815 = vst.msk [vmem:[#allocation3 + $0x98] sm:$0xff] %vm1061_vm3, %v1783_v24  ;;  %v1781_v60 = vadd.f32 %v1749_v23, %v1717_v47  ;;  %v1722_v43 = vadd.f32 %v3688_v10, %v1493_v21  ;;  %v4758_v28 = vpop.f32.mrf.mxu0  ;;  %v5062_v24 = vld [vmem:[#allocation7_spill] sm:$0xff] }
 0x1bf   : > { %v1653_v44 = vpop.f32.mrf.mxu1  ;;  %v1504_v47 = vadd.f32 %v5062_v24, %v5061_v38  ;;  %v1763_v38 = vld [vmem:[#allocation3 + $0xf8] sm:$0xff] }
 0x1c0   : > { %1813 = vst.msk [vmem:[#allocation3 + $0x88] sm:$0xff] %vm1061_vm3, %v1781_v60  ;;  %v1786_v25 = vadd.f32 %v1754_v22, %v1722_v43  ;;  %v1720_v36 = vadd.f32 %v1653_v44, %v1485_v61  ;;  %v4763_v2 = vpop.f32.mrf.mxu0  ;;  %v1759_v60 = vld [vmem:[#allocation3 + $0xd8] sm:$0xff]  ;;  %v5063_v22 = vld [vmem:[#allocation10_spill] sm:$0xff]  ;;  %v5064_v44 = vld [vmem:[#allocation9_spill] sm:$0xff] }
 0x1c1   : > { %v3689_v55 = vpop.f32.mrf.mxu1 }
 0x1c2   : > { %1818 = vst.msk [vmem:[#allocation3 + $0xb0] sm:$0xff] %vm1061_vm3, %v1786_v25  ;;  %v1784_v0 = vadd.f32 %v1752_v63, %v1720_v36  ;;  %v1723_v57 = vadd.f32 %v3689_v55, %v1496_v59  ;;  %v4768_v58 = vpop.f32.mrf.mxu0  ;;  %v1525_v59 = vadd.f32 %v5064_v44, %v5063_v22  ;;  %v1757_v55 = vld [vmem:[#allocation3 + $0xc8] sm:$0xff] }
 0x1c3   : > { %v1656_v35 = vpop.f32.mrf.mxu1 }
 0x1c4   : > { %1816 = vst.msk [vmem:[#allocation3 + $0xa0] sm:$0xff] %vm1061_vm3, %v1784_v0  ;;  %v1787_v15 = vadd.f32 %v1755_v33, %v1723_v57  ;;  %v1721_v40 = vadd.f32 %v1656_v35, %v1488_v62  ;;  %v4773_v11 = vpop.f32.mrf.mxu0  ;;  %v5065_v0 = vld [vmem:[#allocation12_spill] sm:$0xff]  ;;  %v5066_v57 = vld [vmem:[#allocation11_spill] sm:$0xff] }
 0x1c5   : > { %v3692_v12 = vpop.f32.mrf.mxu1  ;;  %v1517_v33 = vadd.f32 %v5066_v57, %v5065_v0  ;;  %v2468_v57 = vld [vmem:[#allocation3 + $0x10] sm:$0xff] }
 0x1c6   : > { %1819 = vst.msk [vmem:[#allocation3 + $0xb8] sm:$0xff] %vm1061_vm3, %v1787_v15  ;;  %v1785_v17 = vadd.f32 %v1753_v51, %v1721_v40  ;;  %v1726_v49 = vadd.f32 %v3692_v12, %v1509_v37  ;;  %v4778_v4 = vpop.f32.mrf.mxu0  ;;  %v1762_v40 = vld [vmem:[#allocation3 + $0xf0] sm:$0xff] }
 0x1c7   : > { %v1669_v13 = vpop.f32.mrf.mxu1  ;;  %v5067_v12 = vld [vmem:[#allocation14_spill] sm:$0xff] }
 0x1c8   : > { %1817 = vst.msk [vmem:[#allocation3 + $0xa8] sm:$0xff] %vm1061_vm3, %v1785_v17  ;;  %v1790_v42 = vadd.f32 %v1758_v48, %v1726_v49  ;;  %v1724_v54 = vadd.f32 %v1669_v13, %v1501_v16  ;;  %v4783_v31 = vpop.f32.mrf.mxu0  ;;  %v1528_v16 = vadd.f32 %v5068_v39, %v5067_v12  ;;  %v1760_v13 = vld [vmem:[#allocation3 + $0xe0] sm:$0xff] }
 0x1c9   : > { %v3693_v21 = vpop.f32.mrf.mxu1  ;;  %v2466_v12 = vld [vmem:[#allocation3] sm:$0xff] }
 0x1ca   : > { %1822 = vst.msk [vmem:[#allocation3 + $0xd0] sm:$0xff] %vm1061_vm3, %v1790_v42  ;;  %v1788_v23 = vadd.f32 %v1756_v20, %v1724_v54  ;;  %v1727_v10 = vadd.f32 %v3693_v21, %v1512_v56  ;;  %v4788_v61 = vpop.f32.mrf.mxu0  ;;  %v5070_v56 = vld [vmem:[#allocation15_spill] sm:$0xff] }
 0x1cb   : > { %v1672_v43 = vpop.f32.mrf.mxu1  ;;  %v1520_v42 = vadd.f32 %v5070_v56, %v5069_v53 }
 0x1cc   : > { %1820 = vst.msk [vmem:[#allocation3 + $0xc0] sm:$0xff] %vm1061_vm3, %v1788_v23  ;;  %v1791_v25 = vadd.f32 %v1759_v60, %v1727_v10  ;;  %v1725_v36 = vadd.f32 %v1672_v43, %v1504_v47  ;;  %v4793_v63 = vpop.f32.mrf.mxu0  ;;  %v1761_v60 = vld [vmem:[#allocation3 + $0xe8] sm:$0xff] }
 0x1cd   : > { %v3696_v62 = vpop.f32.mrf.mxu1 }
 0x1ce   : > { %1823 = vst.msk [vmem:[#allocation3 + $0xd8] sm:$0xff] %vm1061_vm3, %v1791_v25  ;;  %v1789_v35 = vadd.f32 %v1757_v55, %v1725_v36  ;;  %v1730_v37 = vadd.f32 %v3696_v62, %v1525_v59  ;;  %v4798_v15 = vpop.f32.mrf.mxu0  ;;  %v5071_v55 = vld [vmem:[#allocation17_spill] sm:$0xff] }
 0x1cf   : > { %v1685_v51 = vpop.f32.mrf.mxu1 }
 0x1d0   : > { %1821 = vst.msk [vmem:[#allocation3 + $0xc8] sm:$0xff] %vm1061_vm3, %v1789_v35  ;;  %v1794_v17 = vadd.f32 %v1762_v40, %v1730_v37  ;;  %v1728_v49 = vadd.f32 %v1685_v51, %v1517_v33  ;;  %v4803_v48 = vpop.f32.mrf.mxu0 }
 0x1d1   : > { %v3697_v52 = vpop.f32.mrf.mxu1 }
 0x1d2   : > { %1826 = vst.msk [vmem:[#allocation3 + $0xf0] sm:$0xff] %vm1061_vm3, %v1794_v17  ;;  %v1792_v54 = vadd.f32 %v1760_v13, %v1728_v49  ;;  %v1731_v20 = vadd.f32 %v3697_v52, %v1528_v16  ;;  %v4808_v21 = vpop.f32.mrf.mxu0  ;;  %v2469_v13 = vld [vmem:[#allocation3 + $0x18] sm:$0xff] }
 0x1d3   : > { %v1688_v24 = vpop.f32.mrf.mxu1 }
 0x1d4   : > { %1824 = vst.msk [vmem:[#allocation3 + $0xe0] sm:$0xff] %vm1061_vm3, %v1792_v54  ;;  %v1795_v47 = vadd.f32 %v1763_v38, %v1731_v20  ;;  %v1729_v23 = vadd.f32 %v1688_v24, %v1520_v42  ;;  %v3770_v10 = vpop.f32.mrf.mxu0  ;;  %v2467_v54 = vld [vmem:[#allocation3 + $0x8] sm:$0xff] }
 0x1d5   : > { %v3736_v43 = vpop.f32.mrf.mxu1 }
 0x1d6   : > { %1827 = vst.msk [vmem:[#allocation3 + $0xf8] sm:$0xff] %vm1061_vm3, %v1795_v47  ;;  %v1793_v22 = vadd.f32 %v1761_v60, %v1729_v23  ;;  %v2147_v44 = vadd.f32 %v3736_v43, %v4655_v1  ;;  %v2307_v59 = vpop.f32.mrf.mxu0  ;;  %v2472_v23 = vld [vmem:[#allocation3 + $0x30] sm:$0xff] }
 0x1d7   : > { %v2138_v25 = vpop.f32.mrf.mxu1 }
 0x1d8   : > { %1825 = vst.msk [vmem:[#allocation3 + $0xe8] sm:$0xff] %vm1061_vm3, %v1793_v22  ;;  %v2436_v36 = vadd.f32 %v3770_v10, %v2147_v44  ;;  %v2139_v62 = vadd.f32 %v2138_v25, %v5071_v55  ;;  %v3771_v0 = vpop.f32.mrf.mxu0 }
 0x1d9   : > { %v3737_v33 = vpop.f32.mrf.mxu1 }
 0x1da   : > { %v2500_v35 = vadd.f32 %v2468_v57, %v2436_v36  ;;  %v2434_v37 = vadd.f32 %v2307_v59, %v2139_v62  ;;  %v2150_v40 = vadd.f32 %v3737_v33, %v4663_v6  ;;  %v2310_v51 = vpop.f32.mrf.mxu0 }
 0x1db   : > { %v2141_v39 = vpop.f32.mrf.mxu1 }
 0x1dc   : > { %2532 = vst.msk [vmem:[#allocation3 + $0x10] sm:$0xff] %vm1061_vm3, %v2500_v35  ;;  %v2498_v1 = vadd.f32 %v2466_v12, %v2434_v37  ;;  %v2437_v16 = vadd.f32 %v3771_v0, %v2150_v40  ;;  %v2142_v17 = vadd.f32 %v2141_v39, %v4668_v19  ;;  %v3774_v49 = vpop.f32.mrf.mxu0  ;;  %v2473_v35 = vld [vmem:[#allocation3 + $0x38] sm:$0xff] }
 0x1dd   : > { %v3740_v52 = vpop.f32.mrf.mxu1 }
 0x1de   : > { %2530 = vst.msk [vmem:[#allocation3] sm:$0xff] %vm1061_vm3, %v2498_v1  ;;  %v2501_v53 = vadd.f32 %v2469_v13, %v2437_v16  ;;  %v2435_v56 = vadd.f32 %v2310_v51, %v2142_v17  ;;  %v2163_v42 = vadd.f32 %v3740_v52, %v4673_v9  ;;  %v2323_v6 = vpop.f32.mrf.mxu0 }
 0x1df   : > { %v2154_v20 = vpop.f32.mrf.mxu1 }
 0x1e0   : > { %2533 = vst.msk [vmem:[#allocation3 + $0x18] sm:$0xff] %vm1061_vm3, %v2501_v53  ;;  %v2499_v38 = vadd.f32 %v2467_v54, %v2435_v56  ;;  %v2440_v24 = vadd.f32 %v3774_v49, %v2163_v42  ;;  %v2155_v47 = vadd.f32 %v2154_v20, %v4678_v7  ;;  %v3775_v19 = vpop.f32.mrf.mxu0  ;;  %v2470_v7 = vld [vmem:[#allocation3 + $0x20] sm:$0xff]  ;;  %v2471_v49 = vld [vmem:[#allocation3 + $0x28] sm:$0xff] }
 0x1e1   : > { %v3741_v10 = vpop.f32.mrf.mxu1 }
 0x1e2   : > { %2531 = vst.msk [vmem:[#allocation3 + $0x8] sm:$0xff] %vm1061_vm3, %v2499_v38  ;;  %v2504_v60 = vadd.f32 %v2472_v23, %v2440_v24  ;;  %v2438_v43 = vadd.f32 %v2323_v6, %v2155_v47  ;;  %v2166_v22 = vadd.f32 %v3741_v10, %v4683_v27  ;;  %v2326_v9 = vpop.f32.mrf.mxu0  ;;  %v2476_v47 = vld [vmem:[#allocation3 + $0x50] sm:$0xff] }
 0x1e3   : > { %v2564_v44 = vld [vmem:[#allocation3 + $0x10] sm:$0xff]  ;;  %v2157_v59 = vpop.f32.mrf.mxu1 }
 0x1e4   : > { %v3232_v25 = vpack.c.bf16 %v2564_v44, %v2564_v44  ;;  %2536 = vst.msk [vmem:[#allocation3 + $0x30] sm:$0xff] %vm1061_vm3, %v2504_v60  ;;  %v2502_v36 = vadd.f32 %v2470_v7, %v2438_v43  ;;  %v3778_v55 = vpop.f32.mrf.mxu0  ;;  %v2441_v27 = vadd.f32 %v3775_v19, %v2166_v22  ;;  %v2158_v0 = vadd.f32 %v2157_v59, %v4688_v29 }
 0x1e5   : > { %v2562_v62 = vld [vmem:[#allocation3] sm:$0xff]  ;;  %v3744_v57 = vpop.f32.mrf.mxu1  ;;  %v2758_v16 = vsel %vm1061_vm3, %v2564_v44, 0.0  ;;  %v2828_v52 = vmul.f32 %v2564_v44, %v2564_v44 }
 0x1e6   : > { %2725 = vst.msk [vmem:[%s4829_s22 + $0x8] sm:$0xf] %vm2722_vm4, %v3232_v25  ;;  %v3230_v33 = vpack.c.bf16 %v2562_v62, %v2562_v62  ;;  %v2339_v37 = vpop.f32.mrf.mxu0  ;;  %v2505_v51 = vadd.f32 %v2473_v35, %v2441_v27  ;;  %v2439_v12 = vadd.f32 %v2326_v9, %v2158_v0  ;;  %v2179_v39 = vadd.f32 %v3744_v57, %v4693_v32  ;;  %v2474_v25 = vld [vmem:[#allocation3 + $0x40] sm:$0xff] }
 0x1e7   : > { %2534 = vst.msk [vmem:[#allocation3 + $0x20] sm:$0xff] %vm1061_vm3, %v2502_v36  ;;  %v2565_v40 = vld [vmem:[#allocation3 + $0x18] sm:$0xff]  ;;  %v2170_v1 = vpop.f32.mrf.mxu1  ;;  %v2826_v29 = vmul.f32 %v2562_v62, %v2562_v62  ;;  %v2755_v32 = vsel %vm1061_vm3, %v2562_v62, 0.0 }
 0x1e8   : > { %2723 = vst.msk [vmem:[%s4829_s22] sm:$0xf] %vm2722_vm4, %v3230_v33  ;;  %v3233_v17 = vpack.c.bf16 %v2565_v40, %v2565_v40  ;;  %v3779_v13 = vpop.f32.mrf.mxu0  ;;  %v2503_v56 = vadd.f32 %v2471_v49, %v2439_v12  ;;  %v2444_v42 = vadd.f32 %v3778_v55, %v2179_v39  ;;  %v2171_v6 = vadd.f32 %v2170_v1, %v4698_v18  ;;  %v2477_v12 = vld [vmem:[#allocation3 + $0x58] sm:$0xff] }
 0x1e9   : > { %v2563_v53 = vld [vmem:[#allocation3 + $0x8] sm:$0xff]  ;;  %2537 = vst.msk [vmem:[#allocation3 + $0x38] sm:$0xff] %vm1061_vm3, %v2505_v51  ;;  %v3745_v54 = vpop.f32.mrf.mxu1  ;;  %v2858_v9 = vsel %vm1061_vm3, %v2826_v29, 0.0  ;;  %v2829_v44 = vmul.f32 %v2565_v40, %v2565_v40  ;;  %v2861_v33 = vsel %vm1061_vm3, %v2828_v52, 0.0  ;;  %v2760_v35 = vsel %vm1061_vm3, %v2565_v40, 0.0 }
 0x1ea   : > { %2726 = vst.msk [vmem:[%s4829_s22 + $0xc] sm:$0xf] %vm2722_vm4, %v3233_v17  ;;  %v3231_v20 = vpack.c.bf16 %v2563_v53, %v2563_v53  ;;  %v2756_v38 = vsel %vm1061_vm3, %v2563_v53, 0.0  ;;  %v2827_v24 = vmul.f32 %v2563_v53, %v2563_v53  ;;  %v2342_v19 = vpop.f32.mrf.mxu0  ;;  %v2508_v60 = vadd.f32 %v2476_v47, %v2444_v42 }
 0x1eb   : > { %v2757_v23 = vadd.f32 %v2756_v38, %v2755_v32  ;;  %v4846_v10 = vld [vmem:[#allocation3 + $0x30] sm:$0xff]  ;;  %2535 = vst.msk [vmem:[#allocation3 + $0x28] sm:$0xff] %vm1061_vm3, %v2503_v56  ;;  %v2442_v43 = vadd.f32 %v2339_v37, %v2171_v6  ;;  %v2182_v18 = vadd.f32 %v3745_v54, %v4703_v46  ;;  %v2173_v22 = vpop.f32.mrf.mxu1 }
 0x1ec   : > { %2724 = vst.msk [vmem:[%s4829_s22 + $0x4] sm:$0xf] %vm2722_vm4, %v3231_v20  ;;  %v2859_v7 = vsel %vm1061_vm3, %v2827_v24, 0.0  ;;  %v3236_v59 = vpack.c.bf16 %v4846_v10, %v4846_v10  ;;  %v3782_v36 = vpop.f32.mrf.mxu0  ;;  %v2174_v17 = vadd.f32 %v2173_v22, %v4708_v14  ;;  %v2832_v6 = vmul.f32 %v4846_v10, %v4846_v10 }
 0x1ed   : > { %v2759_v55 = vadd.f32 %v2758_v16, %v2757_v23  ;;  %v2860_v62 = vadd.f32 %v2859_v7, %v2858_v9  ;;  %2540 = vst.msk [vmem:[#allocation3 + $0x50] sm:$0xff] %vm1061_vm3, %v2508_v60  ;;  %v2506_v46 = vadd.f32 %v2474_v25, %v2442_v43  ;;  %v2445_v0 = vadd.f32 %v3779_v13, %v2182_v18  ;;  %v3748_v57 = vpop.f32.mrf.mxu1  ;;  %v2475_v9 = vld [vmem:[#allocation3 + $0x48] sm:$0xff] }
 0x1ee   : > { %v2566_v27 = vld [vmem:[#allocation3 + $0x20] sm:$0xff]  ;;  %2729 = vst.msk [vmem:[%s4829_s22 + $0x18] sm:$0xf] %vm2722_vm4, %v3236_v59  ;;  %v2355_v39 = vpop.f32.mrf.mxu0  ;;  %v2863_v13 = vsel %vm1061_vm3, %v2829_v44, 0.0  ;;  %v2195_v53 = vadd.f32 %v3748_v57, %v4713_v34  ;;  %v2443_v47 = vadd.f32 %v2342_v19, %v2174_v17  ;;  %v2480_v44 = vld [vmem:[#allocation3 + $0x70] sm:$0xff]  ;;  %v2766_v19 = vsel %vm1061_vm3, %v4846_v10, 0.0 }
 0x1ef   : > { %v3234_v37 = vpack.c.bf16 %v2566_v27, %v2566_v27  ;;  %v2830_v51 = vmul.f32 %v2566_v27, %v2566_v27  ;;  %v2862_v1 = vadd.f32 %v2861_v33, %v2860_v62  ;;  %v2761_v16 = vadd.f32 %v2760_v35, %v2759_v55  ;;  %2538 = vst.msk [vmem:[#allocation3 + $0x40] sm:$0xff] %vm1061_vm3, %v2506_v46  ;;  %v2186_v49 = vpop.f32.mrf.mxu1  ;;  %v2478_v57 = vld [vmem:[#allocation3 + $0x60] sm:$0xff] }
 0x1f0   : > { %v2509_v29 = vadd.f32 %v2477_v12, %v2445_v0  ;;  %v2762_v40 = vsel %vm1061_vm3, %v2566_v27, 0.0  ;;  %v2569_v52 = vld [vmem:[#allocation3 + $0x38] sm:$0xff]  ;;  %v2187_v56 = vadd.f32 %v2186_v49, %v4718_v30  ;;  %v3783_v42 = vpop.f32.mrf.mxu0  ;;  %v2448_v23 = vadd.f32 %v3782_v36, %v2195_v53 }
 0x1f1   : > { %2727 = vst.msk [vmem:[%s4829_s22 + $0x10] sm:$0xf] %vm2722_vm4, %v3234_v37  ;;  %v2763_v54 = vadd.f32 %v2762_v40, %v2761_v16  ;;  %v2864_v32 = vadd.f32 %v2863_v13, %v2862_v1  ;;  %v3237_v14 = vpack.c.bf16 %v2569_v52, %v2569_v52  ;;  %v3749_v20 = vpop.f32.mrf.mxu1  ;;  %v2865_v38 = vsel %vm1061_vm3, %v2830_v51, 0.0 }
 0x1f2   : > { %2541 = vst.msk [vmem:[#allocation3 + $0x58] sm:$0xff] %vm1061_vm3, %v2509_v29  ;;  %v2567_v24 = vld [vmem:[#allocation3 + $0x28] sm:$0xff]  ;;  %v2446_v60 = vadd.f32 %v2355_v39, %v2187_v56  ;;  %v2358_v34 = vpop.f32.mrf.mxu0  ;;  %v2507_v55 = vadd.f32 %v2475_v9, %v2443_v47  ;;  %v2512_v62 = vadd.f32 %v2480_v44, %v2448_v23  ;;  %v2833_v36 = vmul.f32 %v2569_v52, %v2569_v52 }
 0x1f3   : > { %v2866_v43 = vadd.f32 %v2865_v38, %v2864_v32  ;;  %2730 = vst.msk [vmem:[%s4829_s22 + $0x1c] sm:$0xf] %vm2722_vm4, %v3237_v14  ;;  %v3235_v30 = vpack.c.bf16 %v2567_v24, %v2567_v24  ;;  %v2764_v18 = vsel %vm1061_vm3, %v2567_v24, 0.0  ;;  %v2831_v22 = vmul.f32 %v2567_v24, %v2567_v24  ;;  %v2189_v7 = vpop.f32.mrf.mxu1 }
 0x1f4   : > { %v2765_v59 = vadd.f32 %v2764_v18, %v2763_v54  ;;  %v2572_v25 = vld [vmem:[#allocation3 + $0x50] sm:$0xff]  ;;  %v3786_v27 = vpop.f32.mrf.mxu0  ;;  %2539 = vst.msk [vmem:[#allocation3 + $0x48] sm:$0xff] %vm1061_vm3, %v2507_v55  ;;  %2544 = vst.msk [vmem:[#allocation3 + $0x70] sm:$0xff] %vm1061_vm3, %v2512_v62  ;;  %v2510_v12 = vadd.f32 %v2478_v57, %v2446_v60  ;;  %v2198_v39 = vadd.f32 %v3749_v20, %v4723_v3  ;;  %v2869_v1 = vsel %vm1061_vm3, %v2832_v6, 0.0  ;;  %v2481_v20 = vld [vmem:[#allocation3 + $0x78] sm:$0xff] }
 0x1f5   : > { %2728 = vst.msk [vmem:[%s4829_s22 + $0x14] sm:$0xf] %vm2722_vm4, %v3235_v30  ;;  %v2867_v46 = vsel %vm1061_vm3, %v2831_v22, 0.0  ;;  %v3240_v0 = vpack.c.bf16 %v2572_v25, %v2572_v25  ;;  %v3752_v33 = vpop.f32.mrf.mxu1  ;;  %v2768_v16 = vsel %vm1061_vm3, %v2569_v52, 0.0  ;;  %v2190_v3 = vadd.f32 %v2189_v7, %v4728_v26  ;;  %v2479_v26 = vld [vmem:[#allocation3 + $0x68] sm:$0xff] }
 0x1f6   : > { %v2767_v35 = vadd.f32 %v2766_v19, %v2765_v59  ;;  %v2868_v37 = vadd.f32 %v2867_v46, %v2866_v43  ;;  %v2570_v51 = vld [vmem:[#allocation3 + $0x40] sm:$0xff]  ;;  %v2371_v10 = vpop.f32.mrf.mxu0  ;;  %2542 = vst.msk [vmem:[#allocation3 + $0x60] sm:$0xff] %vm1061_vm3, %v2510_v12  ;;  %v2449_v56 = vadd.f32 %v3783_v42, %v2198_v39  ;;  %v2871_v32 = vsel %vm1061_vm3, %v2833_v36, 0.0 }
 0x1f7   : > { %2733 = vst.msk [vmem:[%s4829_s22 + $0x28] sm:$0xf] %vm2722_vm4, %v3240_v0  ;;  %v3238_v29 = vpack.c.bf16 %v2570_v51, %v2570_v51  ;;  %v2834_v17 = vmul.f32 %v2570_v51, %v2570_v51  ;;  %v2202_v49 = vpop.f32.mrf.mxu1  ;;  %v2836_v6 = vmul.f32 %v2572_v25, %v2572_v25  ;;  %v2770_v52 = vsel %vm1061_vm3, %v2570_v51, 0.0 }
 0x1f8   : > { %v2870_v13 = vadd.f32 %v2869_v1, %v2868_v37  ;;  %v2769_v40 = vadd.f32 %v2768_v16, %v2767_v35  ;;  %v3787_v54 = vpop.f32.mrf.mxu0  ;;  %v2513_v23 = vadd.f32 %v2481_v20, %v2449_v56  ;;  %v2447_v60 = vadd.f32 %v2358_v34, %v2190_v3  ;;  %v2484_v35 = vld [vmem:[#allocation3 + $0x90] sm:$0xff] }
 0x1f9   : > { %v2573_v53 = vld [vmem:[#allocation3 + $0x58] sm:$0xff]  ;;  %2731 = vst.msk [vmem:[%s4829_s22 + $0x20] sm:$0xf] %vm2722_vm4, %v3238_v29  ;;  %v3753_v38 = vpop.f32.mrf.mxu1  ;;  %v2873_v47 = vsel %vm1061_vm3, %v2834_v17, 0.0  ;;  %v2211_v30 = vadd.f32 %v3752_v33, %v4733_v50  ;;  %v2203_v18 = vadd.f32 %v2202_v49, %v4738_v8  ;;  %v2774_v44 = vsel %vm1061_vm3, %v2572_v25, 0.0  ;;  %v2482_v49 = vld [vmem:[#allocation3 + $0x80] sm:$0xff] }
 0x1fa   : > { %v3241_v14 = vpack.c.bf16 %v2573_v53, %v2573_v53  ;;  %v2872_v24 = vadd.f32 %v2871_v32, %v2870_v13  ;;  %v2374_v42 = vpop.f32.mrf.mxu0  ;;  %v2771_v43 = vadd.f32 %v2770_v52, %v2769_v40  ;;  %v2214_v22 = vadd.f32 %v3753_v38, %v4743_v41  ;;  %2545 = vst.msk [vmem:[#allocation3 + $0x78] sm:$0xff] %vm1061_vm3, %v2513_v23 }
 0x1fb   : > { %v2205_v9 = vpop.f32.mrf.mxu1  ;;  %v2837_v59 = vmul.f32 %v2573_v53, %v2573_v53  ;;  %v2511_v55 = vadd.f32 %v2479_v26, %v2447_v60  ;;  %v2571_v62 = vld [vmem:[#allocation3 + $0x48] sm:$0xff]  ;;  %v2576_v19 = vld [vmem:[#allocation3 + $0x70] sm:$0xff]  ;;  %v2452_v36 = vadd.f32 %v3786_v27, %v2211_v30  ;;  %v2450_v46 = vadd.f32 %v2371_v10, %v2203_v18 }
 0x1fc   : > { %2734 = vst.msk [vmem:[%s4829_s22 + $0x2c] sm:$0xf] %vm2722_vm4, %v3241_v14  ;;  %v2874_v7 = vadd.f32 %v2873_v47, %v2872_v24  ;;  %v3790_v34 = vpop.f32.mrf.mxu0  ;;  %v2453_v0 = vadd.f32 %v3787_v54, %v2214_v22  ;;  %v2206_v50 = vadd.f32 %v2205_v9, %v4748_v5  ;;  %v3239_v57 = vpack.c.bf16 %v2571_v62, %v2571_v62  ;;  %v2485_v54 = vld [vmem:[#allocation3 + $0x98] sm:$0xff] }
 0x1fd   : > { %v3756_v8 = vpop.f32.mrf.mxu1  ;;  %v2772_v41 = vsel %vm1061_vm3, %v2571_v62, 0.0  ;;  %v2835_v25 = vmul.f32 %v2571_v62, %v2571_v62  ;;  %v3244_v33 = vpack.c.bf16 %v2576_v19, %v2576_v19  ;;  %2543 = vst.msk [vmem:[#allocation3 + $0x68] sm:$0xff] %vm1061_vm3, %v2511_v55  ;;  %v2877_v51 = vsel %vm1061_vm3, %v2836_v6, 0.0  ;;  %v2574_v39 = vld [vmem:[#allocation3 + $0x60] sm:$0xff] }
 0x1fe   : > { %v2387_v37 = vpop.f32.mrf.mxu0  ;;  %v2776_v27 = vsel %vm1061_vm3, %v2573_v53, 0.0  ;;  %v2773_v12 = vadd.f32 %v2772_v41, %v2771_v43  ;;  %v2516_v10 = vadd.f32 %v2484_v35, %v2452_v36  ;;  %v2879_v1 = vsel %vm1061_vm3, %v2837_v59, 0.0  ;;  %2732 = vst.msk [vmem:[%s4829_s22 + $0x24] sm:$0xf] %vm2722_vm4, %v3239_v57  ;;  %v2483_v43 = vld [vmem:[#allocation3 + $0x88] sm:$0xff] }
 0x1ff   : > { %v2218_v5 = vpop.f32.mrf.mxu1  ;;  %v2875_v16 = vsel %vm1061_vm3, %v2835_v25, 0.0  ;;  %2737 = vst.msk [vmem:[%s4829_s22 + $0x38] sm:$0xf] %vm2722_vm4, %v3244_v33  ;;  %v3242_v29 = vpack.c.bf16 %v2574_v39, %v2574_v39  ;;  %v2838_v17 = vmul.f32 %v2574_v39, %v2574_v39  ;;  %v2782_v53 = vsel %vm1061_vm3, %v2576_v19, 0.0 }
 0x200   : > { %v3791_v13 = vpop.f32.mrf.mxu0  ;;  %v2775_v40 = vadd.f32 %v2774_v44, %v2773_v12  ;;  %v2876_v56 = vadd.f32 %v2875_v16, %v2874_v7  ;;  %2548 = vst.msk [vmem:[#allocation3 + $0x90] sm:$0xff] %vm1061_vm3, %v2516_v10  ;;  %v2514_v3 = vadd.f32 %v2482_v49, %v2450_v46  ;;  %v2840_v6 = vmul.f32 %v2576_v19, %v2576_v19  ;;  %v2489_v16 = vld [vmem:[#allocation3 + $0xb8] sm:$0xff] }
 0x201   : > { %v3757_v32 = vpop.f32.mrf.mxu1  ;;  %2735 = vst.msk [vmem:[%s4829_s22 + $0x30] sm:$0xf] %vm2722_vm4, %v3242_v29  ;;  %v2517_v52 = vadd.f32 %v2485_v54, %v2453_v0  ;;  %v2451_v14 = vadd.f32 %v2374_v42, %v2206_v50  ;;  %v2227_v20 = vadd.f32 %v3756_v8, %v4753_v45  ;;  %v2778_v23 = vsel %vm1061_vm3, %v2574_v39, 0.0  ;;  %v2577_v60 = vld [vmem:[#allocation3 + $0x78] sm:$0xff]  ;;  %v2488_v50 = vld [vmem:[#allocation3 + $0xb0] sm:$0xff]  ;;  %v2486_v8 = vld [vmem:[#allocation3 + $0xa0] sm:$0xff] }
 0x202   : > { %v2390_v38 = vpop.f32.mrf.mxu0  ;;  %v2878_v24 = vadd.f32 %v2877_v51, %v2876_v56  ;;  %v2777_v47 = vadd.f32 %v2776_v27, %v2775_v40  ;;  %2546 = vst.msk [vmem:[#allocation3 + $0x80] sm:$0xff] %vm1061_vm3, %v2514_v3  ;;  %v2219_v26 = vadd.f32 %v2218_v5, %v4758_v28  ;;  %v2881_v18 = vsel %vm1061_vm3, %v2838_v17, 0.0 }
 0x203   : > { %v2221_v30 = vpop.f32.mrf.mxu1  ;;  %v3245_v22 = vpack.c.bf16 %v2577_v60, %v2577_v60  ;;  %2549 = vst.msk [vmem:[#allocation3 + $0x98] sm:$0xff] %vm1061_vm3, %v2517_v52  ;;  %v2515_v42 = vadd.f32 %v2483_v43, %v2451_v14  ;;  %v2230_v45 = vadd.f32 %v3757_v32, %v4763_v2  ;;  %v2456_v55 = vadd.f32 %v3790_v34, %v2227_v20 }
 0x204   : > { %v3794_v9 = vpop.f32.mrf.mxu0  ;;  %v2779_v44 = vadd.f32 %v2778_v23, %v2777_v47  ;;  %v2880_v7 = vadd.f32 %v2879_v1, %v2878_v24  ;;  %v2575_v59 = vld [vmem:[#allocation3 + $0x68] sm:$0xff]  ;;  %v2454_v62 = vadd.f32 %v2387_v37, %v2219_v26  ;;  %v2841_v28 = vmul.f32 %v2577_v60, %v2577_v60 }
 0x205   : > { %v3760_v19 = vpop.f32.mrf.mxu1  ;;  %2738 = vst.msk [vmem:[%s4829_s22 + $0x3c] sm:$0xf] %vm2722_vm4, %v3245_v22  ;;  %v3243_v36 = vpack.c.bf16 %v2575_v59, %v2575_v59  ;;  %v2780_v46 = vsel %vm1061_vm3, %v2575_v59, 0.0  ;;  %v2839_v0 = vmul.f32 %v2575_v59, %v2575_v59  ;;  %v2520_v25 = vadd.f32 %v2488_v50, %v2456_v55  ;;  %v2487_v24 = vld [vmem:[#allocation3 + $0xa8] sm:$0xff] }
 0x206   : > { %2547 = vst.msk [vmem:[#allocation3 + $0x88] sm:$0xff] %vm1061_vm3, %v2515_v42  ;;  %v4928_v2 = vpop.f32.mrf.mxu0  ;;  %v2882_v57 = vadd.f32 %v2881_v18, %v2880_v7  ;;  %v2781_v41 = vadd.f32 %v2780_v46, %v2779_v44  ;;  %v2518_v34 = vadd.f32 %v2486_v8, %v2454_v62  ;;  %v2457_v51 = vadd.f32 %v3791_v13, %v2230_v45 }
 0x207   : > { %v2234_v33 = vpop.f32.mrf.mxu1  ;;  %2736 = vst.msk [vmem:[%s4829_s22 + $0x34] sm:$0xf] %vm2722_vm4, %v3243_v36  ;;  %v2883_v35 = vsel %vm1061_vm3, %v2839_v0, 0.0  ;;  %v2580_v37 = vld [vmem:[#allocation3 + $0x90] sm:$0xff]  ;;  %v2222_v27 = vadd.f32 %v2221_v30, %v4768_v58  ;;  %v2243_v12 = vadd.f32 %v3760_v19, %v4773_v11  ;;  %v2885_v17 = vsel %vm1061_vm3, %v2840_v6, 0.0 }
 0x208   : > { %v4935_v39 = vpop.f32.mrf.mxu0  ;;  %v2783_v10 = vadd.f32 %v2782_v53, %v2781_v41  ;;  %v2884_v5 = vadd.f32 %v2883_v35, %v2882_v57  ;;  %v3248_v1 = vpack.c.bf16 %v2580_v37, %v2580_v37  ;;  %2552 = vst.msk [vmem:[#allocation3 + $0xb0] sm:$0xff] %vm1061_vm3, %v2520_v25  ;;  %2550 = vst.msk [vmem:[#allocation3 + $0xa0] sm:$0xff] %vm1061_vm3, %v2518_v34  ;;  %v2784_v49 = vsel %vm1061_vm3, %v2577_v60, 0.0 }
 0x209   : > { %v3761_v29 = vpop.f32.mrf.mxu1  ;;  %v2578_v13 = vld [vmem:[#allocation3 + $0x80] sm:$0xff]  ;;  %v2521_v58 = vadd.f32 %v2489_v16, %v2457_v51  ;;  %v2455_v40 = vadd.f32 %v2390_v38, %v2222_v27  ;;  %v2460_v54 = vadd.f32 %v3794_v9, %v2243_v12  ;;  %v2887_v52 = vsel %vm1061_vm3, %v2841_v28, 0.0  ;;  %v2492_v9 = vld [vmem:[#allocation3 + $0xd0] sm:$0xff] }
 0x20a   : > { %v2886_v11 = vadd.f32 %v2885_v17, %v2884_v5  ;;  %2741 = vst.msk [vmem:[%s4829_s22 + $0x48] sm:$0xf] %vm2722_vm4, %v3248_v1  ;;  %v3246_v56 = vpack.c.bf16 %v2578_v13, %v2578_v13  ;;  %v2785_v53 = vadd.f32 %v2784_v49, %v2783_v10  ;;  %v2581_v3 = vld [vmem:[#allocation3 + $0x98] sm:$0xff]  ;;  %v2786_v14 = vsel %vm1061_vm3, %v2578_v13, 0.0  ;;  %v2406_v38 = vpop.f32.mrf.mxu0 }
 0x20b   : > { %v2237_v32 = vpop.f32.mrf.mxu1  ;;  %v2842_v6 = vmul.f32 %v2578_v13, %v2578_v13  ;;  %v3249_v20 = vpack.c.bf16 %v2581_v3, %v2581_v3  ;;  %2553 = vst.msk [vmem:[#allocation3 + $0xb8] sm:$0xff] %vm1061_vm3, %v2521_v58  ;;  %v2844_v47 = vmul.f32 %v2580_v37, %v2580_v37  ;;  %v2519_v26 = vadd.f32 %v2487_v24, %v2455_v40 }
 0x20c   : > { %2739 = vst.msk [vmem:[%s4829_s22 + $0x40] sm:$0xf] %vm2722_vm4, %v3246_v56  ;;  %v2787_v23 = vadd.f32 %v2786_v14, %v2785_v53  ;;  %v2888_v60 = vadd.f32 %v2887_v52, %v2886_v11  ;;  %v2790_v44 = vsel %vm1061_vm3, %v2580_v37, 0.0  ;;  %v2524_v55 = vadd.f32 %v2492_v9, %v2460_v54  ;;  %v3798_v50 = vpop.f32.mrf.mxu0  ;;  %v2493_v11 = vld [vmem:[#allocation3 + $0xd8] sm:$0xff]  ;;  %v2494_v9 = vld [vmem:[#allocation3 + $0xe0] sm:$0xff] }
 0x20d   : > { %v2579_v43 = vld [vmem:[#allocation3 + $0x88] sm:$0xff]  ;;  %v3764_v30 = vpop.f32.mrf.mxu1  ;;  %v2889_v18 = vsel %vm1061_vm3, %v2842_v6, 0.0  ;;  %2742 = vst.msk [vmem:[%s4829_s22 + $0x4c] sm:$0xf] %vm2722_vm4, %v3249_v20  ;;  %v2845_v62 = vmul.f32 %v2581_v3, %v2581_v3  ;;  %v2235_v46 = vadd.f32 %v2234_v33, %v4778_v4  ;;  %v2246_v0 = vadd.f32 %v3761_v29, %v4783_v31  ;;  %v2490_v29 = vld [vmem:[#allocation3 + $0xc0] sm:$0xff] }
 0x20e   : > { %v3247_v22 = vpack.c.bf16 %v2579_v43, %v2579_v43  ;;  %v2788_v42 = vsel %vm1061_vm3, %v2579_v43, 0.0  ;;  %v2843_v45 = vmul.f32 %v2579_v43, %v2579_v43  ;;  %v2890_v7 = vadd.f32 %v2889_v18, %v2888_v60  ;;  %2551 = vst.msk [vmem:[#allocation3 + $0xa8] sm:$0xff] %vm1061_vm3, %v2519_v26  ;;  %2556 = vst.msk [vmem:[#allocation3 + $0xd0] sm:$0xff] %vm1061_vm3, %v2524_v55  ;;  %v2419_v17 = vpop.f32.mrf.mxu0  ;;  %v2491_v6 = vld [vmem:[#allocation3 + $0xc8] sm:$0xff] }
 0x20f   : > { %v2789_v59 = vadd.f32 %v2788_v42, %v2787_v23  ;;  %v2584_v28 = vld [vmem:[#allocation3 + $0xb0] sm:$0xff]  ;;  %v2582_v36 = vld [vmem:[#allocation3 + $0xa0] sm:$0xff]  ;;  %v2250_v8 = vpop.f32.mrf.mxu1  ;;  %v2893_v57 = vsel %vm1061_vm3, %v2844_v47, 0.0  ;;  %v2792_v35 = vsel %vm1061_vm3, %v2581_v3, 0.0  ;;  %v2238_v27 = vadd.f32 %v2237_v32, %v4788_v61 }
 0x210   : > { %2740 = vst.msk [vmem:[%s4829_s22 + $0x44] sm:$0xf] %vm2722_vm4, %v3247_v22  ;;  %v2891_v19 = vsel %vm1061_vm3, %v2843_v45, 0.0  ;;  %v3252_v34 = vpack.c.bf16 %v2584_v28, %v2584_v28  ;;  %v3250_v37 = vpack.c.bf16 %v2582_v36, %v2582_v36  ;;  %v2846_v51 = vmul.f32 %v2582_v36, %v2582_v36  ;;  %v3799_v60 = vpop.f32.mrf.mxu0 }
 0x211   : > { %v2791_v41 = vadd.f32 %v2790_v44, %v2789_v59  ;;  %v2892_v25 = vadd.f32 %v2891_v19, %v2890_v7  ;;  %v2458_v33 = vadd.f32 %v4928_v2, %v2235_v46  ;;  %v2461_v10 = vadd.f32 %v4935_v39, %v2246_v0  ;;  %v3765_v61 = vpop.f32.mrf.mxu1 }
 0x212   : > { %2745 = vst.msk [vmem:[%s4829_s22 + $0x58] sm:$0xf] %vm2722_vm4, %v3252_v34  ;;  %v2585_v31 = vld [vmem:[#allocation3 + $0xb8] sm:$0xff]  ;;  %v2895_v5 = vsel %vm1061_vm3, %v2845_v62, 0.0  ;;  %2743 = vst.msk [vmem:[%s4829_s22 + $0x50] sm:$0xf] %vm2722_vm4, %v3250_v37  ;;  %v2459_v56 = vadd.f32 %v2406_v38, %v2238_v27  ;;  %v2259_v53 = vadd.f32 %v3764_v30, %v4793_v63  ;;  %v2251_v3 = vadd.f32 %v2250_v8, %v4798_v15  ;;  %v2422_v46 = vpop.f32.mrf.mxu0 }
 0x213   : > { %v2894_v12 = vadd.f32 %v2893_v57, %v2892_v25  ;;  %v2793_v4 = vadd.f32 %v2792_v35, %v2791_v41  ;;  %v2794_v1 = vsel %vm1061_vm3, %v2582_v36, 0.0  ;;  %v3253_v16 = vpack.c.bf16 %v2585_v31, %v2585_v31  ;;  %v2253_v63 = vpop.f32.mrf.mxu1  ;;  %v2496_v30 = vld [vmem:[#allocation3 + $0xf0] sm:$0xff] }
 0x214   : > { %v2897_v58 = vsel %vm1061_vm3, %v2846_v51, 0.0  ;;  %v2522_v40 = vadd.f32 %v2490_v29, %v2458_v33  ;;  %v2525_v39 = vadd.f32 %v2493_v11, %v2461_v10  ;;  %v2848_v54 = vmul.f32 %v2584_v28, %v2584_v28 }
 0x215   : > { %v2795_v49 = vadd.f32 %v2794_v1, %v2793_v4  ;;  %v2896_v13 = vadd.f32 %v2895_v5, %v2894_v12  ;;  %2746 = vst.msk [vmem:[%s4829_s22 + $0x5c] sm:$0xf] %vm2722_vm4, %v3253_v16  ;;  %v2583_v2 = vld [vmem:[#allocation3 + $0xa8] sm:$0xff]  ;;  %v2588_v47 = vld [vmem:[#allocation3 + $0xd0] sm:$0xff]  ;;  %v2523_v23 = vadd.f32 %v2491_v6, %v2459_v56  ;;  %v2464_v38 = vadd.f32 %v3798_v50, %v2259_v53 }
 0x216   : > { %v3251_v52 = vpack.c.bf16 %v2583_v2, %v2583_v2  ;;  %v2796_v14 = vsel %vm1061_vm3, %v2583_v2, 0.0  ;;  %2554 = vst.msk [vmem:[#allocation3 + $0xc0] sm:$0xff] %vm1061_vm3, %v2522_v40  ;;  %v2847_v24 = vmul.f32 %v2583_v2, %v2583_v2  ;;  %2557 = vst.msk [vmem:[#allocation3 + $0xd8] sm:$0xff] %vm1061_vm3, %v2525_v39  ;;  %v2798_v15 = vsel %vm1061_vm3, %v2584_v28, 0.0  ;;  %v2495_v12 = vld [vmem:[#allocation3 + $0xe8] sm:$0xff] }
 0x217   : > { %v2898_v32 = vadd.f32 %v2897_v58, %v2896_v13  ;;  %v2797_v20 = vadd.f32 %v2796_v14, %v2795_v49  ;;  %v2849_v43 = vmul.f32 %v2585_v31, %v2585_v31  ;;  %v3256_v26 = vpack.c.bf16 %v2588_v47, %v2588_v47  ;;  %2555 = vst.msk [vmem:[#allocation3 + $0xc8] sm:$0xff] %vm1061_vm3, %v2523_v23 }
 0x218   : > { %2744 = vst.msk [vmem:[%s4829_s22 + $0x54] sm:$0xf] %vm2722_vm4, %v3251_v52  ;;  %v2462_v18 = vadd.f32 %v2419_v17, %v2251_v3  ;;  %v2899_v42 = vsel %vm1061_vm3, %v2847_v24, 0.0  ;;  %v2528_v45 = vadd.f32 %v2496_v30, %v2464_v38  ;;  %v2262_v44 = vadd.f32 %v3765_v61, %v4803_v48  ;;  %v2497_v48 = vld [vmem:[#allocation3 + $0xf8] sm:$0xff] }
 0x219   : > { %v2799_v22 = vadd.f32 %v2798_v15, %v2797_v20  ;;  %v2800_v7 = vsel %vm1061_vm3, %v2585_v31, 0.0  ;;  %v2900_v59 = vadd.f32 %v2899_v42, %v2898_v32  ;;  %2749 = vst.msk [vmem:[%s4829_s22 + $0x68] sm:$0xf] %vm2722_vm4, %v3256_v26  ;;  %v2254_v62 = vadd.f32 %v2253_v63, %v4808_v21 }
 0x21a   : > { %v2526_v55 = vadd.f32 %v2494_v9, %v2462_v18  ;;  %v2901_v19 = vsel %vm1061_vm3, %v2848_v54, 0.0  ;;  %2560 = vst.msk [vmem:[#allocation3 + $0xf0] sm:$0xff] %vm1061_vm3, %v2528_v45  ;;  %v2465_v36 = vadd.f32 %v3799_v60, %v2262_v44  ;;  %v2903_v8 = vsel %vm1061_vm3, %v2849_v43, 0.0 }
 0x21b   : > { %v2801_v28 = vadd.f32 %v2800_v7, %v2799_v22  ;;  %v2902_v0 = vadd.f32 %v2901_v19, %v2900_v59  ;;  %v2463_v50 = vadd.f32 %v2422_v46, %v2254_v62  ;;  %v2852_v16 = vmul.f32 %v2588_v47, %v2588_v47 }
 0x21c   : > { %2558 = vst.msk [vmem:[#allocation3 + $0xe0] sm:$0xff] %vm1061_vm3, %v2526_v55  ;;  %v2529_v41 = vadd.f32 %v2497_v48, %v2465_v36  ;;  %v2806_v49 = vsel %vm1061_vm3, %v2588_v47, 0.0 }
 0x21d   : > { %v2586_v57 = vld [vmem:[#allocation3 + $0xc0] sm:$0xff]  ;;  %v2904_v35 = vadd.f32 %v2903_v8, %v2902_v0  ;;  %v2589_v37 = vld [vmem:[#allocation3 + $0xd8] sm:$0xff]  ;;  %v2527_v33 = vadd.f32 %v2495_v12, %v2463_v50  ;;  %v2909_v3 = vsel %vm1061_vm3, %v2852_v16, 0.0 }
 0x21e   : > { %v3254_v25 = vpack.c.bf16 %v2586_v57, %v2586_v57  ;;  %v2802_v21 = vsel %vm1061_vm3, %v2586_v57, 0.0  ;;  %v2850_v34 = vmul.f32 %v2586_v57, %v2586_v57  ;;  %v3257_v27 = vpack.c.bf16 %v2589_v37, %v2589_v37  ;;  %2561 = vst.msk [vmem:[#allocation3 + $0xf8] sm:$0xff] %vm1061_vm3, %v2529_v41  ;;  %v2587_v31 = vld [vmem:[#allocation3 + $0xc8] sm:$0xff] }
 0x21f   : > { %v2803_v51 = vadd.f32 %v2802_v21, %v2801_v28  ;;  %v3255_v5 = vpack.c.bf16 %v2587_v31, %v2587_v31  ;;  %v2804_v1 = vsel %vm1061_vm3, %v2587_v31, 0.0  ;;  %v2851_v17 = vmul.f32 %v2587_v31, %v2587_v31  ;;  %2559 = vst.msk [vmem:[#allocation3 + $0xe8] sm:$0xff] %vm1061_vm3, %v2527_v33 }
 0x220   : > { %2747 = vst.msk [vmem:[%s4829_s22 + $0x60] sm:$0xf] %vm2722_vm4, %v3254_v25  ;;  %v2905_v4 = vsel %vm1061_vm3, %v2850_v34, 0.0  ;;  %2750 = vst.msk [vmem:[%s4829_s22 + $0x6c] sm:$0xf] %vm2722_vm4, %v3257_v27  ;;  %v2853_v40 = vmul.f32 %v2589_v37, %v2589_v37  ;;  %v2808_v56 = vsel %vm1061_vm3, %v2589_v37, 0.0 }
 0x221   : > { %v2906_v10 = vadd.f32 %v2905_v4, %v2904_v35  ;;  %v2805_v29 = vadd.f32 %v2804_v1, %v2803_v51  ;;  %v2592_v61 = vld [vmem:[#allocation3 + $0xf0] sm:$0xff]  ;;  %2748 = vst.msk [vmem:[%s4829_s22 + $0x64] sm:$0xf] %vm2722_vm4, %v3255_v5  ;;  %v2907_v2 = vsel %vm1061_vm3, %v2851_v17, 0.0 }
 0x222   : > { %v3260_v13 = vpack.c.bf16 %v2592_v61, %v2592_v61  ;;  %v2911_v24 = vsel %vm1061_vm3, %v2853_v40, 0.0  ;;  %v2856_v23 = vmul.f32 %v2592_v61, %v2592_v61  ;;  %v2814_v22 = vsel %vm1061_vm3, %v2592_v61, 0.0 }
 0x223   : > { %v2590_v58 = vld [vmem:[#allocation3 + $0xe0] sm:$0xff]  ;;  %v2807_v11 = vadd.f32 %v2806_v49, %v2805_v29  ;;  %v2908_v53 = vadd.f32 %v2907_v2, %v2906_v10 }
 0x224   : > { %v3258_v39 = vpack.c.bf16 %v2590_v58, %v2590_v58  ;;  %2753 = vst.msk [vmem:[%s4829_s22 + $0x78] sm:$0xf] %vm2722_vm4, %v3260_v13  ;;  %v2854_v32 = vmul.f32 %v2590_v58, %v2590_v58  ;;  %v2810_v6 = vsel %vm1061_vm3, %v2590_v58, 0.0  ;;  %v2917_v7 = vsel %vm1061_vm3, %v2856_v23, 0.0 }
 0x225   : > { %v2809_v54 = vadd.f32 %v2808_v56, %v2807_v11  ;;  %v2593_v52 = vld [vmem:[#allocation3 + $0xf8] sm:$0xff]  ;;  %v2910_v14 = vadd.f32 %v2909_v3, %v2908_v53 }
 0x226   : > { %2751 = vst.msk [vmem:[%s4829_s22 + $0x70] sm:$0xf] %vm2722_vm4, %v3258_v39  ;;  %v3261_v20 = vpack.c.bf16 %v2593_v52, %v2593_v52  ;;  %v2591_v60 = vld [vmem:[#allocation3 + $0xe8] sm:$0xff]  ;;  %v2913_v63 = vsel %vm1061_vm3, %v2854_v32, 0.0  ;;  %v2857_v42 = vmul.f32 %v2593_v52, %v2593_v52  ;;  %v2816_v59 = vsel %vm1061_vm3, %v2593_v52, 0.0 }
 0x227   : > { %v2811_v47 = vadd.f32 %v2810_v6, %v2809_v54  ;;  %v2912_v38 = vadd.f32 %v2911_v24, %v2910_v14  ;;  %v3259_v15 = vpack.c.bf16 %v2591_v60, %v2591_v60  ;;  %v2812_v43 = vsel %vm1061_vm3, %v2591_v60, 0.0 }
 0x228   : > { %2754 = vst.msk [vmem:[%s4829_s22 + $0x7c] sm:$0xf] %vm2722_vm4, %v3261_v20  ;;  %v2855_v26 = vmul.f32 %v2591_v60, %v2591_v60  ;;  %v2919_v19 = vsel %vm1061_vm3, %v2857_v42, 0.0 }
 0x229   : > { %v2914_v30 = vadd.f32 %v2913_v63, %v2912_v38  ;;  %v2813_v18 = vadd.f32 %v2812_v43, %v2811_v47  ;;  %2752 = vst.msk [vmem:[%s4829_s22 + $0x74] sm:$0xf] %vm2722_vm4, %v3259_v15 }
 0x22a   : > { %v2915_v45 = vsel %vm1061_vm3, %v2855_v26, 0.0 }
 0x22b   : > { %v2815_v9 = vadd.f32 %v2814_v22, %v2813_v18  ;;  %v2916_v44 = vadd.f32 %v2915_v45, %v2914_v30 }
 0x22d   : > { %v2817_v55 = vadd.f32 %v2816_v59, %v2815_v9  ;;  %v2918_v62 = vadd.f32 %v2917_v7, %v2916_v44 }
 0x22f   : > { %v2818_v28 = vrot.slane %v2817_v55, 4  ;;  %v2920_v36 = vadd.f32 %v2919_v19, %v2918_v62 }
 0x231   : > { %v2819_v46 = vadd.f32 %v2818_v28, %v2817_v55  ;;  %v2921_v0 = vrot.slane %v2920_v36, 4 }
 0x233   : > { %v2820_v48 = vrot.slane %v2819_v46, 2  ;;  %v2922_v50 = vadd.f32 %v2921_v0, %v2920_v36 }
 0x235   : > { %v2821_v8 = vadd.f32 %v2820_v48, %v2819_v46  ;;  %v2923_v57 = vrot.slane %v2922_v50, 2 }
 0x237   : > { %v2822_v41 = vrot.slane %v2821_v8, 1  ;;  %v2924_v25 = vadd.f32 %v2923_v57, %v2922_v50 }
 0x239   : > { %v2823_v21 = vadd.f32 %v2822_v41, %v2821_v8  ;;  %v2925_v34 = vrot.slane %v2924_v25, 1 }
 0x23b   : > { %2825 = vst.msk [vmem:[%s265_s25] sm:$0x1] %vm2824_vm5, %v2823_v21  ;;  %v2926_v35 = vadd.f32 %v2925_v34, %v2924_v25 }
 0x23d   : > { %2927 = vst.msk [vmem:[%s268_s28] sm:$0x1] %vm2824_vm5, %v2926_v35 }
 0x23e PF: > { %s17_s21 = sadd.s32 1, %s3827_s21  }
 0x23f   : > { %p14_p4 = scmp.ge.s32.totalorder %s17_s21, 4  }
 0x241   :  { %16 = sbr.rel (!%p14_p4) target bundleno = 1 (0x1), region = 99 }

</bundles_post_ra>
